<compile_context>
chip_gen: v6e
topology: v6e:2x2x1
jax: 0.10.0
libtpu: 0.0.40
codegen_flags: <defaults>
</compile_context>

<pallas_src>
import functools

import jax
import jax.numpy as jnp
from jax.experimental import pallas as pl
from jax.experimental.pallas import tpu as pltpu  # noqa: F401  (TPU backend)

NP = 128   # padded output-channel / feature width (lane-dense stores)
K1P = 32   # conv1 im2col K: 25 -> 32 (multiple of 8)
C1P = 8    # conv1 output channels carried into conv2 im2col: 6 valid + 2 zero


# ----------------------------------------------------------------------------
# Kernel 1/2: fused conv (im2col matmul) + 2x2 max-pool + ReLU
# ----------------------------------------------------------------------------
def _conv_pool_relu_kernel(p_ref, w_ref, b_ref, o_ref):
    # p_ref: (4, M, K) bf16 — one im2col patch matrix per 2x2 pool position
    # w_ref: (K, 128) bf16, b_ref: (1, 128) f32, o_ref: (M, 128) f32
    w = w_ref[...]
    y = jnp.maximum(
        jnp.maximum(jnp.dot(p_ref[0], w, preferred_element_type=jnp.float32),
                    jnp.dot(p_ref[1], w, preferred_element_type=jnp.float32)),
        jnp.maximum(jnp.dot(p_ref[2], w, preferred_element_type=jnp.float32),
                    jnp.dot(p_ref[3], w, preferred_element_type=jnp.float32)))
    o_ref[...] = jnp.maximum(y + b_ref[...], 0.0)   # bias + ReLU in f32 (VPU)


def conv_pool_relu(patches, w, b):
    """patches: (4, M, K) bf16; w: (K, 128) bf16; b: (1, 128) f32 -> (M, 128) f32."""
    _, M, K = patches.shape
    N = w.shape[1]
    ce = pl.CostEstimate(
        flops=4 * 2 * M * K * N,
        transcendentals=0,
        bytes_accessed=patches.size * 2 + w.size * 2 + b.size * 4 + M * N * 4)
    return pl.pallas_call(
        _conv_pool_relu_kernel,
        out_shape=jax.ShapeDtypeStruct((M, N), jnp.float32),
        in_specs=[pl.BlockSpec((4, M, K), lambda: (0, 0, 0)),
                  pl.BlockSpec((K, N), lambda: (0, 0)),
                  pl.BlockSpec((1, N), lambda: (0, 0))],
        out_specs=pl.BlockSpec((M, N), lambda: (0, 0)),
        cost_estimate=ce,
    )(patches, w, b)


# ----------------------------------------------------------------------------
# Kernel 3: fused FC stack  fc1 -> ReLU -> fc2 -> ReLU -> fc3
# ----------------------------------------------------------------------------
def _fc_fused_kernel(x_ref, w1_ref, b1_ref, w2_ref, b2_ref, w3_ref, b3_ref, o_ref):
    h = jnp.dot(x_ref[...], w1_ref[...], preferred_element_type=jnp.float32)
    h = jnp.maximum(h + b1_ref[...], 0.0)
    h = jnp.dot(h.astype(jnp.bfloat16), w2_ref[...], preferred_element_type=jnp.float32)
    h = jnp.maximum(h + b2_ref[...], 0.0)
    h = jnp.dot(h.astype(jnp.bfloat16), w3_ref[...], preferred_element_type=jnp.float32)
    o_ref[...] = h + b3_ref[...]


def fc_fused(x, w1, b1, w2, b2, w3, b3):
    B, K = x.shape
    ce = pl.CostEstimate(
        flops=2 * B * (K * NP + NP * NP + NP * NP),
        transcendentals=0,
        bytes_accessed=(x.size * 2 + (w1.size + w2.size + w3.size) * 2
                        + (b1.size + b2.size + b3.size) * 4 + B * NP * 4))
    return pl.pallas_call(
        _fc_fused_kernel,
        out_shape=jax.ShapeDtypeStruct((B, NP), jnp.float32),
        in_specs=[pl.BlockSpec((B, K), lambda: (0, 0)),
                  pl.BlockSpec((K, NP), lambda: (0, 0)),
                  pl.BlockSpec((1, NP), lambda: (0, 0)),
                  pl.BlockSpec((NP, NP), lambda: (0, 0)),
                  pl.BlockSpec((1, NP), lambda: (0, 0)),
                  pl.BlockSpec((NP, NP), lambda: (0, 0)),
                  pl.BlockSpec((1, NP), lambda: (0, 0))],
        out_specs=pl.BlockSpec((B, NP), lambda: (0, 0)),
        cost_estimate=ce,
    )(x, w1, b1, w2, b2, w3, b3)


# ----------------------------------------------------------------------------
# Host-side glue: im2col for a 5x5 "same" conv with the 2x2 pool window folded in
# ----------------------------------------------------------------------------
def build_pool_patches(x_nhwc):
    """(B,H,W,C) -> (4, B*(H//2)*(W//2), 25*C), cols ordered (kh, kw, cin)."""
    B, H, W, C = x_nhwc.shape
    Ho, Wo = H // 2, W // 2
    xp = jnp.pad(x_nhwc, ((0, 0), (2, 2), (2, 2), (0, 0)))
    cols = [xp[:, kh:kh + H, kw:kw + W, :] for kh in range(5) for kw in range(5)]
    patches = jnp.stack(cols, axis=3)                               # (B,H,W,25,C)
    pos = [patches[:, dh::2, dw::2, :, :] for dh in (0, 1) for dw in (0, 1)]
    pp = jnp.stack(pos, axis=0)                                     # (4,B,Ho,Wo,25,C)
    return pp.reshape(4, B * Ho * Wo, 25 * C)


# ----------------------------------------------------------------------------
# Deterministic parameter init (shapes from MyTestNet.__init__), pre-padded/packed
# ----------------------------------------------------------------------------
def init_params(key):
    ks = jax.random.split(key, 10)

    def rnd(k, shape, fan_in):
        return jax.random.normal(k, shape, jnp.float32) / jnp.sqrt(jnp.float32(fan_in))

    # torch-layout parameters
    w1_t = rnd(ks[0], (6, 1, 5, 5), 25)       # Conv2d(1, 6, 5, padding=2)
    b1_t = rnd(ks[1], (6,), 25)
    w2_t = rnd(ks[2], (16, 6, 5, 5), 150)     # Conv2d(6, 16, 5, padding=2)
    b2_t = rnd(ks[3], (16,), 150)
    wf1_t = rnd(ks[4], (120, 784), 784)       # Linear(784, 120), (out, in)
    bf1_t = rnd(ks[5], (120,), 784)
    wf2_t = rnd(ks[6], (84, 120), 120)        # Linear(120, 84)
    bf2_t = rnd(ks[7], (84,), 120)
    wf3_t = rnd(ks[8], (10, 84), 84)          # Linear(84, 10)
    bf3_t = rnd(ks[9], (10,), 84)

    p = {}
    # conv1: (Cout,Cin,KH,KW) -> (KH,KW,Cin,Cout) -> (25,6); pad K 25->32, N 6->128
    w1 = jnp.transpose(w1_t, (2, 3, 1, 0)).reshape(25, 6)
    p["w1"] = jnp.pad(w1, ((0, K1P - 25), (0, NP - 6))).astype(jnp.bfloat16)
    p["b1"] = jnp.pad(b1_t, (0, NP - 6)).reshape(1, NP)

    # conv2: input channels padded 6->8 (extra lanes of stage-1 output are zero)
    w2 = jnp.transpose(w2_t, (2, 3, 1, 0))                     # (5,5,6,16)
    w2 = jnp.pad(w2, ((0, 0), (0, 0), (0, C1P - 6), (0, 0)))   # (5,5,8,16)
    w2 = w2.reshape(25 * C1P, 16)                              # K = 200
    p["w2"] = jnp.pad(w2, ((0, 0), (0, NP - 16))).astype(jnp.bfloat16)
    p["b2"] = jnp.pad(b2_t, (0, NP - 16)).reshape(1, NP)

    # fc1: fold the PyTorch NCHW flatten (c,h,w order) and the channel padding
    # (16 -> 128) into a one-time permutation of wf1's rows: row = h*7*128 + w*128 + c
    wf1 = wf1_t.reshape(120, 16, 7, 7)
    wf1 = jnp.transpose(wf1, (2, 3, 1, 0))                     # (7,7,16,120) = (h,w,c,out)
    wf1 = jnp.pad(wf1, ((0, 0), (0, 0), (0, NP - 16), (0, 0)))  # (7,7,128,120)
    wf1 = wf1.reshape(7 * 7 * NP, 120)
    p["wf1"] = jnp.pad(wf1, ((0, 0), (0, NP - 120))).astype(jnp.bfloat16)
    p["bf1"] = jnp.pad(bf1_t, (0, NP - 120)).reshape(1, NP)

    p["wf2"] = jnp.pad(wf2_t.T, ((0, NP - 120), (0, NP - 84))).astype(jnp.bfloat16)
    p["bf2"] = jnp.pad(bf2_t, (0, NP - 84)).reshape(1, NP)

    p["wf3"] = jnp.pad(wf3_t.T, ((0, NP - 84), (0, NP - 10))).astype(jnp.bfloat16)
    p["bf3"] = jnp.pad(bf3_t, (0, NP - 10)).reshape(1, NP)
    return p


# ----------------------------------------------------------------------------
# Forward pass (matches MyTestNet convol -> flatten -> fc semantics)
# ----------------------------------------------------------------------------
def forward(params, x_nchw):
    B = x_nchw.shape[0]
    x = jnp.transpose(x_nchw, (0, 2, 3, 1)).astype(jnp.float32)      # (B,28,28,1)

    # stage 1: conv1 + maxpool(2) + ReLU, one kernel
    p1 = build_pool_patches(x)                                       # (4, B*196, 25)
    p1 = jnp.pad(p1, ((0, 0), (0, 0), (0, K1P - 25)))                # K 25 -> 32
    y1 = conv_pool_relu(p1.astype(jnp.bfloat16), params["w1"], params["b1"])
    # y1: (B*196, 128); lanes 0..5 valid, the rest are exactly zero

    # stage 2: conv2 + maxpool(2) + ReLU, one kernel
    f1 = y1.reshape(B, 14, 14, NP)[..., :C1P]                        # 6 valid + 2 zero chans
    p2 = build_pool_patches(f1)                                      # (4, B*49, 200)
    y2 = conv_pool_relu(p2.astype(jnp.bfloat16), params["w2"], params["b2"])
    # y2: (B*49, 128); lanes 0..15 valid

    # fused FC stack; channel padding + NCHW flatten are folded into wf1's rows
    x_fc = y2.reshape(B, 7 * 7 * NP).astype(jnp.bfloat16)            # (B, 6272)
    out = fc_fused(x_fc, params["wf1"], params["bf1"],
                   params["wf2"], params["bf2"],
                   params["wf3"], params["bf3"])                     # (B, 128)
    return out[:, :10]


if __name__ == "__main__":
    key = jax.random.PRNGKey(0)
    k_params, k_x = jax.random.split(key)
    params = init_params(k_params)
    # MNIST-like input: batch=2, 1 channel, 28x28 (forced by fc_1 in_features=784)
    x = jax.random.normal(k_x, (2, 1, 28, 28), jnp.float32)

    out = jax.jit(forward)(params, x)
    out = jax.block_until_ready(out)
    assert out.shape == (2, 10) and out.dtype == jnp.float32
    print("KERNEL_OK")
</pallas_src>

<mosaic_0001>
module attributes {stable_mosaic.version = 11 : i64} {
  func.func @_conv_pool_relu_kernel(%arg0: memref<4x392x32xbf16, #tpu.memory_space<vmem>>, %arg1: memref<32x128xbf16, #tpu.memory_space<vmem>>, %arg2: memref<1x128xf32, #tpu.memory_space<vmem>>, %arg3: memref<392x128xf32, #tpu.memory_space<vmem>>) attributes {dimension_semantics = [], scalar_prefetch = 0 : i64, scratch_operands = 0 : i64, tpu.core_type = #tpu.core_type<tc>} {
    %c0 = arith.constant 0 : index
    %c0_0 = arith.constant 0 : index
    %0 = vector.load %arg1[%c0, %c0_0] : memref<32x128xbf16, #tpu.memory_space<vmem>>, vector<32x128xbf16>
    %c0_1 = arith.constant 0 : index
    %c0_2 = arith.constant 0 : index
    %c0_3 = arith.constant 0 : index
    %1 = vector.load %arg0[%c0_1, %c0_2, %c0_3] : memref<4x392x32xbf16, #tpu.memory_space<vmem>>, vector<1x392x32xbf16>
    %2 = vector.shape_cast %1 : vector<1x392x32xbf16> to vector<392x32xbf16>
    %cst = arith.constant dense<0.000000e+00> : vector<392x128xf32>
    %3 = tpu.matmul %2, %0, %cst {dimension_numbers = #tpu.dot_dimension_numbers<[1], [0], [0], [1], [0, 0, 1, 1], [], []>} : vector<392x32xbf16>, vector<32x128xbf16>, vector<392x128xf32> -> vector<392x128xf32>
    %c1 = arith.constant 1 : index
    %c0_4 = arith.constant 0 : index
    %c0_5 = arith.constant 0 : index
    %4 = vector.load %arg0[%c1, %c0_4, %c0_5] : memref<4x392x32xbf16, #tpu.memory_space<vmem>>, vector<1x392x32xbf16>
    %5 = vector.shape_cast %4 : vector<1x392x32xbf16> to vector<392x32xbf16>
    %cst_6 = arith.constant dense<0.000000e+00> : vector<392x128xf32>
    %6 = tpu.matmul %5, %0, %cst_6 {dimension_numbers = #tpu.dot_dimension_numbers<[1], [0], [0], [1], [0, 0, 1, 1], [], []>} : vector<392x32xbf16>, vector<32x128xbf16>, vector<392x128xf32> -> vector<392x128xf32>
    %7 = arith.maximumf %3, %6 : vector<392x128xf32>
    %c2 = arith.constant 2 : index
    %c0_7 = arith.constant 0 : index
    %c0_8 = arith.constant 0 : index
    %8 = vector.load %arg0[%c2, %c0_7, %c0_8] : memref<4x392x32xbf16, #tpu.memory_space<vmem>>, vector<1x392x32xbf16>
    %9 = vector.shape_cast %8 : vector<1x392x32xbf16> to vector<392x32xbf16>
    %cst_9 = arith.constant dense<0.000000e+00> : vector<392x128xf32>
    %10 = tpu.matmul %9, %0, %cst_9 {dimension_numbers = #tpu.dot_dimension_numbers<[1], [0], [0], [1], [0, 0, 1, 1], [], []>} : vector<392x32xbf16>, vector<32x128xbf16>, vector<392x128xf32> -> vector<392x128xf32>
    %c3 = arith.constant 3 : index
    %c0_10 = arith.constant 0 : index
    %c0_11 = arith.constant 0 : index
    %11 = vector.load %arg0[%c3, %c0_10, %c0_11] : memref<4x392x32xbf16, #tpu.memory_space<vmem>>, vector<1x392x32xbf16>
    %12 = vector.shape_cast %11 : vector<1x392x32xbf16> to vector<392x32xbf16>
    %cst_12 = arith.constant dense<0.000000e+00> : vector<392x128xf32>
    %13 = tpu.matmul %12, %0, %cst_12 {dimension_numbers = #tpu.dot_dimension_numbers<[1], [0], [0], [1], [0, 0, 1, 1], [], []>} : vector<392x32xbf16>, vector<32x128xbf16>, vector<392x128xf32> -> vector<392x128xf32>
    %14 = arith.maximumf %10, %13 : vector<392x128xf32>
    %15 = arith.maximumf %7, %14 : vector<392x128xf32>
    %c0_13 = arith.constant 0 : index
    %c0_14 = arith.constant 0 : index
    %16 = vector.load %arg2[%c0_13, %c0_14] : memref<1x128xf32, #tpu.memory_space<vmem>>, vector<1x128xf32>
    %17 = vector.broadcast %16 : vector<1x128xf32> to vector<392x128xf32>
    %18 = arith.addf %15, %17 : vector<392x128xf32>
    %cst_15 = arith.constant 0.000000e+00 : f32
    %19 = vector.broadcast %cst_15 : f32 to vector<392x128xf32>
    %20 = arith.maximumf %18, %19 : vector<392x128xf32>
    %c0_16 = arith.constant 0 : index
    %c0_17 = arith.constant 0 : index
    %21 = vector.load %arg3[%c0_16, %c0_17] : memref<392x128xf32, #tpu.memory_space<vmem>>, vector<392x128xf32>
    tpu.vector_store %arg3[%c0_16, %c0_17], %20 {strides = array<i32>} : memref<392x128xf32, #tpu.memory_space<vmem>>, vector<392x128xf32>,
    return
  }
}

module attributes {stable_mosaic.version = 11 : i64} {
  func.func @_conv_pool_relu_kernel(%arg0: memref<4x98x200xbf16, #tpu.memory_space<vmem>>, %arg1: memref<200x128xbf16, #tpu.memory_space<vmem>>, %arg2: memref<1x128xf32, #tpu.memory_space<vmem>>, %arg3: memref<98x128xf32, #tpu.memory_space<vmem>>) attributes {dimension_semantics = [], scalar_prefetch = 0 : i64, scratch_operands = 0 : i64, tpu.core_type = #tpu.core_type<tc>} {
    %c0 = arith.constant 0 : index
    %c0_0 = arith.constant 0 : index
    %0 = vector.load %arg1[%c0, %c0_0] : memref<200x128xbf16, #tpu.memory_space<vmem>>, vector<200x128xbf16>
    %c0_1 = arith.constant 0 : index
    %c0_2 = arith.constant 0 : index
    %c0_3 = arith.constant 0 : index
    %1 = vector.load %arg0[%c0_1, %c0_2, %c0_3] : memref<4x98x200xbf16, #tpu.memory_space<vmem>>, vector<1x98x200xbf16>
    %2 = vector.shape_cast %1 : vector<1x98x200xbf16> to vector<98x200xbf16>
    %cst = arith.constant dense<0.000000e+00> : vector<98x128xf32>
    %3 = tpu.matmul %2, %0, %cst {dimension_numbers = #tpu.dot_dimension_numbers<[1], [0], [0], [1], [0, 0, 1, 1], [], []>} : vector<98x200xbf16>, vector<200x128xbf16>, vector<98x128xf32> -> vector<98x128xf32>
    %c1 = arith.constant 1 : index
    %c0_4 = arith.constant 0 : index
    %c0_5 = arith.constant 0 : index
    %4 = vector.load %arg0[%c1, %c0_4, %c0_5] : memref<4x98x200xbf16, #tpu.memory_space<vmem>>, vector<1x98x200xbf16>
    %5 = vector.shape_cast %4 : vector<1x98x200xbf16> to vector<98x200xbf16>
    %cst_6 = arith.constant dense<0.000000e+00> : vector<98x128xf32>
    %6 = tpu.matmul %5, %0, %cst_6 {dimension_numbers = #tpu.dot_dimension_numbers<[1], [0], [0], [1], [0, 0, 1, 1], [], []>} : vector<98x200xbf16>, vector<200x128xbf16>, vector<98x128xf32> -> vector<98x128xf32>
    %7 = arith.maximumf %3, %6 : vector<98x128xf32>
    %c2 = arith.constant 2 : index
    %c0_7 = arith.constant 0 : index
    %c0_8 = arith.constant 0 : index
    %8 = vector.load %arg0[%c2, %c0_7, %c0_8] : memref<4x98x200xbf16, #tpu.memory_space<vmem>>, vector<1x98x200xbf16>
    %9 = vector.shape_cast %8 : vector<1x98x200xbf16> to vector<98x200xbf16>
    %cst_9 = arith.constant dense<0.000000e+00> : vector<98x128xf32>
    %10 = tpu.matmul %9, %0, %cst_9 {dimension_numbers = #tpu.dot_dimension_numbers<[1], [0], [0], [1], [0, 0, 1, 1], [], []>} : vector<98x200xbf16>, vector<200x128xbf16>, vector<98x128xf32> -> vector<98x128xf32>
    %c3 = arith.constant 3 : index
    %c0_10 = arith.constant 0 : index
    %c0_11 = arith.constant 0 : index
    %11 = vector.load %arg0[%c3, %c0_10, %c0_11] : memref<4x98x200xbf16, #tpu.memory_space<vmem>>, vector<1x98x200xbf16>
    %12 = vector.shape_cast %11 : vector<1x98x200xbf16> to vector<98x200xbf16>
    %cst_12 = arith.constant dense<0.000000e+00> : vector<98x128xf32>
    %13 = tpu.matmul %12, %0, %cst_12 {dimension_numbers = #tpu.dot_dimension_numbers<[1], [0], [0], [1], [0, 0, 1, 1], [], []>} : vector<98x200xbf16>, vector<200x128xbf16>, vector<98x128xf32> -> vector<98x128xf32>
    %14 = arith.maximumf %10, %13 : vector<98x128xf32>
    %15 = arith.maximumf %7, %14 : vector<98x128xf32>
    %c0_13 = arith.constant 0 : index
    %c0_14 = arith.constant 0 : index
    %16 = vector.load %arg2[%c0_13, %c0_14] : memref<1x128xf32, #tpu.memory_space<vmem>>, vector<1x128xf32>
    %17 = vector.broadcast %16 : vector<1x128xf32> to vector<98x128xf32>
    %18 = arith.addf %15, %17 : vector<98x128xf32>
    %cst_15 = arith.constant 0.000000e+00 : f32
    %19 = vector.broadcast %cst_15 : f32 to vector<98x128xf32>
    %20 = arith.maximumf %18, %19 : vector<98x128xf32>
    %c0_16 = arith.constant 0 : index
    %c0_17 = arith.constant 0 : index
    %21 = vector.load %arg3[%c0_16, %c0_17] : memref<98x128xf32, #tpu.memory_space<vmem>>, vector<98x128xf32>
    tpu.vector_store %arg3[%c0_16, %c0_17], %20 {strides = array<i32>} : memref<98x128xf32, #tpu.memory_space<vmem>>, vector<98x128xf32>,
    return
  }
}

module attributes {stable_mosaic.version = 11 : i64} {
  func.func @_fc_fused_kernel(%arg0: memref<2x6272xbf16, #tpu.memory_space<vmem>>, %arg1: memref<6272x128xbf16, #tpu.memory_space<vmem>>, %arg2: memref<1x128xf32, #tpu.memory_space<vmem>>, %arg3: memref<128x128xbf16, #tpu.memory_space<vmem>>, %arg4: memref<1x128xf32, #tpu.memory_space<vmem>>, %arg5: memref<128x128xbf16, #tpu.memory_space<vmem>>, %arg6: memref<1x128xf32, #tpu.memory_space<vmem>>, %arg7: memref<2x128xf32, #tpu.memory_space<vmem>>) attributes {dimension_semantics = [], scalar_prefetch = 0 : i64, scratch_operands = 0 : i64, tpu.core_type = #tpu.core_type<tc>} {
    %c0 = arith.constant 0 : index
    %c0_0 = arith.constant 0 : index
    %0 = vector.load %arg0[%c0, %c0_0] : memref<2x6272xbf16, #tpu.memory_space<vmem>>, vector<2x6272xbf16>
    %c0_1 = arith.constant 0 : index
    %c0_2 = arith.constant 0 : index
    %1 = vector.load %arg1[%c0_1, %c0_2] : memref<6272x128xbf16, #tpu.memory_space<vmem>>, vector<6272x128xbf16>
    %cst = arith.constant dense<0.000000e+00> : vector<2x128xf32>
    %2 = tpu.matmul %0, %1, %cst {dimension_numbers = #tpu.dot_dimension_numbers<[1], [0], [0], [1], [0, 0, 1, 1], [], []>} : vector<2x6272xbf16>, vector<6272x128xbf16>, vector<2x128xf32> -> vector<2x128xf32>
    %c0_3 = arith.constant 0 : index
    %c0_4 = arith.constant 0 : index
    %3 = vector.load %arg2[%c0_3, %c0_4] : memref<1x128xf32, #tpu.memory_space<vmem>>, vector<1x128xf32>
    %4 = vector.broadcast %3 : vector<1x128xf32> to vector<2x128xf32>
    %5 = arith.addf %2, %4 : vector<2x128xf32>
    %cst_5 = arith.constant 0.000000e+00 : f32
    %6 = vector.broadcast %cst_5 : f32 to vector<2x128xf32>
    %7 = arith.maximumf %5, %6 : vector<2x128xf32>
    %8 = arith.truncf %7 : vector<2x128xf32> to vector<2x128xbf16>
    %c0_6 = arith.constant 0 : index
    %c0_7 = arith.constant 0 : index
    %9 = vector.load %arg3[%c0_6, %c0_7] : memref<128x128xbf16, #tpu.memory_space<vmem>>, vector<128x128xbf16>
    %cst_8 = arith.constant dense<0.000000e+00> : vector<2x128xf32>
    %10 = tpu.matmul %8, %9, %cst_8 {dimension_numbers = #tpu.dot_dimension_numbers<[1], [0], [0], [1], [0, 0, 1, 1], [], []>} : vector<2x128xbf16>, vector<128x128xbf16>, vector<2x128xf32> -> vector<2x128xf32>
    %c0_9 = arith.constant 0 : index
    %c0_10 = arith.constant 0 : index
    %11 = vector.load %arg4[%c0_9, %c0_10] : memref<1x128xf32, #tpu.memory_space<vmem>>, vector<1x128xf32>
    %12 = vector.broadcast %11 : vector<1x128xf32> to vector<2x128xf32>
    %13 = arith.addf %10, %12 : vector<2x128xf32>
    %cst_11 = arith.constant 0.000000e+00 : f32
    %14 = vector.broadcast %cst_11 : f32 to vector<2x128xf32>
    %15 = arith.maximumf %13, %14 : vector<2x128xf32>
    %16 = arith.truncf %15 : vector<2x128xf32> to vector<2x128xbf16>
    %c0_12 = arith.constant 0 : index
    %c0_13 = arith.constant 0 : index
    %17 = vector.load %arg5[%c0_12, %c0_13] : memref<128x128xbf16, #tpu.memory_space<vmem>>, vector<128x128xbf16>
    %cst_14 = arith.constant dense<0.000000e+00> : vector<2x128xf32>
    %18 = tpu.matmul %16, %17, %cst_14 {dimension_numbers = #tpu.dot_dimension_numbers<[1], [0], [0], [1], [0, 0, 1, 1], [], []>} : vector<2x128xbf16>, vector<128x128xbf16>, vector<2x128xf32> -> vector<2x128xf32>
    %c0_15 = arith.constant 0 : index
    %c0_16 = arith.constant 0 : index
    %19 = vector.load %arg6[%c0_15, %c0_16] : memref<1x128xf32, #tpu.memory_space<vmem>>, vector<1x128xf32>
    %20 = vector.broadcast %19 : vector<1x128xf32> to vector<2x128xf32>
    %21 = arith.addf %18, %20 : vector<2x128xf32>
    %c0_17 = arith.constant 0 : index
    %c0_18 = arith.constant 0 : index
    %22 = vector.load %arg7[%c0_17, %c0_18] : memref<2x128xf32, #tpu.memory_space<vmem>>, vector<2x128xf32>
    tpu.vector_store %arg7[%c0_17, %c0_18], %21 {strides = array<i32>} : memref<2x128xf32, #tpu.memory_space<vmem>>, vector<2x128xf32>,
    return
  }
}

</mosaic_0001>

<bundles_post_ra>
// kernel: forward.3
= control target key start
LH: loop header
LB: loop body
LE: loop exit
PB: predicated region body
PF: predicated region fallthrough
CT: control target
= control target key end

     0   :  { %v4516_v0 = vmov 0.0   ;;  %vm3235_vm0 = vmmov 0   ;;  %vm203_vm1 = vcmask 261120   ;;  %s4512_s1 = inlined_call_operand.vmem [shape: bf16[32,128], index: 1, kind: input, shape index: {}]   ;;  %s4513_s0 = inlined_call_operand.vmem [shape: bf16[4,392,32], index: 0, kind: input, shape index: {}]   ;;  %s4514_s2 = inlined_call_operand.vmem [shape: f32[1,128], index: 2, kind: input, shape index: {}]   ;;  %s4515_s3 = inlined_call_operand.vmem [shape: f32[392,128], index: 3, kind: output, shape index: {}]  }
   0x1   :  { %2714 = vmatprep.subr.bf16.mxu0 %v4516_v0  ;;  %2818 = vmatprep.subr.bf16.mxu1 %v4516_v0  ;;  %v3132_v1 = vld [vmem:[%s4512_s1 + $0x8] sm:$0xff]   ;;  %v3133_v2 = vld [vmem:[%s4512_s1] sm:$0xff]   ;;  %v3138_v7 = vld [vmem:[%s4513_s0 + $0x10] sm:$0xff]  }
   0x2   :  { %2718 = vmatprep.mubr.msk.bf16.mxu0 %vm3235_vm0, %v4516_v0  ;;  %2822 = vmatprep.mubr.msk.bf16.mxu1 %vm3235_vm0, %v4516_v0  ;;  %v3134_v3 = vld [vmem:[%s4513_s0] sm:$0xff]   ;;  %v3136_v5 = vld [vmem:[%s4513_s0 + $0x8] sm:$0xff]   ;;  %v3139_v8 = vld [vmem:[%s4513_s0 + $0xd4] sm:$0xff]  }
   0x3   :  { %2715 = vmatpush3.bf16.msra.mxu0 %v3132_v1  ;;  %2819 = vmatpush3.bf16.msra.mxu1 %v3132_v1  ;;  %v3135_v4 = vld [vmem:[%s4513_s0 + $0xc4] sm:$0xff]   ;;  %v3137_v6 = vld [vmem:[%s4513_s0 + $0xcc] sm:$0xff]   ;;  %v3140_v9 = vld [vmem:[%s4513_s0 + $0x18] sm:$0xff]  }
   0x4   :  { %2716 = vmatprep.subr.bf16.mxu0 %v4516_v0  ;;  %2820 = vmatprep.subr.bf16.mxu1 %v4516_v0  ;;  %v3141_v10 = vld [vmem:[%s4513_s0 + $0xdc] sm:$0xff]   ;;  %v3143_v12 = vld [vmem:[%s4513_s0 + $0xe4] sm:$0xff]   ;;  %v3145_v14 = vld [vmem:[%s4513_s0 + $0xec] sm:$0xff]  }
   0x5   :  { %v3142_v11 = vld [vmem:[%s4513_s0 + $0x20] sm:$0xff]   ;;  %v3144_v13 = vld [vmem:[%s4513_s0 + $0x28] sm:$0xff]   ;;  %v3146_v15 = vld [vmem:[%s4513_s0 + $0x30] sm:$0xff]  }
   0x6   :  { %v3147_v16 = vld [vmem:[%s4513_s0 + $0xf4] sm:$0xff]   ;;  %v3149_v18 = vld [vmem:[%s4513_s0 + $0xfc] sm:$0xff]   ;;  %v3151_v20 = vld [vmem:[%s4513_s0 + $0x104] sm:$0xff]  }
   0x7   :  { %2717 = vmatpush3.bf16.msra.mxu0 %v3133_v2  ;;  %2821 = vmatpush3.bf16.msra.mxu1 %v3133_v2  ;;  %v3148_v17 = vld [vmem:[%s4513_s0 + $0x38] sm:$0xff]   ;;  %v3150_v19 = vld [vmem:[%s4513_s0 + $0x40] sm:$0xff]   ;;  %v3152_v21 = vld [vmem:[%s4513_s0 + $0x48] sm:$0xff]  }
   0x8   :  { %2922 = vmatprep.subr.bf16.mxu0 %v4516_v0  ;;  %3026 = vmatprep.subr.bf16.mxu1 %v4516_v0  ;;  %v3153_v22 = vld [vmem:[%s4513_s0 + $0x10c] sm:$0xff]   ;;  %v3155_v24 = vld [vmem:[%s4513_s0 + $0x114] sm:$0xff]   ;;  %v3157_v26 = vld [vmem:[%s4513_s0 + $0x11c] sm:$0xff]  }
   0x9   :  { %v3154_v23 = vld [vmem:[%s4513_s0 + $0x50] sm:$0xff]   ;;  %v3156_v25 = vld [vmem:[%s4513_s0 + $0x58] sm:$0xff]   ;;  %v3158_v27 = vld [vmem:[%s4513_s0 + $0x60] sm:$0xff]  }
   0xa   :  { %2719 = vmatmul.mubr.msk.bf16.vlgmr.msra.gmra.mxu0 %vm203_vm1, %v3134_v3  ;;  %2823 = vmatmul.mubr.msk.bf16.vlgmr.msra.gmra.mxu1 %vm203_vm1, %v3135_v4  ;;  %v3159_v28 = vld [vmem:[%s4513_s0 + $0x124] sm:$0xff]   ;;  %v3161_v30 = vld [vmem:[%s4513_s0 + $0x12c] sm:$0xff]   ;;  %v3163_v32 = vld [vmem:[%s4513_s0 + $0x134] sm:$0xff]  }
   0xb   :  { %2923 = vmatpush3.bf16.msra.mxu0 %v3132_v1  ;;  %3027 = vmatpush3.bf16.msra.mxu1 %v3132_v1  ;;  %v3160_v29 = vld [vmem:[%s4513_s0 + $0x68] sm:$0xff]   ;;  %v3162_v31 = vld [vmem:[%s4513_s0 + $0x70] sm:$0xff]   ;;  %v3164_v33 = vld [vmem:[%s4513_s0 + $0x78] sm:$0xff]  }
   0xc   :  { %2722 = vmatprep.mubr.msk.bf16.mxu0 %vm3235_vm0, %v4516_v0  ;;  %2826 = vmatprep.mubr.msk.bf16.mxu1 %vm3235_vm0, %v4516_v0  ;;  %v3165_v34 = vld [vmem:[%s4513_s0 + $0x13c] sm:$0xff]   ;;  %v3167_v36 = vld [vmem:[%s4513_s0 + $0x144] sm:$0xff]   ;;  %v3169_v38 = vld [vmem:[%s4513_s0 + $0x14c] sm:$0xff]  }
   0xd   :  { %2924 = vmatprep.subr.bf16.mxu0 %v4516_v0  ;;  %3028 = vmatprep.subr.bf16.mxu1 %v4516_v0  ;;  %v3166_v35 = vld [vmem:[%s4513_s0 + $0x80] sm:$0xff]   ;;  %v3168_v37 = vld [vmem:[%s4513_s0 + $0x88] sm:$0xff]   ;;  %v3170_v39 = vld [vmem:[%s4513_s0 + $0x90] sm:$0xff]  }
   0xe   :  { %v3171_v40 = vld [vmem:[%s4513_s0 + $0x154] sm:$0xff]   ;;  %v3173_v42 = vld [vmem:[%s4513_s0 + $0x15c] sm:$0xff]   ;;  %v3175_v44 = vld [vmem:[%s4513_s0 + $0x164] sm:$0xff]  }
   0xf   :  { %2925 = vmatpush3.bf16.msra.mxu0 %v3133_v2  ;;  %3029 = vmatpush3.bf16.msra.mxu1 %v3133_v2  ;;  %v3172_v41 = vld [vmem:[%s4513_s0 + $0x98] sm:$0xff]   ;;  %v3174_v43 = vld [vmem:[%s4513_s0 + $0xa0] sm:$0xff]   ;;  %v3176_v45 = vld [vmem:[%s4513_s0 + $0xa8] sm:$0xff]  }
  0x10   :  { %v3177_v46 = vld [vmem:[%s4513_s0 + $0x16c] sm:$0xff]   ;;  %v3179_v48 = vld [vmem:[%s4513_s0 + $0x174] sm:$0xff]   ;;  %v3181_v50 = vld [vmem:[%s4513_s0 + $0x17c] sm:$0xff]  }
  0x11   :  { %v3178_v47 = vld [vmem:[%s4513_s0 + $0xb0] sm:$0xff]   ;;  %v3180_v49 = vld [vmem:[%s4513_s0 + $0xb8] sm:$0xff]   ;;  %v3182_v51 = vld [vmem:[%s4513_s0 + $0xc0] ss:$0 sps:$4 sm:$0xff]  }
  0x12   :  { %2723 = vmatmul.mubr.msk.bf16.gmra.mxu0 %vm203_vm1, %v3136_v5  ;;  %2827 = vmatmul.mubr.msk.bf16.gmra.mxu1 %vm203_vm1, %v3137_v6  ;;  %v3183_v52 = vld [vmem:[%s4513_s0 + $0x184] ss:$0 sps:$4 sm:$0xff]   ;;  %v3184_v60 = vld [vmem:[%s4513_s0 + $0x188] sm:$0xff]  }
  0x13   :  { %2726 = vmatprep.mubr.msk.bf16.mxu0 %vm3235_vm0, %v4516_v0  ;;  %2830 = vmatprep.mubr.msk.bf16.mxu1 %vm3235_vm0, %v4516_v0  ;;  %v3185_v61 = vld [vmem:[%s4513_s0 + $0x24c] sm:$0xff]  }
  0x1a   :  { %2727 = vmatmul.mubr.msk.bf16.gmra.mxu0 %vm203_vm1, %v3138_v7  ;;  %2831 = vmatmul.mubr.msk.bf16.gmra.mxu1 %vm203_vm1, %v3139_v8 }
  0x1b   :  { %2730 = vmatprep.mubr.msk.bf16.mxu0 %vm3235_vm0, %v4516_v0  ;;  %2834 = vmatprep.mubr.msk.bf16.mxu1 %vm3235_vm0, %v4516_v0 }
  0x22   :  { %2731 = vmatmul.mubr.msk.bf16.gmra.mxu0 %vm203_vm1, %v3140_v9  ;;  %2835 = vmatmul.mubr.msk.bf16.gmra.mxu1 %vm203_vm1, %v3141_v10  ;;  %v3186_v9 = vld [vmem:[%s4513_s0 + $0x190] sm:$0xff]  }
  0x23   :  { %2734 = vmatprep.mubr.msk.bf16.mxu0 %vm3235_vm0, %v4516_v0  ;;  %2838 = vmatprep.mubr.msk.bf16.mxu1 %vm3235_vm0, %v4516_v0  ;;  %v3187_v10 = vld [vmem:[%s4513_s0 + $0x254] sm:$0xff]  }
  0x2a   :  { %2735 = vmatmul.mubr.msk.bf16.gmra.mxu0 %vm203_vm1, %v3142_v11  ;;  %2839 = vmatmul.mubr.msk.bf16.gmra.mxu1 %vm203_vm1, %v3143_v12 }
  0x2b   :  { %2738 = vmatprep.mubr.msk.bf16.mxu0 %vm3235_vm0, %v4516_v0  ;;  %2842 = vmatprep.mubr.msk.bf16.mxu1 %vm3235_vm0, %v4516_v0 }
  0x32   :  { %2739 = vmatmul.mubr.msk.bf16.gmra.mxu0 %vm203_vm1, %v3144_v13  ;;  %2843 = vmatmul.mubr.msk.bf16.gmra.mxu1 %vm203_vm1, %v3145_v14 }
  0x33   :  { %2742 = vmatprep.mubr.msk.bf16.mxu0 %vm3235_vm0, %v4516_v0  ;;  %2846 = vmatprep.mubr.msk.bf16.mxu1 %vm3235_vm0, %v4516_v0 }
  0x3a   :  { %2743 = vmatmul.mubr.msk.bf16.gmra.mxu0 %vm203_vm1, %v3146_v15  ;;  %2847 = vmatmul.mubr.msk.bf16.gmra.mxu1 %vm203_vm1, %v3147_v16 }
  0x3b   :  { %2746 = vmatprep.mubr.msk.bf16.mxu0 %vm3235_vm0, %v4516_v0  ;;  %2850 = vmatprep.mubr.msk.bf16.mxu1 %vm3235_vm0, %v4516_v0 }
  0x42   :  { %2747 = vmatmul.mubr.msk.bf16.gmra.mxu0 %vm203_vm1, %v3148_v17  ;;  %2851 = vmatmul.mubr.msk.bf16.gmra.mxu1 %vm203_vm1, %v3149_v18 }
  0x43   :  { %2750 = vmatprep.mubr.msk.bf16.mxu0 %vm3235_vm0, %v4516_v0  ;;  %2854 = vmatprep.mubr.msk.bf16.mxu1 %vm3235_vm0, %v4516_v0 }
  0x4a   :  { %2751 = vmatmul.mubr.msk.bf16.gmra.mxu0 %vm203_vm1, %v3150_v19  ;;  %2855 = vmatmul.mubr.msk.bf16.gmra.mxu1 %vm203_vm1, %v3151_v20 }
  0x4b   :  { %2754 = vmatprep.mubr.msk.bf16.mxu0 %vm3235_vm0, %v4516_v0  ;;  %2858 = vmatprep.mubr.msk.bf16.mxu1 %vm3235_vm0, %v4516_v0 }
  0x52   :  { %2755 = vmatmul.mubr.msk.bf16.gmra.mxu0 %vm203_vm1, %v3152_v21  ;;  %2859 = vmatmul.mubr.msk.bf16.gmra.mxu1 %vm203_vm1, %v3153_v22  ;;  %v3188_v21 = vld [vmem:[%s4513_s0 + $0x198] sm:$0xff]  }
  0x53   :  { %2758 = vmatprep.mubr.msk.bf16.mxu0 %vm3235_vm0, %v4516_v0  ;;  %2862 = vmatprep.mubr.msk.bf16.mxu1 %vm3235_vm0, %v4516_v0  ;;  %v3189_v22 = vld [vmem:[%s4513_s0 + $0x25c] sm:$0xff]  }
  0x5a   :  { %2759 = vmatmul.mubr.msk.bf16.gmra.mxu0 %vm203_vm1, %v3154_v23  ;;  %2863 = vmatmul.mubr.msk.bf16.gmra.mxu1 %vm203_vm1, %v3155_v24 }
  0x5b   :  { %2762 = vmatprep.mubr.msk.bf16.mxu0 %vm3235_vm0, %v4516_v0  ;;  %2866 = vmatprep.mubr.msk.bf16.mxu1 %vm3235_vm0, %v4516_v0 }
  0x62   :  { %2763 = vmatmul.mubr.msk.bf16.gmra.mxu0 %vm203_vm1, %v3156_v25  ;;  %2867 = vmatmul.mubr.msk.bf16.gmra.mxu1 %vm203_vm1, %v3157_v26 }
  0x63   :  { %2766 = vmatprep.mubr.msk.bf16.mxu0 %vm3235_vm0, %v4516_v0  ;;  %2870 = vmatprep.mubr.msk.bf16.mxu1 %vm3235_vm0, %v4516_v0 }
  0x6a   :  { %2767 = vmatmul.mubr.msk.bf16.gmra.mxu0 %vm203_vm1, %v3158_v27  ;;  %2871 = vmatmul.mubr.msk.bf16.gmra.mxu1 %vm203_vm1, %v3159_v28 }
  0x6b   :  { %2770 = vmatprep.mubr.msk.bf16.mxu0 %vm3235_vm0, %v4516_v0  ;;  %2874 = vmatprep.mubr.msk.bf16.mxu1 %vm3235_vm0, %v4516_v0 }
  0x72   :  { %2771 = vmatmul.mubr.msk.bf16.gmra.mxu0 %vm203_vm1, %v3160_v29  ;;  %2875 = vmatmul.mubr.msk.bf16.gmra.mxu1 %vm203_vm1, %v3161_v30 }
  0x73   :  { %2774 = vmatprep.mubr.msk.bf16.mxu0 %vm3235_vm0, %v4516_v0  ;;  %2878 = vmatprep.mubr.msk.bf16.mxu1 %vm3235_vm0, %v4516_v0 }
  0x7a   :  { %2775 = vmatmul.mubr.msk.bf16.gmra.mxu0 %vm203_vm1, %v3162_v31  ;;  %2879 = vmatmul.mubr.msk.bf16.gmra.mxu1 %vm203_vm1, %v3163_v32 }
  0x7b   :  { %2778 = vmatprep.mubr.msk.bf16.mxu0 %vm3235_vm0, %v4516_v0  ;;  %2882 = vmatprep.mubr.msk.bf16.mxu1 %vm3235_vm0, %v4516_v0 }
  0x82   :  { %2779 = vmatmul.mubr.msk.bf16.gmra.mxu0 %vm203_vm1, %v3164_v33  ;;  %2883 = vmatmul.mubr.msk.bf16.gmra.mxu1 %vm203_vm1, %v3165_v34  ;;  %v3190_v33 = vld [vmem:[%s4513_s0 + $0x1a0] sm:$0xff]  }
  0x83   :  { %2782 = vmatprep.mubr.msk.bf16.mxu0 %vm3235_vm0, %v4516_v0  ;;  %2886 = vmatprep.mubr.msk.bf16.mxu1 %vm3235_vm0, %v4516_v0  ;;  %v3191_v34 = vld [vmem:[%s4513_s0 + $0x264] sm:$0xff]  }
  0x8a   :  { %2783 = vmatmul.mubr.msk.bf16.gmra.mxu0 %vm203_vm1, %v3166_v35  ;;  %2887 = vmatmul.mubr.msk.bf16.gmra.mxu1 %vm203_vm1, %v3167_v36 }
  0x8b   :  { %2786 = vmatprep.mubr.msk.bf16.mxu0 %vm3235_vm0, %v4516_v0  ;;  %2890 = vmatprep.mubr.msk.bf16.mxu1 %vm3235_vm0, %v4516_v0 }
  0x92   :  { %2787 = vmatmul.mubr.msk.bf16.gmra.mxu0 %vm203_vm1, %v3168_v37  ;;  %2891 = vmatmul.mubr.msk.bf16.gmra.mxu1 %vm203_vm1, %v3169_v38 }
  0x93   :  { %2790 = vmatprep.mubr.msk.bf16.mxu0 %vm3235_vm0, %v4516_v0  ;;  %2894 = vmatprep.mubr.msk.bf16.mxu1 %vm3235_vm0, %v4516_v0 }
  0x9a   :  { %2791 = vmatmul.mubr.msk.bf16.gmra.mxu0 %vm203_vm1, %v3170_v39  ;;  %2895 = vmatmul.mubr.msk.bf16.gmra.mxu1 %vm203_vm1, %v3171_v40 }
  0x9b   :  { %2794 = vmatprep.mubr.msk.bf16.mxu0 %vm3235_vm0, %v4516_v0  ;;  %2898 = vmatprep.mubr.msk.bf16.mxu1 %vm3235_vm0, %v4516_v0 }
  0xa2   :  { %2795 = vmatmul.mubr.msk.bf16.gmra.mxu0 %vm203_vm1, %v3172_v41  ;;  %2899 = vmatmul.mubr.msk.bf16.gmra.mxu1 %vm203_vm1, %v3173_v42 }
  0xa3   :  { %2798 = vmatprep.mubr.msk.bf16.mxu0 %vm3235_vm0, %v4516_v0  ;;  %2902 = vmatprep.mubr.msk.bf16.mxu1 %vm3235_vm0, %v4516_v0 }
  0xaa   :  { %2799 = vmatmul.mubr.msk.bf16.gmra.mxu0 %vm203_vm1, %v3174_v43  ;;  %2903 = vmatmul.mubr.msk.bf16.gmra.mxu1 %vm203_vm1, %v3175_v44 }
  0xab   :  { %2802 = vmatprep.mubr.msk.bf16.mxu0 %vm3235_vm0, %v4516_v0  ;;  %2906 = vmatprep.mubr.msk.bf16.mxu1 %vm3235_vm0, %v4516_v0 }
  0xb2   :  { %2803 = vmatmul.mubr.msk.bf16.gmra.mxu0 %vm203_vm1, %v3176_v45  ;;  %2907 = vmatmul.mubr.msk.bf16.gmra.mxu1 %vm203_vm1, %v3177_v46  ;;  %v3192_v45 = vld [vmem:[%s4513_s0 + $0x1a8] sm:$0xff]  }
  0xb3   :  { %2806 = vmatprep.mubr.msk.bf16.mxu0 %vm3235_vm0, %v4516_v0  ;;  %2910 = vmatprep.mubr.msk.bf16.mxu1 %vm3235_vm0, %v4516_v0  ;;  %v3193_v46 = vld [vmem:[%s4513_s0 + $0x26c] sm:$0xff]  }
  0xba   :  { %2807 = vmatmul.mubr.msk.bf16.gmra.mxu0 %vm203_vm1, %v3178_v47  ;;  %2911 = vmatmul.mubr.msk.bf16.gmra.mxu1 %vm203_vm1, %v3179_v48 }
  0xbb   :  { %2810 = vmatprep.mubr.msk.bf16.mxu0 %vm3235_vm0, %v4516_v0  ;;  %2914 = vmatprep.mubr.msk.bf16.mxu1 %vm3235_vm0, %v4516_v0 }
  0xc2   :  { %2811 = vmatmul.mubr.msk.bf16.gmra.mxu0 %vm203_vm1, %v3180_v49  ;;  %2915 = vmatmul.mubr.msk.bf16.gmra.mxu1 %vm203_vm1, %v3181_v50 }
  0xc3   :  { %2814 = vmatprep.mubr.msk.bf16.mxu0 %vm3235_vm0, %v4516_v0  ;;  %2918 = vmatprep.mubr.msk.bf16.mxu1 %vm3235_vm0, %v4516_v0 }
  0xca   :  { %v3568_v53 = vpop.f32.mrf.mxu0  ;;  %2815 = vmatmul.mubr.msk.bf16.gmra.mxu0 %vm203_vm1, %v3182_v51  ;;  %v3571_v54 = vpop.f32.mrf.mxu1  ;;  %2919 = vmatmul.mubr.msk.bf16.gmra.mxu1 %vm203_vm1, %v3183_v52 }
  0xcb   :  { %2926 = vmatprep.mubr.msk.bf16.mxu0 %vm3235_vm0, %v4516_v0  ;;  %3030 = vmatprep.mubr.msk.bf16.mxu1 %vm3235_vm0, %v4516_v0 }
  0xcc   :  { %v2720_v56 = vpop.f32.mrf.mxu0  ;;  %v2824_v57 = vpop.f32.mrf.mxu1 }
  0xce   :  { %v3580_v58 = vpop.f32.mrf.mxu0  ;;  %v3582_v59 = vpop.f32.mrf.mxu1 }
  0xd0   :  { %v2721_v63 = vpop.f32.mrf.mxu0  ;;  %v2825_v1 = vpop.f32.mrf.mxu1 }
  0xd1   :  { %v3194_v63 = vld [vmem:[%s4513_s0 + $0x1b0] sm:$0xff]  }
  0xd2   :  { %v3592_v2 = vpop.f32.mrf.mxu0  ;;  %v3594_v3 = vpop.f32.mrf.mxu1  ;;  %2927 = vmatmul.mubr.msk.bf16.vlgmr.msra.gmra.mxu0 %vm203_vm1, %v3184_v60  ;;  %3031 = vmatmul.mubr.msk.bf16.vlgmr.msra.gmra.mxu1 %vm203_vm1, %v3185_v61  ;;  %v3195_v1 = vld [vmem:[%s4513_s0 + $0x274] sm:$0xff]  }
  0xd3   :  { %2930 = vmatprep.mubr.msk.bf16.mxu0 %vm3235_vm0, %v4516_v0  ;;  %3034 = vmatprep.mubr.msk.bf16.mxu1 %vm3235_vm0, %v4516_v0 }
  0xd4   :  { %v2724_v5 = vpop.f32.mrf.mxu0  ;;  %v2828_v6 = vpop.f32.mrf.mxu1 }
  0xd6   :  { %v3604_v7 = vpop.f32.mrf.mxu0  ;;  %v3606_v8 = vpop.f32.mrf.mxu1 }
  0xd8   :  { %v2725_v12 = vpop.f32.mrf.mxu0  ;;  %v2829_v13 = vpop.f32.mrf.mxu1 }
  0xda   :  { %v3616_v14 = vpop.f32.mrf.mxu0  ;;  %v3618_v15 = vpop.f32.mrf.mxu1  ;;  %2931 = vmatmul.mubr.msk.bf16.gmra.mxu0 %vm203_vm1, %v3186_v9  ;;  %3035 = vmatmul.mubr.msk.bf16.gmra.mxu1 %vm203_vm1, %v3187_v10 }
  0xdb   :  { %2934 = vmatprep.mubr.msk.bf16.mxu0 %vm3235_vm0, %v4516_v0  ;;  %3038 = vmatprep.mubr.msk.bf16.mxu1 %vm3235_vm0, %v4516_v0 }
  0xdc   :  { %v2728_v17 = vpop.f32.mrf.mxu0  ;;  %v2832_v18 = vpop.f32.mrf.mxu1 }
  0xde   :  { %v3628_v19 = vpop.f32.mrf.mxu0  ;;  %v3630_v20 = vpop.f32.mrf.mxu1 }
  0xe0   :  { %v2729_v24 = vpop.f32.mrf.mxu0  ;;  %v2833_v25 = vpop.f32.mrf.mxu1 }
  0xe1   :  { %v3196_v24 = vld [vmem:[%s4513_s0 + $0x1b8] sm:$0xff]  }
  0xe2   :  { %v3640_v26 = vpop.f32.mrf.mxu0  ;;  %v3642_v27 = vpop.f32.mrf.mxu1  ;;  %2935 = vmatmul.mubr.msk.bf16.gmra.mxu0 %vm203_vm1, %v3188_v21  ;;  %3039 = vmatmul.mubr.msk.bf16.gmra.mxu1 %vm203_vm1, %v3189_v22  ;;  %v3197_v25 = vld [vmem:[%s4513_s0 + $0x27c] sm:$0xff]  }
  0xe3   :  { %2938 = vmatprep.mubr.msk.bf16.mxu0 %vm3235_vm0, %v4516_v0  ;;  %3042 = vmatprep.mubr.msk.bf16.mxu1 %vm3235_vm0, %v4516_v0 }
  0xe4   :  { %v2732_v29 = vpop.f32.mrf.mxu0  ;;  %v2836_v30 = vpop.f32.mrf.mxu1 }
  0xe6   :  { %v3652_v31 = vpop.f32.mrf.mxu0  ;;  %v3654_v32 = vpop.f32.mrf.mxu1 }
  0xe8   :  { %v2733_v36 = vpop.f32.mrf.mxu0  ;;  %v2837_v37 = vpop.f32.mrf.mxu1 }
  0xea   :  { %v3664_v38 = vpop.f32.mrf.mxu0  ;;  %v3666_v39 = vpop.f32.mrf.mxu1  ;;  %2939 = vmatmul.mubr.msk.bf16.gmra.mxu0 %vm203_vm1, %v3190_v33  ;;  %3043 = vmatmul.mubr.msk.bf16.gmra.mxu1 %vm203_vm1, %v3191_v34 }
  0xeb   :  { %2942 = vmatprep.mubr.msk.bf16.mxu0 %vm3235_vm0, %v4516_v0  ;;  %3046 = vmatprep.mubr.msk.bf16.mxu1 %vm3235_vm0, %v4516_v0 }
  0xec   :  { %v2736_v41 = vpop.f32.mrf.mxu0  ;;  %v2840_v42 = vpop.f32.mrf.mxu1 }
  0xee   :  { %v3676_v43 = vpop.f32.mrf.mxu0  ;;  %v3678_v44 = vpop.f32.mrf.mxu1 }
  0xf0   :  { %v2737_v48 = vpop.f32.mrf.mxu0  ;;  %v2841_v49 = vpop.f32.mrf.mxu1 }
  0xf1   :  { %v3198_v48 = vld [vmem:[%s4513_s0 + $0x1c0] sm:$0xff]  }
  0xf2   :  { %v3688_v50 = vpop.f32.mrf.mxu0  ;;  %v3690_v51 = vpop.f32.mrf.mxu1  ;;  %2943 = vmatmul.mubr.msk.bf16.gmra.mxu0 %vm203_vm1, %v3192_v45  ;;  %3047 = vmatmul.mubr.msk.bf16.gmra.mxu1 %vm203_vm1, %v3193_v46  ;;  %v3199_v49 = vld [vmem:[%s4513_s0 + $0x284] sm:$0xff]  }
  0xf3   :  { %2946 = vmatprep.mubr.msk.bf16.mxu0 %vm3235_vm0, %v4516_v0  ;;  %3050 = vmatprep.mubr.msk.bf16.mxu1 %vm3235_vm0, %v4516_v0 }
  0xf4   :  { %v2740_v56 = vpop.f32.mrf.mxu0  ;;  %v2844_v57 = vpop.f32.mrf.mxu1 }
  0xf6   :  { %v3700_v60 = vpop.f32.mrf.mxu0  ;;  %v3702_v61 = vpop.f32.mrf.mxu1 }
  0xf8   :  { %v2741_v6 = vpop.f32.mrf.mxu0  ;;  %v2845_v9 = vpop.f32.mrf.mxu1 }
  0xfa   :  { %v3712_v10 = vpop.f32.mrf.mxu0  ;;  %v3714_v12 = vpop.f32.mrf.mxu1  ;;  %2947 = vmatmul.mubr.msk.bf16.gmra.mxu0 %vm203_vm1, %v3194_v63  ;;  %3051 = vmatmul.mubr.msk.bf16.gmra.mxu1 %vm203_vm1, %v3195_v1 }
  0xfb   :  { %2950 = vmatprep.mubr.msk.bf16.mxu0 %vm3235_vm0, %v4516_v0  ;;  %3054 = vmatprep.mubr.msk.bf16.mxu1 %vm3235_vm0, %v4516_v0 }
  0xfc   :  { %v2744_v17 = vpop.f32.mrf.mxu0  ;;  %v2848_v18 = vpop.f32.mrf.mxu1 }
  0xfe   :  { %v3724_v21 = vpop.f32.mrf.mxu0  ;;  %v3726_v22 = vpop.f32.mrf.mxu1 }
 0x100   :  { %v2745_v30 = vpop.f32.mrf.mxu0  ;;  %v2849_v33 = vpop.f32.mrf.mxu1 }
 0x101   :  { %v3200_v30 = vld [vmem:[%s4513_s0 + $0x1c8] sm:$0xff]  }
 0x102   :  { %v3736_v34 = vpop.f32.mrf.mxu0  ;;  %v3738_v36 = vpop.f32.mrf.mxu1  ;;  %2951 = vmatmul.mubr.msk.bf16.gmra.mxu0 %vm203_vm1, %v3196_v24  ;;  %3055 = vmatmul.mubr.msk.bf16.gmra.mxu1 %vm203_vm1, %v3197_v25  ;;  %v3201_v33 = vld [vmem:[%s4513_s0 + $0x28c] sm:$0xff]  }
 0x103   :  { %2954 = vmatprep.mubr.msk.bf16.mxu0 %vm3235_vm0, %v4516_v0  ;;  %3058 = vmatprep.mubr.msk.bf16.mxu1 %vm3235_vm0, %v4516_v0 }
 0x104   :  { %v2748_v41 = vpop.f32.mrf.mxu0  ;;  %v2852_v42 = vpop.f32.mrf.mxu1 }
 0x106   :  { %v3748_v45 = vpop.f32.mrf.mxu0  ;;  %v3750_v46 = vpop.f32.mrf.mxu1 }
 0x108   :  { %v2749_v57 = vpop.f32.mrf.mxu0  ;;  %v2853_v63 = vpop.f32.mrf.mxu1 }
 0x10a   :  { %v3760_v1 = vpop.f32.mrf.mxu0  ;;  %v3762_v6 = vpop.f32.mrf.mxu1  ;;  %2955 = vmatmul.mubr.msk.bf16.gmra.mxu0 %vm203_vm1, %v3198_v48  ;;  %3059 = vmatmul.mubr.msk.bf16.gmra.mxu1 %vm203_vm1, %v3199_v49 }
 0x10b   :  { %2958 = vmatprep.mubr.msk.bf16.mxu0 %vm3235_vm0, %v4516_v0  ;;  %3062 = vmatprep.mubr.msk.bf16.mxu1 %vm3235_vm0, %v4516_v0 }
 0x10c   :  { %v2752_v17 = vpop.f32.mrf.mxu0  ;;  %v2856_v18 = vpop.f32.mrf.mxu1 }
 0x10e   :  { %v3772_v24 = vpop.f32.mrf.mxu0  ;;  %v3774_v25 = vpop.f32.mrf.mxu1 }
 0x110   :  { %v2753_v42 = vpop.f32.mrf.mxu0  ;;  %v2857_v48 = vpop.f32.mrf.mxu1 }
 0x112   :  { %v3784_v49 = vpop.f32.mrf.mxu0  ;;  %v3786_v57 = vpop.f32.mrf.mxu1  ;;  %2959 = vmatmul.mubr.msk.bf16.gmra.mxu0 %vm203_vm1, %v3200_v30  ;;  %3063 = vmatmul.mubr.msk.bf16.gmra.mxu1 %vm203_vm1, %v3201_v33  ;;  %v3202_v30 = vld [vmem:[%s4513_s0 + $0x1d0] sm:$0xff]  }
 0x113   :  { %2962 = vmatprep.mubr.msk.bf16.mxu0 %vm3235_vm0, %v4516_v0  ;;  %3066 = vmatprep.mubr.msk.bf16.mxu1 %vm3235_vm0, %v4516_v0  ;;  %v3203_v33 = vld [vmem:[%s4513_s0 + $0x294] sm:$0xff]  }
 0x114   :  { %v2756_v17 = vpop.f32.mrf.mxu0  ;;  %v2860_v18 = vpop.f32.mrf.mxu1 }
 0x116   :  { %v3796_v42 = vpop.f32.mrf.mxu0  ;;  %v3798_v48 = vpop.f32.mrf.mxu1 }
 0x118   :  { %v2757_v41 = vpop.f32.mrf.mxu0  ;;  %v2861_v9 = vpop.f32.mrf.mxu1 }
 0x11a   :  { %v3808_v56 = vpop.f32.mrf.mxu0  ;;  %v3810_v17 = vpop.f32.mrf.mxu1  ;;  %2963 = vmatmul.mubr.msk.bf16.gmra.mxu0 %vm203_vm1, %v3202_v30  ;;  %3067 = vmatmul.mubr.msk.bf16.gmra.mxu1 %vm203_vm1, %v3203_v33  ;;  %v3204_v30 = vld [vmem:[%s4513_s0 + $0x1d8] sm:$0xff]  }
 0x11b   :  { %2966 = vmatprep.mubr.msk.bf16.mxu0 %vm3235_vm0, %v4516_v0  ;;  %3070 = vmatprep.mubr.msk.bf16.mxu1 %vm3235_vm0, %v4516_v0  ;;  %v3205_v33 = vld [vmem:[%s4513_s0 + $0x29c] sm:$0xff]  }
 0x11c   :  { %v2760_v63 = vpop.f32.mrf.mxu0  ;;  %v2864_v41 = vpop.f32.mrf.mxu1 }
 0x11e   :  { %v3820_v9 = vpop.f32.mrf.mxu0  ;;  %v3822_v37 = vpop.f32.mrf.mxu1 }
 0x120   :  { %v2761_v29 = vpop.f32.mrf.mxu0  ;;  %v2865_v13 = vpop.f32.mrf.mxu1 }
 0x122   :  { %v3832_v5 = vpop.f32.mrf.mxu0  ;;  %v3834_v63 = vpop.f32.mrf.mxu1  ;;  %2967 = vmatmul.mubr.msk.bf16.gmra.mxu0 %vm203_vm1, %v3204_v30  ;;  %3071 = vmatmul.mubr.msk.bf16.gmra.mxu1 %vm203_vm1, %v3205_v33  ;;  %v3206_v30 = vld [vmem:[%s4513_s0 + $0x1e0] sm:$0xff]  }
 0x123   :  { %2970 = vmatprep.mubr.msk.bf16.mxu0 %vm3235_vm0, %v4516_v0  ;;  %3074 = vmatprep.mubr.msk.bf16.mxu1 %vm3235_vm0, %v4516_v0  ;;  %v3207_v33 = vld [vmem:[%s4513_s0 + $0x2a4] sm:$0xff]  }
 0x124   :  { %v2764_v18 = vpop.f32.mrf.mxu0  ;;  %v2868_v29 = vpop.f32.mrf.mxu1 }
 0x126   :  { %v3844_v13 = vpop.f32.mrf.mxu0  ;;  %v3846_v52 = vpop.f32.mrf.mxu1 }
 0x127   :  { %4569 = vst [vmem:[#allocation2_spill] sm:$0xff] %v3846_v52 }
 0x128   :  { %v2765_v47 = vpop.f32.mrf.mxu0  ;;  %v2869_v40 = vpop.f32.mrf.mxu1 }
 0x12a   :  { %v3856_v35 = vpop.f32.mrf.mxu0  ;;  %v3858_v18 = vpop.f32.mrf.mxu1  ;;  %2971 = vmatmul.mubr.msk.bf16.gmra.mxu0 %vm203_vm1, %v3206_v30  ;;  %3075 = vmatmul.mubr.msk.bf16.gmra.mxu1 %vm203_vm1, %v3207_v33  ;;  %v3208_v30 = vld [vmem:[%s4513_s0 + $0x1e8] sm:$0xff]  }
 0x12b   :  { %4570 = vst [vmem:[#allocation3_spill] sm:$0xff] %v3856_v35  ;;  %4571 = vst [vmem:[#allocation4_spill] sm:$0xff] %v3858_v18  ;;  %2974 = vmatprep.mubr.msk.bf16.mxu0 %vm3235_vm0, %v4516_v0  ;;  %3078 = vmatprep.mubr.msk.bf16.mxu1 %vm3235_vm0, %v4516_v0  ;;  %v3209_v33 = vld [vmem:[%s4513_s0 + $0x2ac] sm:$0xff]  }
 0x12c   :  { %v2768_v41 = vpop.f32.mrf.mxu0  ;;  %v2872_v47 = vpop.f32.mrf.mxu1 }
 0x12e   :  { %v3868_v40 = vpop.f32.mrf.mxu0  ;;  %v3870_v28 = vpop.f32.mrf.mxu1 }
 0x12f   :  { %4572 = vst [vmem:[#allocation5_spill] sm:$0xff] %v3868_v40  ;;  %4573 = vst [vmem:[#allocation6_spill] sm:$0xff] %v3870_v28 }
 0x130   :  { %v2769_v23 = vpop.f32.mrf.mxu0  ;;  %v2873_v16 = vpop.f32.mrf.mxu1 }
 0x132   :  { %v3880_v11 = vpop.f32.mrf.mxu0  ;;  %v3882_v41 = vpop.f32.mrf.mxu1  ;;  %2975 = vmatmul.mubr.msk.bf16.gmra.mxu0 %vm203_vm1, %v3208_v30  ;;  %3079 = vmatmul.mubr.msk.bf16.gmra.mxu1 %vm203_vm1, %v3209_v33  ;;  %v3210_v30 = vld [vmem:[%s4513_s0 + $0x1f0] sm:$0xff]  }
 0x133   :  { %4574 = vst [vmem:[#allocation7_spill] sm:$0xff] %v3880_v11  ;;  %4575 = vst [vmem:[#allocation8_spill] sm:$0xff] %v3882_v41  ;;  %2978 = vmatprep.mubr.msk.bf16.mxu0 %vm3235_vm0, %v4516_v0  ;;  %3082 = vmatprep.mubr.msk.bf16.mxu1 %vm3235_vm0, %v4516_v0  ;;  %v3211_v33 = vld [vmem:[%s4513_s0 + $0x2b4] sm:$0xff]   ;;  %v4580_v41 = vmov 0.0  }
 0x134   :  { %v2772_v29 = vpop.f32.mrf.mxu0  ;;  %v2876_v23 = vpop.f32.mrf.mxu1 }
 0x136   :  { %v3892_v16 = vpop.f32.mrf.mxu0  ;;  %v3894_v4 = vpop.f32.mrf.mxu1 }
 0x137   :  { %4576 = vst [vmem:[#allocation9_spill] sm:$0xff] %v3892_v16  ;;  %4577 = vst [vmem:[#allocation10_spill] sm:$0xff] %v3894_v4 }
 0x138   :  { %v2773_v62 = vpop.f32.mrf.mxu0  ;;  %v2877_v55 = vpop.f32.mrf.mxu1 }
 0x13a   :  { %v3904_v0 = vpop.f32.mrf.mxu0  ;;  %v3906_v29 = vpop.f32.mrf.mxu1  ;;  %2979 = vmatmul.mubr.msk.bf16.gmra.mxu0 %vm203_vm1, %v3210_v30  ;;  %3083 = vmatmul.mubr.msk.bf16.gmra.mxu1 %vm203_vm1, %v3211_v33  ;;  %v3212_v30 = vld [vmem:[%s4513_s0 + $0x1f8] sm:$0xff]  }
 0x13b   :  { %4578 = vst [vmem:[#allocation11_spill] sm:$0xff] %v3904_v0  ;;  %4579 = vst [vmem:[#allocation12_spill] sm:$0xff] %v3906_v29  ;;  %2982 = vmatprep.mubr.msk.bf16.mxu0 %vm3235_vm0, %v4580_v41  ;;  %3086 = vmatprep.mubr.msk.bf16.mxu1 %vm3235_vm0, %v4580_v41  ;;  %v3213_v33 = vld [vmem:[%s4513_s0 + $0x2bc] sm:$0xff]  }
 0x13c   :  { %v2776_v47 = vpop.f32.mrf.mxu0  ;;  %v2880_v62 = vpop.f32.mrf.mxu1 }
 0x13e   :  { %v3916_v55 = vpop.f32.mrf.mxu0  ;;  %v3918_v4 = vpop.f32.mrf.mxu1 }
 0x13f   :  { %4581 = vst [vmem:[#allocation13_spill] sm:$0xff] %v3916_v55  ;;  %4582 = vst [vmem:[#allocation14_spill] sm:$0xff] %v3918_v4 }
 0x140   :  { %v2777_v29 = vpop.f32.mrf.mxu0  ;;  %v2881_v0 = vpop.f32.mrf.mxu1 }
 0x142   :  { %v3928_v16 = vpop.f32.mrf.mxu0  ;;  %v3930_v47 = vpop.f32.mrf.mxu1  ;;  %2983 = vmatmul.mubr.msk.bf16.gmra.mxu0 %vm203_vm1, %v3212_v30  ;;  %3087 = vmatmul.mubr.msk.bf16.gmra.mxu1 %vm203_vm1, %v3213_v33  ;;  %v3214_v30 = vld [vmem:[%s4513_s0 + $0x200] sm:$0xff]  }
 0x143   :  { %4583 = vst [vmem:[#allocation15_spill] sm:$0xff] %v3928_v16  ;;  %4584 = vst [vmem:[#allocation16_spill] sm:$0xff] %v3930_v47  ;;  %2986 = vmatprep.mubr.msk.bf16.mxu0 %vm3235_vm0, %v4580_v41  ;;  %3090 = vmatprep.mubr.msk.bf16.mxu1 %vm3235_vm0, %v4580_v41  ;;  %v3215_v33 = vld [vmem:[%s4513_s0 + $0x2c4] sm:$0xff]  }
 0x144   :  { %v2780_v23 = vpop.f32.mrf.mxu0  ;;  %v2884_v29 = vpop.f32.mrf.mxu1 }
 0x146   :  { %v3940_v0 = vpop.f32.mrf.mxu0  ;;  %v3942_v4 = vpop.f32.mrf.mxu1 }
 0x147   :  { %4585 = vst [vmem:[#allocation17_spill] sm:$0xff] %v3940_v0  ;;  %4586 = vst [vmem:[#allocation18_spill] sm:$0xff] %v3942_v4 }
 0x148   :  { %v2781_v47 = vpop.f32.mrf.mxu0  ;;  %v2885_v16 = vpop.f32.mrf.mxu1 }
 0x14a   :  { %v3952_v55 = vpop.f32.mrf.mxu0  ;;  %v3954_v23 = vpop.f32.mrf.mxu1  ;;  %2987 = vmatmul.mubr.msk.bf16.gmra.mxu0 %vm203_vm1, %v3214_v30  ;;  %3091 = vmatmul.mubr.msk.bf16.gmra.mxu1 %vm203_vm1, %v3215_v33  ;;  %v3216_v30 = vld [vmem:[%s4513_s0 + $0x208] sm:$0xff]  }
 0x14b   :  { %4587 = vst [vmem:[#allocation19_spill] sm:$0xff] %v3952_v55  ;;  %4588 = vst [vmem:[#allocation20_spill] sm:$0xff] %v3954_v23  ;;  %2990 = vmatprep.mubr.msk.bf16.mxu0 %vm3235_vm0, %v4580_v41  ;;  %3094 = vmatprep.mubr.msk.bf16.mxu1 %vm3235_vm0, %v4580_v41  ;;  %v3217_v33 = vld [vmem:[%s4513_s0 + $0x2cc] sm:$0xff]  }
 0x14c   :  { %v2784_v62 = vpop.f32.mrf.mxu0  ;;  %v2888_v47 = vpop.f32.mrf.mxu1 }
 0x14e   :  { %v3964_v16 = vpop.f32.mrf.mxu0  ;;  %v3966_v4 = vpop.f32.mrf.mxu1 }
 0x14f   :  { %4589 = vst [vmem:[#allocation21_spill] sm:$0xff] %v3964_v16  ;;  %4590 = vst [vmem:[#allocation22_spill] sm:$0xff] %v3966_v4 }
 0x150   :  { %v2785_v23 = vpop.f32.mrf.mxu0  ;;  %v2889_v55 = vpop.f32.mrf.mxu1 }
 0x152   :  { %v3976_v0 = vpop.f32.mrf.mxu0  ;;  %v3978_v62 = vpop.f32.mrf.mxu1  ;;  %2991 = vmatmul.mubr.msk.bf16.gmra.mxu0 %vm203_vm1, %v3216_v30  ;;  %3095 = vmatmul.mubr.msk.bf16.gmra.mxu1 %vm203_vm1, %v3217_v33  ;;  %v3218_v30 = vld [vmem:[%s4513_s0 + $0x210] sm:$0xff]  }
 0x153   :  { %4591 = vst [vmem:[#allocation23_spill] sm:$0xff] %v3976_v0  ;;  %4592 = vst [vmem:[#allocation24_spill] sm:$0xff] %v3978_v62  ;;  %2994 = vmatprep.mubr.msk.bf16.mxu0 %vm3235_vm0, %v4580_v41  ;;  %3098 = vmatprep.mubr.msk.bf16.mxu1 %vm3235_vm0, %v4580_v41  ;;  %v3219_v33 = vld [vmem:[%s4513_s0 + $0x2d4] sm:$0xff]  }
 0x154   :  { %v2788_v29 = vpop.f32.mrf.mxu0  ;;  %v2892_v23 = vpop.f32.mrf.mxu1 }
 0x156   :  { %v3988_v55 = vpop.f32.mrf.mxu0  ;;  %v3990_v4 = vpop.f32.mrf.mxu1 }
 0x157   :  { %4593 = vst [vmem:[#allocation25_spill] sm:$0xff] %v3988_v55  ;;  %4594 = vst [vmem:[#allocation26_spill] sm:$0xff] %v3990_v4 }
 0x158   :  { %v2789_v62 = vpop.f32.mrf.mxu0  ;;  %v2893_v0 = vpop.f32.mrf.mxu1 }
 0x15a   :  { %v4000_v16 = vpop.f32.mrf.mxu0  ;;  %v4002_v29 = vpop.f32.mrf.mxu1  ;;  %2995 = vmatmul.mubr.msk.bf16.gmra.mxu0 %vm203_vm1, %v3218_v30  ;;  %3099 = vmatmul.mubr.msk.bf16.gmra.mxu1 %vm203_vm1, %v3219_v33  ;;  %v3220_v30 = vld [vmem:[%s4513_s0 + $0x218] sm:$0xff]  }
 0x15b   :  { %4595 = vst [vmem:[#allocation27_spill] sm:$0xff] %v4000_v16  ;;  %4596 = vst [vmem:[#allocation28_spill] sm:$0xff] %v4002_v29  ;;  %2998 = vmatprep.mubr.msk.bf16.mxu0 %vm3235_vm0, %v4580_v41  ;;  %3102 = vmatprep.mubr.msk.bf16.mxu1 %vm3235_vm0, %v4580_v41  ;;  %v3221_v33 = vld [vmem:[%s4513_s0 + $0x2dc] sm:$0xff]  }
 0x15c   :  { %v2792_v47 = vpop.f32.mrf.mxu0  ;;  %v2896_v62 = vpop.f32.mrf.mxu1 }
 0x15e   :  { %v4012_v0 = vpop.f32.mrf.mxu0  ;;  %v4014_v4 = vpop.f32.mrf.mxu1 }
 0x15f   :  { %4597 = vst [vmem:[#allocation29_spill] sm:$0xff] %v4012_v0  ;;  %4598 = vst [vmem:[#allocation30_spill] sm:$0xff] %v4014_v4 }
 0x160   :  { %v2793_v29 = vpop.f32.mrf.mxu0  ;;  %v2897_v16 = vpop.f32.mrf.mxu1 }
 0x162   :  { %v4024_v55 = vpop.f32.mrf.mxu0  ;;  %v4026_v47 = vpop.f32.mrf.mxu1  ;;  %2999 = vmatmul.mubr.msk.bf16.gmra.mxu0 %vm203_vm1, %v3220_v30  ;;  %3103 = vmatmul.mubr.msk.bf16.gmra.mxu1 %vm203_vm1, %v3221_v33  ;;  %v3222_v30 = vld [vmem:[%s4513_s0 + $0x220] sm:$0xff]  }
 0x163   :  { %4599 = vst [vmem:[#allocation31_spill] sm:$0xff] %v4024_v55  ;;  %4600 = vst [vmem:[#allocation32_spill] sm:$0xff] %v4026_v47  ;;  %3002 = vmatprep.mubr.msk.bf16.mxu0 %vm3235_vm0, %v4580_v41  ;;  %3106 = vmatprep.mubr.msk.bf16.mxu1 %vm3235_vm0, %v4580_v41  ;;  %v3223_v33 = vld [vmem:[%s4513_s0 + $0x2e4] sm:$0xff]  }
 0x164   :  { %v2796_v23 = vpop.f32.mrf.mxu0  ;;  %v2900_v29 = vpop.f32.mrf.mxu1 }
 0x166   :  { %v4036_v16 = vpop.f32.mrf.mxu0  ;;  %v4038_v4 = vpop.f32.mrf.mxu1 }
 0x167   :  { %4601 = vst [vmem:[#allocation33_spill] sm:$0xff] %v4036_v16  ;;  %4602 = vst [vmem:[#allocation34_spill] sm:$0xff] %v4038_v4 }
 0x168   :  { %v2797_v47 = vpop.f32.mrf.mxu0  ;;  %v2901_v55 = vpop.f32.mrf.mxu1 }
 0x16a   :  { %v4048_v0 = vpop.f32.mrf.mxu0  ;;  %v4050_v23 = vpop.f32.mrf.mxu1  ;;  %3003 = vmatmul.mubr.msk.bf16.gmra.mxu0 %vm203_vm1, %v3222_v30  ;;  %3107 = vmatmul.mubr.msk.bf16.gmra.mxu1 %vm203_vm1, %v3223_v33  ;;  %v3224_v30 = vld [vmem:[%s4513_s0 + $0x228] sm:$0xff]  }
 0x16b   :  { %4603 = vst [vmem:[#allocation35_spill] sm:$0xff] %v4048_v0  ;;  %4604 = vst [vmem:[#allocation36_spill] sm:$0xff] %v4050_v23  ;;  %3006 = vmatprep.mubr.msk.bf16.mxu0 %vm3235_vm0, %v4580_v41  ;;  %3110 = vmatprep.mubr.msk.bf16.mxu1 %vm3235_vm0, %v4580_v41  ;;  %v3225_v33 = vld [vmem:[%s4513_s0 + $0x2ec] sm:$0xff]  }
 0x16c   :  { %v2800_v62 = vpop.f32.mrf.mxu0  ;;  %v2904_v47 = vpop.f32.mrf.mxu1 }
 0x16e   :  { %v4060_v55 = vpop.f32.mrf.mxu0  ;;  %v4062_v4 = vpop.f32.mrf.mxu1 }
 0x16f   :  { %4605 = vst [vmem:[#allocation37_spill] sm:$0xff] %v4060_v55  ;;  %4606 = vst [vmem:[#allocation38_spill] sm:$0xff] %v4062_v4 }
 0x170   :  { %v2801_v23 = vpop.f32.mrf.mxu0  ;;  %v2905_v0 = vpop.f32.mrf.mxu1 }
 0x172   :  { %v4072_v16 = vpop.f32.mrf.mxu0  ;;  %v4074_v62 = vpop.f32.mrf.mxu1  ;;  %3007 = vmatmul.mubr.msk.bf16.gmra.mxu0 %vm203_vm1, %v3224_v30  ;;  %3111 = vmatmul.mubr.msk.bf16.gmra.mxu1 %vm203_vm1, %v3225_v33  ;;  %v3226_v30 = vld [vmem:[%s4513_s0 + $0x230] sm:$0xff]  }
 0x173   :  { %4607 = vst [vmem:[#allocation39_spill] sm:$0xff] %v4072_v16  ;;  %4608 = vst [vmem:[#allocation40_spill] sm:$0xff] %v4074_v62  ;;  %3010 = vmatprep.mubr.msk.bf16.mxu0 %vm3235_vm0, %v4580_v41  ;;  %3114 = vmatprep.mubr.msk.bf16.mxu1 %vm3235_vm0, %v4580_v41  ;;  %v3227_v33 = vld [vmem:[%s4513_s0 + $0x2f4] sm:$0xff]  }
 0x174   :  { %v2804_v29 = vpop.f32.mrf.mxu0  ;;  %v2908_v23 = vpop.f32.mrf.mxu1 }
 0x176   :  { %v4084_v0 = vpop.f32.mrf.mxu0  ;;  %v4086_v4 = vpop.f32.mrf.mxu1 }
 0x177   :  { %4609 = vst [vmem:[#allocation41_spill] sm:$0xff] %v4084_v0  ;;  %4610 = vst [vmem:[#allocation42_spill] sm:$0xff] %v4086_v4 }
 0x178   :  { %v2805_v62 = vpop.f32.mrf.mxu0  ;;  %v2909_v16 = vpop.f32.mrf.mxu1 }
 0x17a   :  { %v4096_v55 = vpop.f32.mrf.mxu0  ;;  %v4098_v29 = vpop.f32.mrf.mxu1  ;;  %3011 = vmatmul.mubr.msk.bf16.gmra.mxu0 %vm203_vm1, %v3226_v30  ;;  %3115 = vmatmul.mubr.msk.bf16.gmra.mxu1 %vm203_vm1, %v3227_v33  ;;  %v3228_v30 = vld [vmem:[%s4513_s0 + $0x238] sm:$0xff]  }
 0x17b   :  { %4611 = vst [vmem:[#allocation43_spill] sm:$0xff] %v4096_v55  ;;  %4612 = vst [vmem:[#allocation44_spill] sm:$0xff] %v4098_v29  ;;  %3014 = vmatprep.mubr.msk.bf16.mxu0 %vm3235_vm0, %v4580_v41  ;;  %3118 = vmatprep.mubr.msk.bf16.mxu1 %vm3235_vm0, %v4580_v41  ;;  %v3229_v33 = vld [vmem:[%s4513_s0 + $0x2fc] sm:$0xff]  }
 0x17c   :  { %v2808_v47 = vpop.f32.mrf.mxu0  ;;  %v2912_v62 = vpop.f32.mrf.mxu1 }
 0x17e   :  { %v4108_v16 = vpop.f32.mrf.mxu0  ;;  %v4110_v4 = vpop.f32.mrf.mxu1 }
 0x17f   :  { %4613 = vst [vmem:[#allocation45_spill] sm:$0xff] %v4108_v16  ;;  %4614 = vst [vmem:[#allocation46_spill] sm:$0xff] %v4110_v4 }
 0x180   :  { %v2809_v29 = vpop.f32.mrf.mxu0  ;;  %v2913_v55 = vpop.f32.mrf.mxu1 }
 0x182   :  { %v4120_v0 = vpop.f32.mrf.mxu0  ;;  %v4122_v47 = vpop.f32.mrf.mxu1  ;;  %3015 = vmatmul.mubr.msk.bf16.gmra.mxu0 %vm203_vm1, %v3228_v30  ;;  %3119 = vmatmul.mubr.msk.bf16.gmra.mxu1 %vm203_vm1, %v3229_v33  ;;  %v3230_v30 = vld [vmem:[%s4513_s0 + $0x240] sm:$0xff]  }
 0x183   :  { %4615 = vst [vmem:[#allocation47_spill] sm:$0xff] %v4120_v0  ;;  %4616 = vst [vmem:[#allocation48_spill] sm:$0xff] %v4122_v47  ;;  %3018 = vmatprep.mubr.msk.bf16.mxu0 %vm3235_vm0, %v4580_v41  ;;  %3122 = vmatprep.mubr.msk.bf16.mxu1 %vm3235_vm0, %v4580_v41  ;;  %v3231_v33 = vld [vmem:[%s4513_s0 + $0x304] sm:$0xff]  }
 0x184   :  { %v2812_v23 = vpop.f32.mrf.mxu0  ;;  %v2916_v29 = vpop.f32.mrf.mxu1 }
 0x186   :  { %v4132_v55 = vpop.f32.mrf.mxu0  ;;  %v4134_v4 = vpop.f32.mrf.mxu1 }
 0x187   :  { %4617 = vst [vmem:[#allocation49_spill] sm:$0xff] %v4132_v55  ;;  %4618 = vst [vmem:[#allocation50_spill] sm:$0xff] %v4134_v4  ;;  %v3232_v55 = vld [vmem:[%s4513_s0 + $0x248] ss:$0 sps:$4 sm:$0xff]  }
 0x188   :  { %v2813_v47 = vpop.f32.mrf.mxu0  ;;  %v2917_v0 = vpop.f32.mrf.mxu1 }
 0x18a   :  { %v4144_v16 = vpop.f32.mrf.mxu0  ;;  %v4146_v23 = vpop.f32.mrf.mxu1  ;;  %3019 = vmatmul.mubr.msk.bf16.gmra.mxu0 %vm203_vm1, %v3230_v30  ;;  %3123 = vmatmul.mubr.msk.bf16.gmra.mxu1 %vm203_vm1, %v3231_v33  ;;  %v3233_v30 = vld [vmem:[%s4513_s0 + $0x30c] ss:$0 sps:$4 sm:$0xff]  }
 0x18b   :  { %4619 = vst [vmem:[#allocation51_spill] sm:$0xff] %v4144_v16  ;;  %4620 = vst [vmem:[#allocation52_spill] sm:$0xff] %v4146_v23  ;;  %3022 = vmatprep.mubr.msk.bf16.mxu0 %vm3235_vm0, %v4580_v41  ;;  %3126 = vmatprep.mubr.msk.bf16.mxu1 %vm3235_vm0, %v4580_v41 }
 0x18c   :  { %v2816_v62 = vpop.f32.mrf.mxu0  ;;  %v2920_v47 = vpop.f32.mrf.mxu1 }
 0x18e   :  { %v508_v0 = vpop.f32.mrf.mxu0  ;;  %v988_v4 = vpop.f32.mrf.mxu1 }
 0x18f   :  { %v4167_v4 = vld [vmem:[%s4514_s2] ss:$0 sm:$0xff]  ;;  %v4621_v0 = vmax.f32 %v3568_v53, %v3571_v54 }
 0x190   :  { %v2817_v33 = vpop.f32.mrf.mxu0  ;;  %v2921_v29 = vpop.f32.mrf.mxu1 }
 0x192   :  { %v1322_v23 = vpop.f32.mrf.mxu0  ;;  %3023 = vmatmul.mubr.msk.bf16.gmra.mxu0 %vm203_vm1, %v3232_v55  ;;  %v1802_v16 = vpop.f32.mrf.mxu1  ;;  %3127 = vmatmul.mubr.msk.bf16.gmra.mxu1 %vm203_vm1, %v3233_v30 }
 0x193   :  { %v2000_v41 = vmax.f32 %v1322_v23, %v1802_v16  ;;  %v4622_v16 = vmax.f32 %v3580_v58, %v3582_v59 }
 0x194   :  { %v2928_v62 = vpop.f32.mrf.mxu0  ;;  %v3032_v47 = vpop.f32.mrf.mxu1 }
 0x195   :  { %v2049_v11 = vmax.f32 %v4621_v0, %v2000_v41 }
 0x196   :  { %v1325_v33 = vpop.f32.mrf.mxu0  ;;  %v1805_v29 = vpop.f32.mrf.mxu1 }
 0x197   :  { %v2105_v28 = vadd.f32 %v4167_v4, %v2049_v11  ;;  %v2001_v55 = vmax.f32 %v1325_v33, %v1805_v29 }
 0x198   :  { %v2929_v40 = vpop.f32.mrf.mxu0  ;;  %v3033_v18 = vpop.f32.mrf.mxu1 }
 0x199   :  { %v2154_v30 = vmax.f32 %v2105_v28, 0.0  ;;  %v2050_v23 = vmax.f32 %v4622_v16, %v2001_v55  ;;  %v4623_v18 = vmax.f32 %v3592_v2, %v3594_v3 }
 0x19a   :  { %v1330_v35 = vpop.f32.mrf.mxu0  ;;  %v1810_v52 = vpop.f32.mrf.mxu1 }
 0x19b   :  { %2203 = vst [vmem:[%s4515_s3] sm:$0xff] %v2154_v30  ;;  %v2106_v53 = vadd.f32 %v4167_v4, %v2050_v23  ;;  %v2002_v54 = vmax.f32 %v1330_v35, %v1810_v52  ;;  %v4624_v35 = vmax.f32 %v3604_v7, %v3606_v8 }
 0x19c   :  { %v2932_v41 = vpop.f32.mrf.mxu0  ;;  %v3036_v62 = vpop.f32.mrf.mxu1 }
 0x19d   :  { %v2155_v11 = vmax.f32 %v2106_v53, 0.0  ;;  %v2051_v28 = vmax.f32 %v4623_v18, %v2002_v54  ;;  %v4625_v54 = vmax.f32 %v3616_v14, %v3618_v15 }
 0x19e   :  { %v1333_v40 = vpop.f32.mrf.mxu0  ;;  %v1813_v47 = vpop.f32.mrf.mxu1 }
 0x19f   :  { %2204 = vst [vmem:[%s4515_s3 + $0x8] sm:$0xff] %v2155_v11  ;;  %v2107_v58 = vadd.f32 %v4167_v4, %v2051_v28  ;;  %v2003_v59 = vmax.f32 %v1333_v40, %v1813_v47  ;;  %v4626_v47 = vmax.f32 %v3628_v19, %v3630_v20 }
 0x1a0   :  { %v2933_v0 = vpop.f32.mrf.mxu0  ;;  %v3037_v33 = vpop.f32.mrf.mxu1 }
 0x1a1   :  { %v2156_v29 = vmax.f32 %v2107_v58, 0.0  ;;  %v2052_v52 = vmax.f32 %v4624_v35, %v2003_v59 }
 0x1a2   :  { %v1338_v55 = vpop.f32.mrf.mxu0  ;;  %v1818_v30 = vpop.f32.mrf.mxu1 }
 0x1a3   :  { %2205 = vst [vmem:[%s4515_s3 + $0x10] sm:$0xff] %v2156_v29  ;;  %v2108_v2 = vadd.f32 %v4167_v4, %v2052_v52  ;;  %v2004_v3 = vmax.f32 %v1338_v55, %v1818_v30  ;;  %v4627_v52 = vmax.f32 %v3640_v26, %v3642_v27 }
 0x1a4   :  { %v2936_v16 = vpop.f32.mrf.mxu0  ;;  %v3040_v23 = vpop.f32.mrf.mxu1 }
 0x1a5   :  { %v2157_v53 = vmax.f32 %v2108_v2, 0.0  ;;  %v2053_v41 = vmax.f32 %v4625_v54, %v2004_v3 }
 0x1a6   :  { %v1341_v62 = vpop.f32.mrf.mxu0  ;;  %v1821_v11 = vpop.f32.mrf.mxu1 }
 0x1a7   :  { %2206 = vst [vmem:[%s4515_s3 + $0x18] sm:$0xff] %v2157_v53  ;;  %v2109_v7 = vadd.f32 %v4167_v4, %v2053_v41  ;;  %v2005_v8 = vmax.f32 %v1341_v62, %v1821_v11  ;;  %v4628_v53 = vmax.f32 %v3652_v31, %v3654_v32 }
 0x1a8   :  { %v2937_v18 = vpop.f32.mrf.mxu0  ;;  %v3041_v28 = vpop.f32.mrf.mxu1 }
 0x1a9   :  { %v2158_v40 = vmax.f32 %v2109_v7, 0.0  ;;  %v2054_v58 = vmax.f32 %v4626_v47, %v2005_v8  ;;  %v4629_v18 = vmax.f32 %v3664_v38, %v3666_v39 }
 0x1aa   :  { %v1346_v59 = vpop.f32.mrf.mxu0  ;;  %v1826_v0 = vpop.f32.mrf.mxu1 }
 0x1ab   :  { %2207 = vst [vmem:[%s4515_s3 + $0x20] sm:$0xff] %v2158_v40  ;;  %v2110_v14 = vadd.f32 %v4167_v4, %v2054_v58  ;;  %v2006_v15 = vmax.f32 %v1346_v59, %v1826_v0 }
 0x1ac   :  { %v2940_v33 = vpop.f32.mrf.mxu0  ;;  %v3044_v29 = vpop.f32.mrf.mxu1 }
 0x1ad   :  { %v2159_v35 = vmax.f32 %v2110_v14, 0.0  ;;  %v2055_v55 = vmax.f32 %v4627_v52, %v2006_v15  ;;  %v4630_v14 = vmax.f32 %v3676_v43, %v3678_v44 }
 0x1ae   :  { %v1349_v30 = vpop.f32.mrf.mxu0  ;;  %v1829_v2 = vpop.f32.mrf.mxu1 }
 0x1af   :  { %2208 = vst [vmem:[%s4515_s3 + $0x28] sm:$0xff] %v2159_v35  ;;  %v2111_v19 = vadd.f32 %v4167_v4, %v2055_v55  ;;  %v2007_v20 = vmax.f32 %v1349_v30, %v1829_v2  ;;  %v4631_v30 = vmax.f32 %v3688_v50, %v3690_v51 }
 0x1b0   :  { %v2941_v3 = vpop.f32.mrf.mxu0  ;;  %v3045_v16 = vpop.f32.mrf.mxu1 }
 0x1b1   :  { %v2160_v23 = vmax.f32 %v2111_v19, 0.0  ;;  %v2056_v54 = vmax.f32 %v4628_v53, %v2007_v20  ;;  %v4632_v53 = vmax.f32 %v3700_v60, %v3702_v61 }
 0x1b2   :  { %v1354_v41 = vpop.f32.mrf.mxu0  ;;  %v1834_v62 = vpop.f32.mrf.mxu1 }
 0x1b3   :  { %2209 = vst [vmem:[%s4515_s3 + $0x30] sm:$0xff] %v2160_v23  ;;  %v2112_v26 = vadd.f32 %v4167_v4, %v2056_v54  ;;  %v2008_v27 = vmax.f32 %v1354_v41, %v1834_v62 }
 0x1b4   :  { %v2944_v11 = vpop.f32.mrf.mxu0  ;;  %v3048_v7 = vpop.f32.mrf.mxu1 }
 0x1b5   :  { %v2161_v8 = vmax.f32 %v2112_v26, 0.0  ;;  %v2057_v28 = vmax.f32 %v4629_v18, %v2008_v27  ;;  %v4633_v7 = vmax.f32 %v3712_v10, %v3714_v12 }
 0x1b6   :  { %v1357_v40 = vpop.f32.mrf.mxu0  ;;  %v1837_v47 = vpop.f32.mrf.mxu1 }
 0x1b7   :  { %2210 = vst [vmem:[%s4515_s3 + $0x38] sm:$0xff] %v2161_v8  ;;  %v2113_v31 = vadd.f32 %v4167_v4, %v2057_v28  ;;  %v2009_v32 = vmax.f32 %v1357_v40, %v1837_v47 }
 0x1b8   :  { %v2945_v58 = vpop.f32.mrf.mxu0  ;;  %v3049_v59 = vpop.f32.mrf.mxu1 }
 0x1b9   :  { %v2162_v0 = vmax.f32 %v2113_v31, 0.0  ;;  %v2058_v15 = vmax.f32 %v4630_v14, %v2009_v32  ;;  %v4634_v32 = vmax.f32 %v3724_v21, %v3726_v22 }
 0x1ba   :  { %v1362_v33 = vpop.f32.mrf.mxu0  ;;  %v1842_v29 = vpop.f32.mrf.mxu1 }
 0x1bb   :  { %2211 = vst [vmem:[%s4515_s3 + $0x40] sm:$0xff] %v2162_v0  ;;  %v2114_v38 = vadd.f32 %v4167_v4, %v2058_v15  ;;  %v2010_v39 = vmax.f32 %v1362_v33, %v1842_v29  ;;  %v4635_v29 = vmax.f32 %v3736_v34, %v3738_v36 }
 0x1bc   :  { %v2948_v35 = vpop.f32.mrf.mxu0  ;;  %v3052_v52 = vpop.f32.mrf.mxu1 }
 0x1bd   :  { %v2163_v55 = vmax.f32 %v2114_v38, 0.0  ;;  %v2059_v2 = vmax.f32 %v4631_v30, %v2010_v39 }
 0x1be   :  { %v1365_v19 = vpop.f32.mrf.mxu0  ;;  %v1845_v20 = vpop.f32.mrf.mxu1 }
 0x1bf   :  { %2212 = vst [vmem:[%s4515_s3 + $0x48] sm:$0xff] %v2163_v55  ;;  %v2115_v43 = vadd.f32 %v4167_v4, %v2059_v2  ;;  %v2011_v44 = vmax.f32 %v1365_v19, %v1845_v20  ;;  %v4636_v2 = vmax.f32 %v3748_v45, %v3750_v46 }
 0x1c0   :  { %v2949_v3 = vpop.f32.mrf.mxu0  ;;  %v3053_v16 = vpop.f32.mrf.mxu1 }
 0x1c1   :  { %v2164_v23 = vmax.f32 %v2115_v43, 0.0  ;;  %v2060_v54 = vmax.f32 %v4632_v53, %v2011_v44 }
 0x1c2   :  { %v1370_v41 = vpop.f32.mrf.mxu0  ;;  %v1850_v62 = vpop.f32.mrf.mxu1 }
 0x1c3   :  { %2213 = vst [vmem:[%s4515_s3 + $0x50] sm:$0xff] %v2164_v23  ;;  %v2116_v50 = vadd.f32 %v4167_v4, %v2060_v54  ;;  %v2012_v51 = vmax.f32 %v1370_v41, %v1850_v62  ;;  %v4637_v23 = vmax.f32 %v3760_v1, %v3762_v6 }
 0x1c4   :  { %v2952_v26 = vpop.f32.mrf.mxu0  ;;  %v3056_v27 = vpop.f32.mrf.mxu1 }
 0x1c5   :  { %v2165_v11 = vmax.f32 %v2116_v50, 0.0  ;;  %v2061_v8 = vmax.f32 %v4633_v7, %v2012_v51  ;;  %v4638_v26 = vmax.f32 %v3772_v24, %v3774_v25 }
 0x1c6   :  { %v1373_v18 = vpop.f32.mrf.mxu0  ;;  %v1853_v28 = vpop.f32.mrf.mxu1 }
 0x1c7   :  { %2214 = vst [vmem:[%s4515_s3 + $0x58] sm:$0xff] %v2165_v11  ;;  %v2117_v60 = vadd.f32 %v4167_v4, %v2061_v8  ;;  %v2013_v61 = vmax.f32 %v1373_v18, %v1853_v28 }
 0x1c8   :  { %v2953_v40 = vpop.f32.mrf.mxu0  ;;  %v3057_v47 = vpop.f32.mrf.mxu1 }
 0x1c9   :  { %v2166_v31 = vmax.f32 %v2117_v60, 0.0  ;;  %v2062_v58 = vmax.f32 %v4634_v32, %v2013_v61  ;;  %v4639_v60 = vmax.f32 %v3784_v49, %v3786_v57 }
 0x1ca   :  { %v1378_v59 = vpop.f32.mrf.mxu0  ;;  %v1858_v0 = vpop.f32.mrf.mxu1 }
 0x1cb   :  { %2215 = vst [vmem:[%s4515_s3 + $0x60] sm:$0xff] %v2166_v31  ;;  %v2118_v10 = vadd.f32 %v4167_v4, %v2062_v58  ;;  %v2014_v12 = vmax.f32 %v1378_v59, %v1858_v0  ;;  %v4640_v59 = vmax.f32 %v3796_v42, %v3798_v48 }
 0x1cc   :  { %v2956_v14 = vpop.f32.mrf.mxu0  ;;  %v3060_v15 = vpop.f32.mrf.mxu1 }
 0x1cd   :  { %v2167_v33 = vmax.f32 %v2118_v10, 0.0  ;;  %v2063_v38 = vmax.f32 %v4635_v29, %v2014_v12  ;;  %v4641_v29 = vmax.f32 %v3808_v56, %v3810_v17 }
 0x1ce   :  { %v1381_v39 = vpop.f32.mrf.mxu0  ;;  %v1861_v35 = vpop.f32.mrf.mxu1 }
 0x1cf   :  { %2216 = vst [vmem:[%s4515_s3 + $0x68] sm:$0xff] %v2167_v33  ;;  %v2119_v21 = vadd.f32 %v4167_v4, %v2063_v38  ;;  %v2015_v22 = vmax.f32 %v1381_v39, %v1861_v35 }
 0x1d0   :  { %v2957_v52 = vpop.f32.mrf.mxu0  ;;  %v3061_v55 = vpop.f32.mrf.mxu1 }
 0x1d1   :  { %v2168_v30 = vmax.f32 %v2119_v21, 0.0  ;;  %v2064_v19 = vmax.f32 %v4636_v2, %v2015_v22  ;;  %v4642_v55 = vmax.f32 %v3820_v9, %v3822_v37 }
 0x1d2   :  { %v1386_v20 = vpop.f32.mrf.mxu0  ;;  %v1866_v43 = vpop.f32.mrf.mxu1 }
 0x1d3   :  { %2217 = vst [vmem:[%s4515_s3 + $0x70] sm:$0xff] %v2168_v30  ;;  %v2120_v34 = vadd.f32 %v4167_v4, %v2064_v19  ;;  %v2016_v36 = vmax.f32 %v1386_v20, %v1866_v43 }
 0x1d4   :  { %v2960_v44 = vpop.f32.mrf.mxu0  ;;  %v3064_v3 = vpop.f32.mrf.mxu1 }
 0x1d5   :  { %v2169_v16 = vmax.f32 %v2120_v34, 0.0  ;;  %v2065_v53 = vmax.f32 %v4637_v23, %v2016_v36  ;;  %v4643_v36 = vmax.f32 %v3832_v5, %v3834_v63 }
 0x1d6   :  { %v1389_v54 = vpop.f32.mrf.mxu0  ;;  %v1869_v41 = vpop.f32.mrf.mxu1 }
 0x1d7   :  { %2218 = vst [vmem:[%s4515_s3 + $0x78] sm:$0xff] %v2169_v16  ;;  %v2121_v45 = vadd.f32 %v4167_v4, %v2065_v53  ;;  %v2017_v46 = vmax.f32 %v1389_v54, %v1869_v41  ;;  %v4644_v41 = vld [vmem:[#allocation2_spill] sm:$0xff] }
 0x1d8   :  { %v2961_v62 = vpop.f32.mrf.mxu0  ;;  %v3065_v50 = vpop.f32.mrf.mxu1 }
 0x1d9   :  { %v2170_v51 = vmax.f32 %v2121_v45, 0.0  ;;  %v2066_v27 = vmax.f32 %v4638_v26, %v2017_v46  ;;  %v4645_v45 = vmax.f32 %v3844_v13, %v4644_v41 }
 0x1da   :  { %v1394_v11 = vpop.f32.mrf.mxu0  ;;  %v1874_v7 = vpop.f32.mrf.mxu1 }
 0x1db   :  { %2219 = vst [vmem:[%s4515_s3 + $0x80] sm:$0xff] %v2170_v51  ;;  %v2122_v1 = vadd.f32 %v4167_v4, %v2066_v27  ;;  %v2018_v6 = vmax.f32 %v1394_v11, %v1874_v7  ;;  %v4646_v11 = vld [vmem:[#allocation3_spill] sm:$0xff]  ;;  %v4647_v7 = vld [vmem:[#allocation4_spill] sm:$0xff] }
 0x1dc   :  { %v2964_v8 = vpop.f32.mrf.mxu0  ;;  %v3068_v18 = vpop.f32.mrf.mxu1 }
 0x1dd   :  { %v2171_v28 = vmax.f32 %v2122_v1, 0.0  ;;  %v2067_v61 = vmax.f32 %v4639_v60, %v2018_v6  ;;  %v4648_v1 = vmax.f32 %v4646_v11, %v4647_v7 }
 0x1de   :  { %v1397_v40 = vpop.f32.mrf.mxu0  ;;  %v1877_v47 = vpop.f32.mrf.mxu1 }
 0x1df   :  { %2220 = vst [vmem:[%s4515_s3 + $0x88] sm:$0xff] %v2171_v28  ;;  %v2123_v24 = vadd.f32 %v4167_v4, %v2067_v61  ;;  %v2019_v25 = vmax.f32 %v1397_v40, %v1877_v47  ;;  %v4649_v47 = vld [vmem:[#allocation5_spill] sm:$0xff] }
 0x1e0   :  { %v2965_v31 = vpop.f32.mrf.mxu0  ;;  %v3069_v32 = vpop.f32.mrf.mxu1 }
 0x1e1   :  { %v2172_v58 = vmax.f32 %v2123_v24, 0.0  ;;  %v2068_v0 = vmax.f32 %v4640_v59, %v2019_v25  ;;  %v4650_v24 = vld [vmem:[#allocation6_spill] sm:$0xff] }
 0x1e2   :  { %v1402_v10 = vpop.f32.mrf.mxu0  ;;  %v1882_v12 = vpop.f32.mrf.mxu1  ;;  %v4651_v25 = vmax.f32 %v4649_v47, %v4650_v24 }
 0x1e3   :  { %2221 = vst [vmem:[%s4515_s3 + $0x90] sm:$0xff] %v2172_v58  ;;  %v2124_v49 = vadd.f32 %v4167_v4, %v2068_v0  ;;  %v2020_v57 = vmax.f32 %v1402_v10, %v1882_v12 }
 0x1e4   :  { %v2968_v14 = vpop.f32.mrf.mxu0  ;;  %v3072_v15 = vpop.f32.mrf.mxu1 }
 0x1e5   :  { %v2173_v33 = vmax.f32 %v2124_v49, 0.0  ;;  %v2069_v38 = vmax.f32 %v4641_v29, %v2020_v57  ;;  %v4652_v57 = vld [vmem:[#allocation7_spill] sm:$0xff]  ;;  %v4653_v14 = vld [vmem:[#allocation8_spill] sm:$0xff] }
 0x1e6   :  { %v1405_v39 = vpop.f32.mrf.mxu0  ;;  %v1885_v35 = vpop.f32.mrf.mxu1  ;;  %v4654_v15 = vmax.f32 %v4652_v57, %v4653_v14 }
 0x1e7   :  { %2222 = vst [vmem:[%s4515_s3 + $0x98] sm:$0xff] %v2173_v33  ;;  %v2125_v42 = vadd.f32 %v4167_v4, %v2069_v38  ;;  %v2021_v48 = vmax.f32 %v1405_v39, %v1885_v35 }
 0x1e8   :  { %v2969_v21 = vpop.f32.mrf.mxu0  ;;  %v3073_v22 = vpop.f32.mrf.mxu1 }
 0x1e9   :  { %v2174_v52 = vmax.f32 %v2125_v42, 0.0  ;;  %v2070_v30 = vmax.f32 %v4642_v55, %v2021_v48  ;;  %v4655_v22 = vld [vmem:[#allocation9_spill] sm:$0xff] }
 0x1ea   :  { %v1410_v2 = vpop.f32.mrf.mxu0  ;;  %v1890_v19 = vpop.f32.mrf.mxu1 }
 0x1eb   :  { %2223 = vst [vmem:[%s4515_s3 + $0xa0] sm:$0xff] %v2174_v52  ;;  %v2126_v56 = vadd.f32 %v4167_v4, %v2070_v30  ;;  %v2022_v17 = vmax.f32 %v1410_v2, %v1890_v19  ;;  %v4656_v52 = vld [vmem:[#allocation10_spill] sm:$0xff] }
 0x1ec   :  { %v2972_v20 = vpop.f32.mrf.mxu0  ;;  %v3076_v43 = vpop.f32.mrf.mxu1  ;;  %v4657_v55 = vmax.f32 %v4655_v22, %v4656_v52 }
 0x1ed   :  { %v2175_v34 = vmax.f32 %v2126_v56, 0.0  ;;  %v2071_v44 = vmax.f32 %v4643_v36, %v2022_v17  ;;  %v4658_v36 = vld [vmem:[#allocation11_spill] sm:$0xff] }
 0x1ee   :  { %v1413_v3 = vpop.f32.mrf.mxu0  ;;  %v1893_v16 = vpop.f32.mrf.mxu1 }
 0x1ef   :  { %2224 = vst [vmem:[%s4515_s3 + $0xa8] sm:$0xff] %v2175_v34  ;;  %v2127_v37 = vadd.f32 %v4167_v4, %v2071_v44  ;;  %v2023_v9 = vmax.f32 %v1413_v3, %v1893_v16  ;;  %v4659_v44 = vld [vmem:[#allocation12_spill] sm:$0xff] }
 0x1f0   :  { %v2973_v23 = vpop.f32.mrf.mxu0  ;;  %v3077_v53 = vpop.f32.mrf.mxu1  ;;  %v4660_v3 = vmax.f32 %v4658_v36, %v4659_v44 }
 0x1f1   :  { %v2176_v54 = vmax.f32 %v2127_v37, 0.0  ;;  %v2072_v46 = vmax.f32 %v4645_v45, %v2023_v9 }
 0x1f2   :  { %v1418_v62 = vpop.f32.mrf.mxu0  ;;  %v1898_v50 = vpop.f32.mrf.mxu1 }
 0x1f3   :  { %2225 = vst [vmem:[%s4515_s3 + $0xb0] sm:$0xff] %v2176_v54  ;;  %v2128_v5 = vadd.f32 %v4167_v4, %v2072_v46  ;;  %v2024_v63 = vmax.f32 %v1418_v62, %v1898_v50  ;;  %v4661_v46 = vld [vmem:[#allocation13_spill] sm:$0xff]  ;;  %v4662_v62 = vld [vmem:[#allocation14_spill] sm:$0xff] }
 0x1f4   :  { %v2976_v51 = vpop.f32.mrf.mxu0  ;;  %v3080_v26 = vpop.f32.mrf.mxu1  ;;  %v4663_v50 = vmax.f32 %v4661_v46, %v4662_v62 }
 0x1f5   :  { %v2177_v27 = vmax.f32 %v2128_v5, 0.0  ;;  %v2073_v6 = vmax.f32 %v4648_v1, %v2024_v63 }
 0x1f6   :  { %v1421_v8 = vpop.f32.mrf.mxu0  ;;  %v1901_v18 = vpop.f32.mrf.mxu1 }
 0x1f7   :  { %2226 = vst [vmem:[%s4515_s3 + $0xb8] sm:$0xff] %v2177_v27  ;;  %v2129_v13 = vadd.f32 %v4167_v4, %v2073_v6  ;;  %v2025_v28 = vmax.f32 %v1421_v8, %v1901_v18  ;;  %v4664_v6 = vld [vmem:[#allocation15_spill] sm:$0xff]  ;;  %v4665_v8 = vld [vmem:[#allocation16_spill] sm:$0xff] }
 0x1f8   :  { %v2977_v60 = vpop.f32.mrf.mxu0  ;;  %v3081_v61 = vpop.f32.mrf.mxu1  ;;  %v4666_v18 = vmax.f32 %v4664_v6, %v4665_v8 }
 0x1f9   :  { %v2178_v40 = vmax.f32 %v2129_v13, 0.0  ;;  %v2074_v31 = vmax.f32 %v4651_v25, %v2025_v28 }
 0x1fa   :  { %v1426_v32 = vpop.f32.mrf.mxu0  ;;  %v1906_v58 = vpop.f32.mrf.mxu1 }
 0x1fb   :  { %2227 = vst [vmem:[%s4515_s3 + $0xc0] sm:$0xff] %v2178_v40  ;;  %v2130_v59 = vadd.f32 %v4167_v4, %v2074_v31  ;;  %v2026_v0 = vmax.f32 %v1426_v32, %v1906_v58  ;;  %v4667_v31 = vld [vmem:[#allocation17_spill] sm:$0xff]  ;;  %v4668_v32 = vld [vmem:[#allocation18_spill] sm:$0xff] }
 0x1fc   :  { %v2980_v10 = vpop.f32.mrf.mxu0  ;;  %v3084_v12 = vpop.f32.mrf.mxu1  ;;  %v4669_v58 = vmax.f32 %v4667_v31, %v4668_v32 }
 0x1fd   :  { %v2179_v49 = vmax.f32 %v2130_v59, 0.0  ;;  %v2075_v33 = vmax.f32 %v4654_v15, %v2026_v0 }
 0x1fe   :  { %v1429_v29 = vpop.f32.mrf.mxu0  ;;  %v1909_v38 = vpop.f32.mrf.mxu1 }
 0x1ff   :  { %2228 = vst [vmem:[%s4515_s3 + $0xc8] sm:$0xff] %v2179_v49  ;;  %v2131_v39 = vadd.f32 %v4167_v4, %v2075_v33  ;;  %v2027_v35 = vmax.f32 %v1429_v29, %v1909_v38  ;;  %v4670_v33 = vld [vmem:[#allocation19_spill] sm:$0xff]  ;;  %v4671_v29 = vld [vmem:[#allocation20_spill] sm:$0xff] }
 0x200   :  { %v2981_v42 = vpop.f32.mrf.mxu0  ;;  %v3085_v48 = vpop.f32.mrf.mxu1  ;;  %v4672_v38 = vmax.f32 %v4670_v33, %v4671_v29 }
 0x201   :  { %v2180_v21 = vmax.f32 %v2131_v39, 0.0  ;;  %v2076_v30 = vmax.f32 %v4657_v55, %v2027_v35 }
 0x202   :  { %v1434_v2 = vpop.f32.mrf.mxu0  ;;  %v1914_v19 = vpop.f32.mrf.mxu1 }
 0x203   :  { %2229 = vst [vmem:[%s4515_s3 + $0xd0] sm:$0xff] %v2180_v21  ;;  %v2132_v56 = vadd.f32 %v4167_v4, %v2076_v30  ;;  %v2028_v17 = vmax.f32 %v1434_v2, %v1914_v19  ;;  %v4673_v30 = vld [vmem:[#allocation21_spill] sm:$0xff]  ;;  %v4674_v2 = vld [vmem:[#allocation22_spill] sm:$0xff] }
 0x204   :  { %v2984_v20 = vpop.f32.mrf.mxu0  ;;  %v3088_v43 = vpop.f32.mrf.mxu1  ;;  %v4675_v19 = vmax.f32 %v4673_v30, %v4674_v2 }
 0x205   :  { %v2181_v34 = vmax.f32 %v2132_v56, 0.0  ;;  %v2077_v16 = vmax.f32 %v4660_v3, %v2028_v17 }
 0x206   :  { %v1437_v37 = vpop.f32.mrf.mxu0  ;;  %v1917_v9 = vpop.f32.mrf.mxu1 }
 0x207   :  { %2230 = vst [vmem:[%s4515_s3 + $0xd8] sm:$0xff] %v2181_v34  ;;  %v2133_v23 = vadd.f32 %v4167_v4, %v2077_v16  ;;  %v2029_v53 = vmax.f32 %v1437_v37, %v1917_v9  ;;  %v4676_v16 = vld [vmem:[#allocation23_spill] sm:$0xff]  ;;  %v4677_v37 = vld [vmem:[#allocation24_spill] sm:$0xff] }
 0x208   :  { %v2985_v54 = vpop.f32.mrf.mxu0  ;;  %v3089_v41 = vpop.f32.mrf.mxu1  ;;  %v4678_v9 = vmax.f32 %v4676_v16, %v4677_v37 }
 0x209   :  { %v2182_v45 = vmax.f32 %v2133_v23, 0.0  ;;  %v2078_v5 = vmax.f32 %v4663_v50, %v2029_v53 }
 0x20a   :  { %v1442_v63 = vpop.f32.mrf.mxu0  ;;  %v1922_v51 = vpop.f32.mrf.mxu1 }
 0x20b   :  { %2231 = vst [vmem:[%s4515_s3 + $0xe0] sm:$0xff] %v2182_v45  ;;  %v2134_v26 = vadd.f32 %v4167_v4, %v2078_v5  ;;  %v2030_v27 = vmax.f32 %v1442_v63, %v1922_v51  ;;  %v4679_v5 = vld [vmem:[#allocation25_spill] sm:$0xff]  ;;  %v4680_v63 = vld [vmem:[#allocation26_spill] sm:$0xff] }
 0x20c   :  { %v2988_v11 = vpop.f32.mrf.mxu0  ;;  %v3092_v7 = vpop.f32.mrf.mxu1  ;;  %v4681_v51 = vmax.f32 %v4679_v5, %v4680_v63 }
 0x20d   :  { %v2183_v1 = vmax.f32 %v2134_v26, 0.0  ;;  %v2079_v13 = vmax.f32 %v4666_v18, %v2030_v27 }
 0x20e   :  { %v1445_v28 = vpop.f32.mrf.mxu0  ;;  %v1925_v60 = vpop.f32.mrf.mxu1 }
 0x20f   :  { %2232 = vst [vmem:[%s4515_s3 + $0xe8] sm:$0xff] %v2183_v1  ;;  %v2135_v61 = vadd.f32 %v4167_v4, %v2079_v13  ;;  %v2031_v40 = vmax.f32 %v1445_v28, %v1925_v60  ;;  %v4682_v13 = vld [vmem:[#allocation27_spill] sm:$0xff]  ;;  %v4683_v28 = vld [vmem:[#allocation28_spill] sm:$0xff] }
 0x210   :  { %v2989_v47 = vpop.f32.mrf.mxu0  ;;  %v3093_v24 = vpop.f32.mrf.mxu1  ;;  %v4684_v60 = vmax.f32 %v4682_v13, %v4683_v28 }
 0x211   :  { %v2184_v25 = vmax.f32 %v2135_v61, 0.0  ;;  %v2080_v59 = vmax.f32 %v4669_v58, %v2031_v40 }
 0x212   :  { %v1450_v0 = vpop.f32.mrf.mxu0  ;;  %v1930_v10 = vpop.f32.mrf.mxu1 }
 0x213   :  { %2233 = vst [vmem:[%s4515_s3 + $0xf0] sm:$0xff] %v2184_v25  ;;  %v2136_v12 = vadd.f32 %v4167_v4, %v2080_v59  ;;  %v2032_v49 = vmax.f32 %v1450_v0, %v1930_v10  ;;  %v4685_v59 = vld [vmem:[#allocation29_spill] sm:$0xff]  ;;  %v4686_v0 = vld [vmem:[#allocation30_spill] sm:$0xff] }
 0x214   :  { %v2992_v57 = vpop.f32.mrf.mxu0  ;;  %v3096_v14 = vpop.f32.mrf.mxu1  ;;  %v4687_v10 = vmax.f32 %v4685_v59, %v4686_v0 }
 0x215   :  { %v2185_v15 = vmax.f32 %v2136_v12, 0.0  ;;  %v2081_v39 = vmax.f32 %v4672_v38, %v2032_v49 }
 0x216   :  { %v1453_v35 = vpop.f32.mrf.mxu0  ;;  %v1933_v42 = vpop.f32.mrf.mxu1 }
 0x217   :  { %2234 = vst [vmem:[%s4515_s3 + $0xf8] sm:$0xff] %v2185_v15  ;;  %v2137_v48 = vadd.f32 %v4167_v4, %v2081_v39  ;;  %v2033_v21 = vmax.f32 %v1453_v35, %v1933_v42  ;;  %v4688_v39 = vld [vmem:[#allocation31_spill] sm:$0xff]  ;;  %v4689_v35 = vld [vmem:[#allocation32_spill] sm:$0xff] }
 0x218   :  { %v2993_v22 = vpop.f32.mrf.mxu0  ;;  %v3097_v52 = vpop.f32.mrf.mxu1  ;;  %v4690_v42 = vmax.f32 %v4688_v39, %v4689_v35 }
 0x219   :  { %v2186_v55 = vmax.f32 %v2137_v48, 0.0  ;;  %v2082_v56 = vmax.f32 %v4675_v19, %v2033_v21 }
 0x21a   :  { %v1458_v17 = vpop.f32.mrf.mxu0  ;;  %v1938_v20 = vpop.f32.mrf.mxu1 }
 0x21b   :  { %2235 = vst [vmem:[%s4515_s3 + $0x100] sm:$0xff] %v2186_v55  ;;  %v2138_v43 = vadd.f32 %v4167_v4, %v2082_v56  ;;  %v2034_v34 = vmax.f32 %v1458_v17, %v1938_v20  ;;  %v4691_v56 = vld [vmem:[#allocation33_spill] sm:$0xff]  ;;  %v4692_v17 = vld [vmem:[#allocation34_spill] sm:$0xff] }
 0x21c   :  { %v2996_v36 = vpop.f32.mrf.mxu0  ;;  %v3100_v44 = vpop.f32.mrf.mxu1  ;;  %v4693_v20 = vmax.f32 %v4691_v56, %v4692_v17 }
 0x21d   :  { %v2187_v3 = vmax.f32 %v2138_v43, 0.0  ;;  %v2083_v23 = vmax.f32 %v4678_v9, %v2034_v34 }
 0x21e   :  { %v1461_v53 = vpop.f32.mrf.mxu0  ;;  %v1941_v54 = vpop.f32.mrf.mxu1 }
 0x21f   :  { %2236 = vst [vmem:[%s4515_s3 + $0x108] sm:$0xff] %v2187_v3  ;;  %v2139_v41 = vadd.f32 %v4167_v4, %v2083_v23  ;;  %v2035_v45 = vmax.f32 %v1461_v53, %v1941_v54  ;;  %v4694_v23 = vld [vmem:[#allocation35_spill] sm:$0xff]  ;;  %v4695_v53 = vld [vmem:[#allocation36_spill] sm:$0xff] }
 0x220   :  { %v2997_v46 = vpop.f32.mrf.mxu0  ;;  %v3101_v62 = vpop.f32.mrf.mxu1  ;;  %v4696_v54 = vmax.f32 %v4694_v23, %v4695_v53 }
 0x221   :  { %v2188_v50 = vmax.f32 %v2139_v41, 0.0  ;;  %v2084_v26 = vmax.f32 %v4681_v51, %v2035_v45 }
 0x222   :  { %v1466_v27 = vpop.f32.mrf.mxu0  ;;  %v1946_v11 = vpop.f32.mrf.mxu1 }
 0x223   :  { %2237 = vst [vmem:[%s4515_s3 + $0x110] sm:$0xff] %v2188_v50  ;;  %v2140_v7 = vadd.f32 %v4167_v4, %v2084_v26  ;;  %v2036_v1 = vmax.f32 %v1466_v27, %v1946_v11  ;;  %v4697_v26 = vld [vmem:[#allocation37_spill] sm:$0xff]  ;;  %v4698_v27 = vld [vmem:[#allocation38_spill] sm:$0xff] }
 0x224   :  { %v3000_v6 = vpop.f32.mrf.mxu0  ;;  %v3104_v8 = vpop.f32.mrf.mxu1  ;;  %v4699_v11 = vmax.f32 %v4697_v26, %v4698_v27 }
 0x225   :  { %v2189_v18 = vmax.f32 %v2140_v7, 0.0  ;;  %v2085_v61 = vmax.f32 %v4684_v60, %v2036_v1 }
 0x226   :  { %v1469_v40 = vpop.f32.mrf.mxu0  ;;  %v1949_v47 = vpop.f32.mrf.mxu1 }
 0x227   :  { %2238 = vst [vmem:[%s4515_s3 + $0x118] sm:$0xff] %v2189_v18  ;;  %v2141_v24 = vadd.f32 %v4167_v4, %v2085_v61  ;;  %v2037_v25 = vmax.f32 %v1469_v40, %v1949_v47  ;;  %v4700_v61 = vld [vmem:[#allocation39_spill] sm:$0xff]  ;;  %v4701_v40 = vld [vmem:[#allocation40_spill] sm:$0xff] }
 0x228   :  { %v3001_v31 = vpop.f32.mrf.mxu0  ;;  %v3105_v32 = vpop.f32.mrf.mxu1  ;;  %v4702_v47 = vmax.f32 %v4700_v61, %v4701_v40 }
 0x229   :  { %v2190_v58 = vmax.f32 %v2141_v24, 0.0  ;;  %v2086_v12 = vmax.f32 %v4687_v10, %v2037_v25 }
 0x22a   :  { %v1474_v49 = vpop.f32.mrf.mxu0  ;;  %v1954_v57 = vpop.f32.mrf.mxu1 }
 0x22b   :  { %2239 = vst [vmem:[%s4515_s3 + $0x120] sm:$0xff] %v2190_v58  ;;  %v2142_v14 = vadd.f32 %v4167_v4, %v2086_v12  ;;  %v2038_v15 = vmax.f32 %v1474_v49, %v1954_v57  ;;  %v4703_v12 = vld [vmem:[#allocation41_spill] sm:$0xff]  ;;  %v4704_v49 = vld [vmem:[#allocation42_spill] sm:$0xff] }
 0x22c   :  { %v3004_v33 = vpop.f32.mrf.mxu0  ;;  %v3108_v29 = vpop.f32.mrf.mxu1  ;;  %v4705_v57 = vmax.f32 %v4703_v12, %v4704_v49 }
 0x22d   :  { %v2191_v38 = vmax.f32 %v2142_v14, 0.0  ;;  %v2087_v48 = vmax.f32 %v4690_v42, %v2038_v15 }
 0x22e   :  { %v1477_v21 = vpop.f32.mrf.mxu0  ;;  %v1957_v22 = vpop.f32.mrf.mxu1 }
 0x22f   :  { %2240 = vst [vmem:[%s4515_s3 + $0x128] sm:$0xff] %v2191_v38  ;;  %v2143_v52 = vadd.f32 %v4167_v4, %v2087_v48  ;;  %v2039_v55 = vmax.f32 %v1477_v21, %v1957_v22  ;;  %v4706_v48 = vld [vmem:[#allocation43_spill] sm:$0xff]  ;;  %v4707_v21 = vld [vmem:[#allocation44_spill] sm:$0xff] }
 0x230   :  { %v3005_v30 = vpop.f32.mrf.mxu0  ;;  %v3109_v2 = vpop.f32.mrf.mxu1  ;;  %v4708_v22 = vmax.f32 %v4706_v48, %v4707_v21 }
 0x231   :  { %v2192_v19 = vmax.f32 %v2143_v52, 0.0  ;;  %v2088_v43 = vmax.f32 %v4693_v20, %v2039_v55 }
 0x232   :  { %v1482_v34 = vpop.f32.mrf.mxu0  ;;  %v1962_v36 = vpop.f32.mrf.mxu1 }
 0x233   :  { %2241 = vst [vmem:[%s4515_s3 + $0x130] sm:$0xff] %v2192_v19  ;;  %v2144_v44 = vadd.f32 %v4167_v4, %v2088_v43  ;;  %v2040_v3 = vmax.f32 %v1482_v34, %v1962_v36  ;;  %v4709_v43 = vld [vmem:[#allocation45_spill] sm:$0xff]  ;;  %v4710_v34 = vld [vmem:[#allocation46_spill] sm:$0xff] }
 0x234   :  { %v3008_v16 = vpop.f32.mrf.mxu0  ;;  %v3112_v37 = vpop.f32.mrf.mxu1  ;;  %v4711_v36 = vmax.f32 %v4709_v43, %v4710_v34 }
 0x235   :  { %v2193_v9 = vmax.f32 %v2144_v44, 0.0  ;;  %v2089_v41 = vmax.f32 %v4696_v54, %v2040_v3 }
 0x236   :  { %v1485_v45 = vpop.f32.mrf.mxu0  ;;  %v1965_v46 = vpop.f32.mrf.mxu1 }
 0x237   :  { %2242 = vst [vmem:[%s4515_s3 + $0x138] sm:$0xff] %v2193_v9  ;;  %v2145_v62 = vadd.f32 %v4167_v4, %v2089_v41  ;;  %v2041_v50 = vmax.f32 %v1485_v45, %v1965_v46  ;;  %v4712_v41 = vld [vmem:[#allocation47_spill] sm:$0xff]  ;;  %v4713_v45 = vld [vmem:[#allocation48_spill] sm:$0xff] }
 0x238   :  { %v3009_v5 = vpop.f32.mrf.mxu0  ;;  %v3113_v63 = vpop.f32.mrf.mxu1  ;;  %v4714_v46 = vmax.f32 %v4712_v41, %v4713_v45 }
 0x239   :  { %v2194_v51 = vmax.f32 %v2145_v62, 0.0  ;;  %v2090_v7 = vmax.f32 %v4699_v11, %v2041_v50 }
 0x23a   :  { %v1490_v1 = vpop.f32.mrf.mxu0  ;;  %v1970_v6 = vpop.f32.mrf.mxu1 }
 0x23b   :  { %2243 = vst [vmem:[%s4515_s3 + $0x140] sm:$0xff] %v2194_v51  ;;  %v2146_v8 = vadd.f32 %v4167_v4, %v2090_v7  ;;  %v2042_v18 = vmax.f32 %v1490_v1, %v1970_v6  ;;  %v4715_v7 = vld [vmem:[#allocation49_spill] sm:$0xff]  ;;  %v4716_v1 = vld [vmem:[#allocation50_spill] sm:$0xff] }
 0x23c   :  { %v3012_v13 = vpop.f32.mrf.mxu0  ;;  %v3116_v28 = vpop.f32.mrf.mxu1  ;;  %v4717_v6 = vmax.f32 %v4715_v7, %v4716_v1 }
 0x23d   :  { %v2195_v60 = vmax.f32 %v2146_v8, 0.0  ;;  %v2091_v24 = vmax.f32 %v4702_v47, %v2042_v18 }
 0x23e   :  { %v1493_v25 = vpop.f32.mrf.mxu0  ;;  %v1973_v31 = vpop.f32.mrf.mxu1 }
 0x23f   :  { %2244 = vst [vmem:[%s4515_s3 + $0x148] sm:$0xff] %v2195_v60  ;;  %v2147_v32 = vadd.f32 %v4167_v4, %v2091_v24  ;;  %v2043_v58 = vmax.f32 %v1493_v25, %v1973_v31  ;;  %v4718_v24 = vld [vmem:[#allocation51_spill] sm:$0xff]  ;;  %v4719_v25 = vld [vmem:[#allocation52_spill] sm:$0xff] }
 0x240   :  { %v3013_v59 = vpop.f32.mrf.mxu0  ;;  %v3117_v0 = vpop.f32.mrf.mxu1  ;;  %v4720_v31 = vmax.f32 %v4718_v24, %v4719_v25 }
 0x241   :  { %v2196_v10 = vmax.f32 %v2147_v32, 0.0  ;;  %v2092_v14 = vmax.f32 %v4705_v57, %v2043_v58 }
 0x242   :  { %v1498_v15 = vpop.f32.mrf.mxu0  ;;  %v1978_v33 = vpop.f32.mrf.mxu1 }
 0x243   :  { %2245 = vst [vmem:[%s4515_s3 + $0x150] sm:$0xff] %v2196_v10  ;;  %v2148_v29 = vadd.f32 %v4167_v4, %v2092_v14  ;;  %v2044_v38 = vmax.f32 %v1498_v15, %v1978_v33 }
 0x244   :  { %v3016_v39 = vpop.f32.mrf.mxu0  ;;  %v3120_v35 = vpop.f32.mrf.mxu1 }
 0x245   :  { %v2197_v42 = vmax.f32 %v2148_v29, 0.0  ;;  %v2093_v52 = vmax.f32 %v4708_v22, %v2044_v38 }
 0x246   :  { %v1501_v55 = vpop.f32.mrf.mxu0  ;;  %v1981_v30 = vpop.f32.mrf.mxu1 }
 0x247   :  { %2246 = vst [vmem:[%s4515_s3 + $0x158] sm:$0xff] %v2197_v42  ;;  %v2149_v2 = vadd.f32 %v4167_v4, %v2093_v52  ;;  %v2045_v19 = vmax.f32 %v1501_v55, %v1981_v30 }
 0x248   :  { %v3017_v56 = vpop.f32.mrf.mxu0  ;;  %v3121_v17 = vpop.f32.mrf.mxu1 }
 0x249   :  { %v2198_v20 = vmax.f32 %v2149_v2, 0.0  ;;  %v2094_v44 = vmax.f32 %v4711_v36, %v2045_v19 }
 0x24a   :  { %v1506_v3 = vpop.f32.mrf.mxu0  ;;  %v1986_v16 = vpop.f32.mrf.mxu1 }
 0x24b   :  { %2247 = vst [vmem:[%s4515_s3 + $0x160] sm:$0xff] %v2198_v20  ;;  %v2150_v37 = vadd.f32 %v4167_v4, %v2094_v44  ;;  %v2046_v9 = vmax.f32 %v1506_v3, %v1986_v16 }
 0x24c   :  { %v3020_v23 = vpop.f32.mrf.mxu0  ;;  %v3124_v53 = vpop.f32.mrf.mxu1 }
 0x24d   :  { %v2199_v54 = vmax.f32 %v2150_v37, 0.0  ;;  %v2095_v62 = vmax.f32 %v4714_v46, %v2046_v9 }
 0x24e   :  { %v1509_v50 = vpop.f32.mrf.mxu0  ;;  %v1989_v5 = vpop.f32.mrf.mxu1 }
 0x24f   :  { %2248 = vst [vmem:[%s4515_s3 + $0x168] sm:$0xff] %v2199_v54  ;;  %v2151_v63 = vadd.f32 %v4167_v4, %v2095_v62  ;;  %v2047_v51 = vmax.f32 %v1509_v50, %v1989_v5 }
 0x250   :  { %v3021_v26 = vpop.f32.mrf.mxu0  ;;  %v3125_v27 = vpop.f32.mrf.mxu1 }
 0x251   :  { %v2200_v11 = vmax.f32 %v2151_v63, 0.0  ;;  %v2096_v8 = vmax.f32 %v4717_v6, %v2047_v51 }
 0x252   :  { %v1514_v18 = vpop.f32.mrf.mxu0  ;;  %v1994_v13 = vpop.f32.mrf.mxu1 }
 0x253   :  { %2249 = vst [vmem:[%s4515_s3 + $0x170] sm:$0xff] %v2200_v11  ;;  %v2152_v28 = vadd.f32 %v4167_v4, %v2096_v8  ;;  %v2048_v60 = vmax.f32 %v1514_v18, %v1994_v13 }
 0x254   :  { %v3024_v61 = vpop.f32.mrf.mxu0  ;;  %v3128_v40 = vpop.f32.mrf.mxu1 }
 0x255   :  { %v2201_v47 = vmax.f32 %v2152_v28, 0.0  ;;  %v2097_v32 = vmax.f32 %v4720_v31, %v2048_v60 }
 0x256   :  { %v1517_v58 = vpop.f32.mrf.mxu0  ;;  %v1997_v59 = vpop.f32.mrf.mxu1 }
 0x257   :  { %2250 = vst [vmem:[%s4515_s3 + $0x178] sm:$0xff] %v2201_v47  ;;  %v2153_v0 = vadd.f32 %v4167_v4, %v2097_v32 }
 0x258   :  { %v3025_v10 = vpop.f32.mrf.mxu0  ;;  %v3129_v12 = vpop.f32.mrf.mxu1 }
 0x259   :  { %v2202_v49 = vmax.f32 %v2153_v0, 0.0 }
 0x25b   :  { %2251 = vst [vmem:[%s4515_s3 + $0x180] sm:$0xff] %v2202_v49 }

// kernel: forward.4
= control target key start
LH: loop header
LB: loop body
LE: loop exit
PB: predicated region body
PF: predicated region fallthrough
CT: control target
= control target key end

     0   :  { %v1171_v0 = vmov 0   ;;  %vm188_vm0 = vcmask 588800   ;;  %vm210_vm1 = vcmask 1043456   ;;  %s1680_s1 = inlined_call_operand.vmem [shape: bf16[200,128], index: 1, kind: input, shape index: {}]   ;;  %s1681_s0 = inlined_call_operand.vmem [shape: bf16[4,98,200], index: 0, kind: input, shape index: {}]   ;;  %s1682_s2 = inlined_call_operand.vmem [shape: f32[1,128], index: 2, kind: input, shape index: {}]   ;;  %s1683_s3 = inlined_call_operand.vmem [shape: f32[98,128], index: 3, kind: output, shape index: {}]  }
   0x1   :  { %214 = vmatprep.subr.bf16.mxu0 %v1171_v0  ;;  %397 = vmatprep.subr.bf16.mxu1 %v1171_v0  ;;  %v1197_v1 = vld [vmem:[%s1680_s1 + $0x38] sm:$0xff]   ;;  %v1204_v2 = vld [vmem:[%s1680_s1 + $0x30] sm:$0xff]   ;;  %v1213_v3 = vld [vmem:[%s1680_s1 + $0x28] sm:$0xff]  }
   0x2   :  { %215 = vmatpush1.bf16.msra.mxu0 %v1197_v1  ;;  %398 = vmatpush1.bf16.msra.mxu1 %v1197_v1  ;;  %v1222_v4 = vld [vmem:[%s1680_s1 + $0x20] sm:$0xff]   ;;  %v1234_v6 = vld [vmem:[%s1680_s1 + $0x18] sm:$0xff]   ;;  %v1096_v7 = vld [vmem:[%s1681_s0 + $0x6c] ss:$8 sps:$4 sm:$0xff]  }
   0x3   :  { %216 = vmatprep.subr.bf16.mxu0 %v1171_v0  ;;  %399 = vmatprep.subr.bf16.mxu1 %v1171_v0  ;;  %v1093_v5 = vld [vmem:[%s1681_s0 + $0x4] ss:$8 sps:$4 sm:$0xff]   ;;  %v1248_v8 = vld [vmem:[%s1680_s1 + $0x10] sm:$0xff]   ;;  %v1086_v11 = vld [vmem:[%s1680_s1 + $0x60] ss:$0 sps:$4 sm:$0xff]  }
   0x4   :  { %967 = vmatprep.mubr.msk.bf16.mxu0 %vm188_vm0, %v1093_v5  ;;  %1001 = vmatprep.mubr.msk.bf16.mxu1 %vm188_vm0, %v1096_v7  ;;  %v1257_v9 = vld [vmem:[%s1680_s1 + $0x8] sm:$0xff]   ;;  %v1266_v10 = vld [vmem:[%s1680_s1] sm:$0xff]   ;;  %v1277_v12 = vsel %vm210_vm1, %v1086_v11, 0  ;;  %v1284_v13 = vld [vmem:[%s1680_s1 + $0x58] sm:$0xff]  }
   0x5   :  { %v1293_v14 = vld [vmem:[%s1680_s1 + $0x50] sm:$0xff]   ;;  %v1302_v15 = vld [vmem:[%s1680_s1 + $0x48] sm:$0xff]   ;;  %v1311_v16 = vld [vmem:[%s1680_s1 + $0x40] sm:$0xff]  }
   0x6   :  { %217 = vmatpush1.bf16.msra.mxu0 %v1204_v2  ;;  %400 = vmatpush1.bf16.msra.mxu1 %v1204_v2  ;;  %v1091_v17 = vld [vmem:[%s1681_s0] ss:$8 sps:$4 sm:$0xff]   ;;  %v1097_v19 = vld [vmem:[%s1681_s0 + $0x14] ss:$8 sps:$4 sm:$0xff]   ;;  %v1101_v21 = vld [vmem:[%s1681_s0 + $0x10] ss:$8 sps:$4 sm:$0xff]  }
   0x7   :  { %218 = vmatprep.subr.bf16.mxu0 %v1171_v0  ;;  %401 = vmatprep.subr.bf16.mxu1 %v1171_v0  ;;  %v1094_v18 = vld [vmem:[%s1681_s0 + $0x68] ss:$8 sps:$4 sm:$0xff]   ;;  %v1099_v20 = vld [vmem:[%s1681_s0 + $0x7c] ss:$8 sps:$4 sm:$0xff]   ;;  %v1102_v22 = vld [vmem:[%s1681_s0 + $0x78] ss:$8 sps:$4 sm:$0xff]  }
   0x8   :  { %v1103_v23 = vld [vmem:[%s1681_s0 + $0x24] ss:$8 sps:$4 sm:$0xff]   ;;  %v1107_v25 = vld [vmem:[%s1681_s0 + $0x20] ss:$8 sps:$4 sm:$0xff]   ;;  %v1109_v27 = vld [vmem:[%s1681_s0 + $0x34] ss:$8 sps:$4 sm:$0xff]  }
   0x9   :  { %v1105_v24 = vld [vmem:[%s1681_s0 + $0x8c] ss:$8 sps:$4 sm:$0xff]   ;;  %v1108_v26 = vld [vmem:[%s1681_s0 + $0x88] ss:$8 sps:$4 sm:$0xff]   ;;  %v1111_v28 = vld [vmem:[%s1681_s0 + $0x9c] ss:$8 sps:$4 sm:$0xff]  }
   0xa   :  { %219 = vmatpush1.bf16.msra.mxu0 %v1213_v3  ;;  %402 = vmatpush1.bf16.msra.mxu1 %v1213_v3  ;;  %v1113_v29 = vld [vmem:[%s1681_s0 + $0x30] ss:$8 sps:$4 sm:$0xff]   ;;  %v1115_v31 = vld [vmem:[%s1681_s0 + $0x44] ss:$8 sps:$4 sm:$0xff]   ;;  %v1119_v33 = vld [vmem:[%s1681_s0 + $0x40] ss:$8 sps:$4 sm:$0xff]  }
   0xb   :  { %220 = vmatprep.subr.bf16.mxu0 %v1171_v0  ;;  %403 = vmatprep.subr.bf16.mxu1 %v1171_v0  ;;  %v1114_v30 = vld [vmem:[%s1681_s0 + $0x98] ss:$8 sps:$4 sm:$0xff]   ;;  %v1117_v32 = vld [vmem:[%s1681_s0 + $0xac] ss:$8 sps:$4 sm:$0xff]   ;;  %v1120_v34 = vld [vmem:[%s1681_s0 + $0xa8] ss:$8 sps:$4 sm:$0xff]  }
   0xc   :  { %v1121_v35 = vld [vmem:[%s1681_s0 + $0x54] ss:$8 sps:$4 sm:$0xff]   ;;  %v52_v37 = vld [vmem:[%s1681_s0 + $0x60] sm:$0x11]  ;;  %v986_v38 = vld [vmem:[%s1681_s0 + $0xc8] sm:$0x11] }
   0xd   :  { %v1123_v36 = vld [vmem:[%s1681_s0 + $0xbc] ss:$8 sps:$4 sm:$0xff]   ;;  %v1125_v39 = vld [vmem:[%s1681_s0 + $0x50] ss:$8 sps:$4 sm:$0xff]   ;;  %v953_v41 = vcombine.high %v52_v37, %v52_v37  ;;  %v1000_v42 = vcombine.high %v986_v38, %v986_v38  ;;  %v952_v43 = vcombine.low %v52_v37, %v52_v37  ;;  %v999_v44 = vcombine.low %v986_v38, %v986_v38  ;;  %v1139_v50 = vld [vmem:[%s1681_s0 + $0x14c] ss:$8 sps:$4 sm:$0xff]  }
   0xe   :  { %221 = vmatpush1.bf16.msra.mxu0 %v1222_v4  ;;  %404 = vmatpush1.bf16.msra.mxu1 %v1222_v4  ;;  %v1126_v40 = vld [vmem:[%s1681_s0 + $0xb8] ss:$8 sps:$4 sm:$0xff]   ;;  %v1133_v45 = vld [vmem:[%s1681_s0 + $0xd4] ss:$8 sps:$4 sm:$0xff]   ;;  %v1137_v49 = vld [vmem:[%s1681_s0 + $0xe4] ss:$8 sps:$4 sm:$0xff]  }
   0xf   :  { %222 = vmatprep.subr.bf16.mxu0 %v1171_v0  ;;  %405 = vmatprep.subr.bf16.mxu1 %v1171_v0  ;;  %v1136_v46 = vld [vmem:[%s1681_s0 + $0x13c] ss:$8 sps:$4 sm:$0xff]   ;;  %v1131_v47 = vld [vmem:[%s1681_s0 + $0xd0] ss:$8 sps:$4 sm:$0xff]   ;;  %v1141_v51 = vld [vmem:[%s1681_s0 + $0xe0] ss:$8 sps:$4 sm:$0xff]  }
  0x10   :  { %v1134_v48 = vld [vmem:[%s1681_s0 + $0x138] ss:$8 sps:$4 sm:$0xff]   ;;  %v1142_v52 = vld [vmem:[%s1681_s0 + $0x148] ss:$8 sps:$4 sm:$0xff]   ;;  %v1143_v53 = vld [vmem:[%s1681_s0 + $0xf4] ss:$8 sps:$4 sm:$0xff]  }
  0x11   :  { %v1145_v54 = vld [vmem:[%s1681_s0 + $0x15c] ss:$8 sps:$4 sm:$0xff]   ;;  %v1147_v55 = vld [vmem:[%s1681_s0 + $0xf0] ss:$8 sps:$4 sm:$0xff]   ;;  %v1151_v58 = vld [vmem:[%s1681_s0 + $0x16c] ss:$8 sps:$4 sm:$0xff]  }
  0x12   :  { %223 = vmatpush1.bf16.msra.mxu0 %v1234_v6  ;;  %406 = vmatpush1.bf16.msra.mxu1 %v1234_v6  ;;  %v1148_v56 = vld [vmem:[%s1681_s0 + $0x158] ss:$8 sps:$4 sm:$0xff]   ;;  %v1149_v57 = vld [vmem:[%s1681_s0 + $0x104] ss:$8 sps:$4 sm:$0xff]   ;;  %v1154_v60 = vld [vmem:[%s1681_s0 + $0x168] ss:$8 sps:$4 sm:$0xff]  }
  0x13   :  { %224 = vmatprep.subr.bf16.mxu0 %v1171_v0  ;;  %407 = vmatprep.subr.bf16.mxu1 %v1171_v0  ;;  %v1153_v59 = vld [vmem:[%s1681_s0 + $0x100] ss:$8 sps:$4 sm:$0xff]   ;;  %v1155_v61 = vld [vmem:[%s1681_s0 + $0x114] ss:$8 sps:$4 sm:$0xff]   ;;  %v1159_v63 = vld [vmem:[%s1681_s0 + $0x110] ss:$8 sps:$4 sm:$0xff]  }
  0x14   :  { %v1157_v62 = vld [vmem:[%s1681_s0 + $0x17c] ss:$8 sps:$4 sm:$0xff]   ;;  %v1165_v5 = vld [vmem:[%s1681_s0 + $0x120] ss:$8 sps:$4 sm:$0xff]  }
  0x16   :  { %225 = vmatpush1.bf16.msra.mxu0 %v1248_v8  ;;  %408 = vmatpush1.bf16.msra.mxu1 %v1248_v8 }
  0x17   :  { %226 = vmatprep.subr.bf16.mxu0 %v1171_v0  ;;  %409 = vmatprep.subr.bf16.mxu1 %v1171_v0 }
  0x1a   :  { %227 = vmatpush1.bf16.msra.mxu0 %v1257_v9  ;;  %410 = vmatpush1.bf16.msra.mxu1 %v1257_v9 }
  0x1b   :  { %228 = vmatprep.subr.bf16.mxu0 %v1171_v0  ;;  %411 = vmatprep.subr.bf16.mxu1 %v1171_v0 }
  0x1e   :  { %229 = vmatpush1.bf16.msra.mxu0 %v1266_v10  ;;  %412 = vmatpush1.bf16.msra.mxu1 %v1266_v10 }
  0x1f   :  { %236 = vmatprep.subr.bf16.mxu0 %v1171_v0  ;;  %419 = vmatprep.subr.bf16.mxu1 %v1171_v0 }
  0x22   :  { %237 = vmatpush2.bf16.msra.mxu0 %v1277_v12  ;;  %420 = vmatpush2.bf16.msra.mxu1 %v1277_v12 }
  0x23   :  { %238 = vmatprep.subr.bf16.mxu0 %v1171_v0  ;;  %421 = vmatprep.subr.bf16.mxu1 %v1171_v0 }
  0x26   :  { %239 = vmatpush2.bf16.msra.mxu0 %v1284_v13  ;;  %422 = vmatpush2.bf16.msra.mxu1 %v1284_v13 }
  0x27   :  { %240 = vmatprep.subr.bf16.mxu0 %v1171_v0  ;;  %423 = vmatprep.subr.bf16.mxu1 %v1171_v0 }
  0x2a   :  { %241 = vmatpush2.bf16.msra.mxu0 %v1293_v14  ;;  %424 = vmatpush2.bf16.msra.mxu1 %v1293_v14 }
  0x2b   :  { %242 = vmatprep.subr.bf16.mxu0 %v1171_v0  ;;  %425 = vmatprep.subr.bf16.mxu1 %v1171_v0 }
  0x2e   :  { %243 = vmatpush2.bf16.msra.mxu0 %v1302_v15  ;;  %426 = vmatpush2.bf16.msra.mxu1 %v1302_v15 }
  0x2f   :  { %244 = vmatprep.subr.bf16.mxu0 %v1171_v0  ;;  %427 = vmatprep.subr.bf16.mxu1 %v1171_v0 }
  0x32   :  { %245 = vmatpush2.bf16.msra.mxu0 %v1311_v16  ;;  %428 = vmatpush2.bf16.msra.mxu1 %v1311_v16 }
  0x33   :  { %593 = vmatprep.subr.bf16.mxu0 %v1171_v0  ;;  %776 = vmatprep.subr.bf16.mxu1 %v1171_v0 }
  0x35   :  { %247 = vmatmul.mubr.bf16.vlgmr.msra.gmra.mxu0 %v1091_v17  ;;  %430 = vmatmul.mubr.bf16.vlgmr.msra.gmra.mxu1 %v1094_v18 }
  0x36   :  { %594 = vmatpush1.bf16.msra.mxu0 %v1197_v1  ;;  %777 = vmatpush1.bf16.msra.mxu1 %v1197_v1  ;;  %v1161_v1 = vld [vmem:[%s1681_s0 + $0x124] ss:$8 sps:$4 sm:$0xff]  }
  0x37   :  { %595 = vmatprep.subr.bf16.mxu0 %v1171_v0  ;;  %778 = vmatprep.subr.bf16.mxu1 %v1171_v0 }
  0x38   :  { %968 = vmatprep.mubr.msk.bf16.mxu0 %vm188_vm0, %v1097_v19  ;;  %1002 = vmatprep.mubr.msk.bf16.mxu1 %vm188_vm0, %v1099_v20 }
  0x3a   :  { %596 = vmatpush1.bf16.msra.mxu0 %v1204_v2  ;;  %779 = vmatpush1.bf16.msra.mxu1 %v1204_v2  ;;  %v1163_v2 = vld [vmem:[%s1681_s0 + $0x18c] ss:$8 sps:$4 sm:$0xff]  }
  0x3b   :  { %597 = vmatprep.subr.bf16.mxu0 %v1171_v0  ;;  %780 = vmatprep.subr.bf16.mxu1 %v1171_v0 }
  0x3d   :  { %255 = vmatmul.mubr.bf16.gmra.mxu0 %v1101_v21  ;;  %438 = vmatmul.mubr.bf16.gmra.mxu1 %v1102_v22 }
  0x3e   :  { %598 = vmatpush1.bf16.msra.mxu0 %v1213_v3  ;;  %781 = vmatpush1.bf16.msra.mxu1 %v1213_v3  ;;  %v1020_v3 = vld [vmem:[%s1681_s0 + $0x130] sm:$0x11] }
  0x3f   :  { %599 = vmatprep.subr.bf16.mxu0 %v1171_v0  ;;  %782 = vmatprep.subr.bf16.mxu1 %v1171_v0  ;;  %v1034_v7 = vcombine.high %v1020_v3, %v1020_v3 }
  0x40   :  { %969 = vmatprep.mubr.msk.bf16.mxu0 %vm188_vm0, %v1103_v23  ;;  %1003 = vmatprep.mubr.msk.bf16.mxu1 %vm188_vm0, %v1105_v24 }
  0x42   :  { %600 = vmatpush1.bf16.msra.mxu0 %v1222_v4  ;;  %783 = vmatpush1.bf16.msra.mxu1 %v1222_v4  ;;  %v1054_v4 = vld [vmem:[%s1681_s0 + $0x198] sm:$0x11] }
  0x43   :  { %601 = vmatprep.subr.bf16.mxu0 %v1171_v0  ;;  %784 = vmatprep.subr.bf16.mxu1 %v1171_v0 }
  0x45   :  { %263 = vmatmul.mubr.bf16.gmra.mxu0 %v1107_v25  ;;  %446 = vmatmul.mubr.bf16.gmra.mxu1 %v1108_v26 }
  0x46   :  { %602 = vmatpush1.bf16.msra.mxu0 %v1234_v6  ;;  %785 = vmatpush1.bf16.msra.mxu1 %v1234_v6  ;;  %v1166_v6 = vld [vmem:[%s1681_s0 + $0x188] ss:$8 sps:$4 sm:$0xff]  }
  0x47   :  { %603 = vmatprep.subr.bf16.mxu0 %v1171_v0  ;;  %786 = vmatprep.subr.bf16.mxu1 %v1171_v0 }
  0x48   :  { %970 = vmatprep.mubr.msk.bf16.mxu0 %vm188_vm0, %v1109_v27  ;;  %1004 = vmatprep.mubr.msk.bf16.mxu1 %vm188_vm0, %v1111_v28 }
  0x4a   :  { %604 = vmatpush1.bf16.msra.mxu0 %v1248_v8  ;;  %787 = vmatpush1.bf16.msra.mxu1 %v1248_v8  ;;  %v1068_v8 = vcombine.high %v1054_v4, %v1054_v4 }
  0x4b   :  { %605 = vmatprep.subr.bf16.mxu0 %v1171_v0  ;;  %788 = vmatprep.subr.bf16.mxu1 %v1171_v0 }
  0x4d   :  { %271 = vmatmul.mubr.bf16.gmra.mxu0 %v1113_v29  ;;  %454 = vmatmul.mubr.bf16.gmra.mxu1 %v1114_v30 }
  0x4e   :  { %606 = vmatpush1.bf16.msra.mxu0 %v1257_v9  ;;  %789 = vmatpush1.bf16.msra.mxu1 %v1257_v9  ;;  %v1033_v9 = vcombine.low %v1020_v3, %v1020_v3 }
  0x4f   :  { %971 = vmatprep.mubr.msk.bf16.mxu0 %vm188_vm0, %v1115_v31  ;;  %1005 = vmatprep.mubr.msk.bf16.mxu1 %vm188_vm0, %v1117_v32 }
  0x50   :  { %607 = vmatprep.subr.bf16.mxu0 %v1171_v0  ;;  %790 = vmatprep.subr.bf16.mxu1 %v1171_v0 }
  0x52   :  { %608 = vmatpush1.bf16.msra.mxu0 %v1266_v10  ;;  %791 = vmatpush1.bf16.msra.mxu1 %v1266_v10  ;;  %v1067_v10 = vcombine.low %v1054_v4, %v1054_v4 }
  0x53   :  { %615 = vmatprep.subr.bf16.mxu0 %v1171_v0  ;;  %798 = vmatprep.subr.bf16.mxu1 %v1171_v0 }
  0x55   :  { %279 = vmatmul.mubr.bf16.gmra.mxu0 %v1119_v33  ;;  %462 = vmatmul.mubr.bf16.gmra.mxu1 %v1120_v34 }
  0x56   :  { %616 = vmatpush2.bf16.msra.mxu0 %v1277_v12  ;;  %799 = vmatpush2.bf16.msra.mxu1 %v1277_v12 }
  0x57   :  { %972 = vmatprep.mubr.msk.bf16.mxu0 %vm188_vm0, %v1121_v35  ;;  %1006 = vmatprep.mubr.msk.bf16.mxu1 %vm188_vm0, %v1123_v36 }
  0x58   :  { %617 = vmatprep.subr.bf16.mxu0 %v1171_v0  ;;  %800 = vmatprep.subr.bf16.mxu1 %v1171_v0 }
  0x5a   :  { %618 = vmatpush2.bf16.msra.mxu0 %v1284_v13  ;;  %801 = vmatpush2.bf16.msra.mxu1 %v1284_v13 }
  0x5b   :  { %619 = vmatprep.subr.bf16.mxu0 %v1171_v0  ;;  %802 = vmatprep.subr.bf16.mxu1 %v1171_v0 }
  0x5d   :  { %287 = vmatmul.mubr.bf16.gmra.mxu0 %v1125_v39  ;;  %470 = vmatmul.mubr.bf16.gmra.mxu1 %v1126_v40 }
  0x5e   :  { %620 = vmatpush2.bf16.msra.mxu0 %v1293_v14  ;;  %803 = vmatpush2.bf16.msra.mxu1 %v1293_v14 }
  0x5f   :  { %973 = vmatprep.mubr.msk.bf16.mxu0 %vm188_vm0, %v953_v41  ;;  %1007 = vmatprep.mubr.msk.bf16.mxu1 %vm188_vm0, %v1000_v42 }
  0x60   :  { %621 = vmatprep.subr.bf16.mxu0 %v1171_v0  ;;  %804 = vmatprep.subr.bf16.mxu1 %v1171_v0 }
  0x62   :  { %622 = vmatpush2.bf16.msra.mxu0 %v1302_v15  ;;  %805 = vmatpush2.bf16.msra.mxu1 %v1302_v15 }
  0x63   :  { %623 = vmatprep.subr.bf16.mxu0 %v1171_v0  ;;  %806 = vmatprep.subr.bf16.mxu1 %v1171_v0  ;;  %v1160_v0 = vld [vmem:[%s1681_s0 + $0x178] ss:$8 sps:$4 sm:$0xff]  }
  0x65   :  { %295 = vmatmul.mubr.bf16.gmra.mxu0 %v952_v43  ;;  %478 = vmatmul.mubr.bf16.gmra.mxu1 %v999_v44 }
  0x66   :  { %624 = vmatpush2.bf16.msra.mxu0 %v1311_v16  ;;  %807 = vmatpush2.bf16.msra.mxu1 %v1311_v16 }
  0x67   :  { %1035 = vmatprep.mubr.msk.bf16.mxu0 %vm188_vm0, %v1133_v45  ;;  %1069 = vmatprep.mubr.msk.bf16.mxu1 %vm188_vm0, %v1136_v46 }
  0x6d   :  { %626 = vmatmul.mubr.bf16.vlgmr.msra.gmra.mxu0 %v1131_v47  ;;  %809 = vmatmul.mubr.bf16.vlgmr.msra.gmra.mxu1 %v1134_v48 }
  0x6e   :  { %1036 = vmatprep.mubr.msk.bf16.mxu0 %vm188_vm0, %v1137_v49  ;;  %1070 = vmatprep.mubr.msk.bf16.mxu1 %vm188_vm0, %v1139_v50 }
  0x75   :  { %634 = vmatmul.mubr.bf16.gmra.mxu0 %v1141_v51  ;;  %817 = vmatmul.mubr.bf16.gmra.mxu1 %v1142_v52 }
  0x76   :  { %1037 = vmatprep.mubr.msk.bf16.mxu0 %vm188_vm0, %v1143_v53  ;;  %1071 = vmatprep.mubr.msk.bf16.mxu1 %vm188_vm0, %v1145_v54 }
  0x7d   :  { %642 = vmatmul.mubr.bf16.gmra.mxu0 %v1147_v55  ;;  %825 = vmatmul.mubr.bf16.gmra.mxu1 %v1148_v56 }
  0x7e   :  { %1038 = vmatprep.mubr.msk.bf16.mxu0 %vm188_vm0, %v1149_v57  ;;  %1072 = vmatprep.mubr.msk.bf16.mxu1 %vm188_vm0, %v1151_v58 }
  0x85   :  { %650 = vmatmul.mubr.bf16.gmra.mxu0 %v1153_v59  ;;  %833 = vmatmul.mubr.bf16.gmra.mxu1 %v1154_v60 }
  0x86   :  { %1039 = vmatprep.mubr.msk.bf16.mxu0 %vm188_vm0, %v1155_v61  ;;  %1073 = vmatprep.mubr.msk.bf16.mxu1 %vm188_vm0, %v1157_v62 }
  0x8d   :  { %658 = vmatmul.mubr.bf16.gmra.mxu0 %v1159_v63  ;;  %841 = vmatmul.mubr.bf16.gmra.mxu1 %v1160_v0 }
  0x8e   :  { %1040 = vmatprep.mubr.msk.bf16.mxu0 %vm188_vm0, %v1161_v1  ;;  %1074 = vmatprep.mubr.msk.bf16.mxu1 %vm188_vm0, %v1163_v2 }
  0x95   :  { %666 = vmatmul.mubr.bf16.gmra.mxu0 %v1165_v5  ;;  %849 = vmatmul.mubr.bf16.gmra.mxu1 %v1166_v6 }
  0x96   :  { %1041 = vmatprep.mubr.msk.bf16.mxu0 %vm188_vm0, %v1034_v7  ;;  %1075 = vmatprep.mubr.msk.bf16.mxu1 %vm188_vm0, %v1068_v8  ;;  %v1602_v7 = vld [vmem:[%s1682_s2] ss:$0 sm:$0xff] }
  0x9d   :  { %674 = vmatmul.mubr.bf16.gmra.mxu0 %v1033_v9  ;;  %857 = vmatmul.mubr.bf16.gmra.mxu1 %v1067_v10 }
  0xf5   :  { %v1545_v11 = vpop.f32.mrf.mxu0  ;;  %v1547_v12 = vpop.f32.mrf.mxu1 }
  0xf6   :  { %v485_v5 = vmax.f32 %v1545_v11, %v1547_v12 }
  0xf7   :  { %v250_v13 = vpop.f32.mrf.mxu0  ;;  %v433_v14 = vpop.f32.mrf.mxu1 }
  0xf9   :  { %v1549_v15 = vpop.f32.mrf.mxu0  ;;  %v1551_v16 = vpop.f32.mrf.mxu1 }
  0xfb   :  { %v253_v17 = vpop.f32.mrf.mxu0  ;;  %v436_v18 = vpop.f32.mrf.mxu1 }
  0xfc   :  { %v486_v17 = vmax.f32 %v1549_v15, %v1551_v16 }
  0xfd   :  { %v1553_v19 = vpop.f32.mrf.mxu0  ;;  %v1555_v20 = vpop.f32.mrf.mxu1 }
  0xff   :  { %v258_v21 = vpop.f32.mrf.mxu0  ;;  %v441_v22 = vpop.f32.mrf.mxu1 }
 0x101   :  { %v1557_v23 = vpop.f32.mrf.mxu0  ;;  %v1559_v24 = vpop.f32.mrf.mxu1 }
 0x103   :  { %v261_v25 = vpop.f32.mrf.mxu0  ;;  %v444_v26 = vpop.f32.mrf.mxu1 }
 0x105   :  { %v1561_v27 = vpop.f32.mrf.mxu0  ;;  %v1563_v28 = vpop.f32.mrf.mxu1 }
 0x107   :  { %v266_v29 = vpop.f32.mrf.mxu0  ;;  %v449_v30 = vpop.f32.mrf.mxu1 }
 0x108   :  { %v487_v30 = vmax.f32 %v1553_v19, %v1555_v20 }
 0x109   :  { %v1565_v31 = vpop.f32.mrf.mxu0  ;;  %v1567_v32 = vpop.f32.mrf.mxu1 }
 0x10b   :  { %v269_v33 = vpop.f32.mrf.mxu0  ;;  %v452_v34 = vpop.f32.mrf.mxu1 }
 0x10d   :  { %v1569_v35 = vpop.f32.mrf.mxu0  ;;  %v1571_v36 = vpop.f32.mrf.mxu1 }
 0x10f   :  { %v274_v37 = vpop.f32.mrf.mxu0  ;;  %v457_v38 = vpop.f32.mrf.mxu1 }
 0x111   :  { %v1573_v39 = vpop.f32.mrf.mxu0  ;;  %v1575_v40 = vpop.f32.mrf.mxu1 }
 0x113   :  { %v277_v41 = vpop.f32.mrf.mxu0  ;;  %v460_v42 = vpop.f32.mrf.mxu1 }
 0x115   :  { %v1577_v43 = vpop.f32.mrf.mxu0  ;;  %v1579_v44 = vpop.f32.mrf.mxu1 }
 0x117   :  { %v282_v45 = vpop.f32.mrf.mxu0  ;;  %v465_v46 = vpop.f32.mrf.mxu1 }
 0x118   :  { %v488_v45 = vmax.f32 %v1557_v23, %v1559_v24 }
 0x119   :  { %v1581_v47 = vpop.f32.mrf.mxu0  ;;  %v1583_v48 = vpop.f32.mrf.mxu1 }
 0x11b   :  { %v285_v49 = vpop.f32.mrf.mxu0  ;;  %v468_v50 = vpop.f32.mrf.mxu1 }
 0x11d   :  { %v1585_v51 = vpop.f32.mrf.mxu0  ;;  %v1587_v52 = vpop.f32.mrf.mxu1 }
 0x11f   :  { %v290_v53 = vpop.f32.mrf.mxu0  ;;  %v473_v54 = vpop.f32.mrf.mxu1 }
 0x121   :  { %v1589_v55 = vpop.f32.mrf.mxu0  ;;  %v1591_v56 = vpop.f32.mrf.mxu1 }
 0x123   :  { %v293_v57 = vpop.f32.mrf.mxu0  ;;  %v476_v58 = vpop.f32.mrf.mxu1 }
 0x124   :  { %v489_v58 = vmax.f32 %v1561_v27, %v1563_v28 }
 0x125   :  { %v1593_v59 = vpop.f32.mrf.mxu0  ;;  %v1595_v60 = vpop.f32.mrf.mxu1 }
 0x127   :  { %v298_v61 = vpop.f32.mrf.mxu0  ;;  %v481_v62 = vpop.f32.mrf.mxu1 }
 0x129   :  { %v299_v63 = vpop.f32.mrf.mxu0  ;;  %v482_v0 = vpop.f32.mrf.mxu1 }
 0x12b   :  { %v300_v1 = vpop.f32.mrf.mxu0  ;;  %v483_v2 = vpop.f32.mrf.mxu1 }
 0x12d   :  { %v627_v3 = vpop.f32.mrf.mxu0  ;;  %v810_v4 = vpop.f32.mrf.mxu1 }
 0x12e   :  { %v864_v6 = vmax.f32 %v627_v3, %v810_v4  ;;  %v490_v3 = vmax.f32 %v1565_v31, %v1567_v32 }
 0x12f   :  { %v629_v8 = vpop.f32.mrf.mxu0  ;;  %v812_v9 = vpop.f32.mrf.mxu1 }
 0x130   :  { %v877_v10 = vmax.f32 %v485_v5, %v864_v6 }
 0x131   :  { %v630_v13 = vpop.f32.mrf.mxu0  ;;  %v813_v14 = vpop.f32.mrf.mxu1 }
 0x132   :  { %v897_v18 = vadd.f32 %v1602_v7, %v877_v10  ;;  %v865_v21 = vmax.f32 %v630_v13, %v813_v14  ;;  %v491_v13 = vmax.f32 %v1569_v35, %v1571_v36 }
 0x133   :  { %v632_v22 = vpop.f32.mrf.mxu0  ;;  %v815_v25 = vpop.f32.mrf.mxu1 }
 0x134   :  { %v910_v11 = vmax.f32 %v897_v18, 0.0  ;;  %v878_v12 = vmax.f32 %v486_v17, %v865_v21 }
 0x135   :  { %v635_v26 = vpop.f32.mrf.mxu0  ;;  %v818_v29 = vpop.f32.mrf.mxu1 }
 0x136   :  { %923 = vst [vmem:[%s1683_s3] sm:$0xff] %v910_v11  ;;  %v898_v33 = vadd.f32 %v1602_v7, %v878_v12  ;;  %v866_v34 = vmax.f32 %v635_v26, %v818_v29  ;;  %v492_v11 = vmax.f32 %v1573_v39, %v1575_v40 }
 0x137   :  { %v637_v15 = vpop.f32.mrf.mxu0  ;;  %v820_v16 = vpop.f32.mrf.mxu1 }
 0x138   :  { %v911_v37 = vmax.f32 %v898_v33, 0.0  ;;  %v879_v38 = vmax.f32 %v487_v30, %v866_v34  ;;  %v493_v15 = vmax.f32 %v1577_v43, %v1579_v44 }
 0x139   :  { %v638_v41 = vpop.f32.mrf.mxu0  ;;  %v821_v42 = vpop.f32.mrf.mxu1 }
 0x13a   :  { %924 = vst [vmem:[%s1683_s3 + $0x8] sm:$0xff] %v911_v37  ;;  %v899_v19 = vadd.f32 %v1602_v7, %v879_v38  ;;  %v867_v20 = vmax.f32 %v638_v41, %v821_v42 }
 0x13b   :  { %v640_v46 = vpop.f32.mrf.mxu0  ;;  %v823_v49 = vpop.f32.mrf.mxu1 }
 0x13c   :  { %v912_v50 = vmax.f32 %v899_v19, 0.0  ;;  %v880_v53 = vmax.f32 %v488_v45, %v867_v20  ;;  %v494_v19 = vmax.f32 %v1581_v47, %v1583_v48 }
 0x13d   :  { %v643_v54 = vpop.f32.mrf.mxu0  ;;  %v826_v57 = vpop.f32.mrf.mxu1 }
 0x13e   :  { %925 = vst [vmem:[%s1683_s3 + $0x10] sm:$0xff] %v912_v50  ;;  %v900_v23 = vadd.f32 %v1602_v7, %v880_v53  ;;  %v868_v24 = vmax.f32 %v643_v54, %v826_v57  ;;  %v495_v57 = vmax.f32 %v1585_v51, %v1587_v52 }
 0x13f   :  { %v645_v61 = vpop.f32.mrf.mxu0  ;;  %v828_v62 = vpop.f32.mrf.mxu1 }
 0x140   :  { %v913_v63 = vmax.f32 %v900_v23, 0.0  ;;  %v881_v0 = vmax.f32 %v489_v58, %v868_v24 }
 0x141   :  { %v646_v1 = vpop.f32.mrf.mxu0  ;;  %v829_v2 = vpop.f32.mrf.mxu1 }
 0x142   :  { %926 = vst [vmem:[%s1683_s3 + $0x18] sm:$0xff] %v913_v63  ;;  %v901_v27 = vadd.f32 %v1602_v7, %v881_v0  ;;  %v869_v28 = vmax.f32 %v646_v1, %v829_v2  ;;  %v496_v0 = vmax.f32 %v1589_v55, %v1591_v56 }
 0x143   :  { %v648_v4 = vpop.f32.mrf.mxu0  ;;  %v831_v5 = vpop.f32.mrf.mxu1 }
 0x144   :  { %v914_v6 = vmax.f32 %v901_v27, 0.0  ;;  %v882_v8 = vmax.f32 %v490_v3, %v869_v28  ;;  %v497_v5 = vmax.f32 %v1593_v59, %v1595_v60 }
 0x145   :  { %v651_v9 = vpop.f32.mrf.mxu0  ;;  %v834_v10 = vpop.f32.mrf.mxu1 }
 0x146   :  { %927 = vst [vmem:[%s1683_s3 + $0x20] sm:$0xff] %v914_v6  ;;  %v902_v31 = vadd.f32 %v1602_v7, %v882_v8  ;;  %v870_v32 = vmax.f32 %v651_v9, %v834_v10 }
 0x147   :  { %v653_v14 = vpop.f32.mrf.mxu0  ;;  %v836_v17 = vpop.f32.mrf.mxu1 }
 0x148   :  { %v915_v18 = vmax.f32 %v902_v31, 0.0  ;;  %v883_v21 = vmax.f32 %v491_v13, %v870_v32 }
 0x149   :  { %v654_v22 = vpop.f32.mrf.mxu0  ;;  %v837_v25 = vpop.f32.mrf.mxu1 }
 0x14a   :  { %928 = vst [vmem:[%s1683_s3 + $0x28] sm:$0xff] %v915_v18  ;;  %v903_v35 = vadd.f32 %v1602_v7, %v883_v21  ;;  %v871_v36 = vmax.f32 %v654_v22, %v837_v25 }
 0x14b   :  { %v656_v12 = vpop.f32.mrf.mxu0  ;;  %v839_v26 = vpop.f32.mrf.mxu1 }
 0x14c   :  { %v916_v29 = vmax.f32 %v903_v35, 0.0  ;;  %v884_v30 = vmax.f32 %v492_v11, %v871_v36 }
 0x14d   :  { %v659_v33 = vpop.f32.mrf.mxu0  ;;  %v842_v34 = vpop.f32.mrf.mxu1 }
 0x14e   :  { %929 = vst [vmem:[%s1683_s3 + $0x30] sm:$0xff] %v916_v29  ;;  %v904_v39 = vadd.f32 %v1602_v7, %v884_v30  ;;  %v872_v40 = vmax.f32 %v659_v33, %v842_v34 }
 0x14f   :  { %v661_v16 = vpop.f32.mrf.mxu0  ;;  %v844_v37 = vpop.f32.mrf.mxu1 }
 0x150   :  { %v917_v38 = vmax.f32 %v904_v39, 0.0  ;;  %v885_v41 = vmax.f32 %v493_v15, %v872_v40 }
 0x151   :  { %v662_v42 = vpop.f32.mrf.mxu0  ;;  %v845_v45 = vpop.f32.mrf.mxu1 }
 0x152   :  { %930 = vst [vmem:[%s1683_s3 + $0x38] sm:$0xff] %v917_v38  ;;  %v905_v43 = vadd.f32 %v1602_v7, %v885_v41  ;;  %v873_v44 = vmax.f32 %v662_v42, %v845_v45 }
 0x153   :  { %v664_v20 = vpop.f32.mrf.mxu0  ;;  %v847_v46 = vpop.f32.mrf.mxu1 }
 0x154   :  { %v918_v49 = vmax.f32 %v905_v43, 0.0  ;;  %v886_v50 = vmax.f32 %v494_v19, %v873_v44 }
 0x155   :  { %v667_v53 = vpop.f32.mrf.mxu0  ;;  %v850_v54 = vpop.f32.mrf.mxu1 }
 0x156   :  { %931 = vst [vmem:[%s1683_s3 + $0x40] sm:$0xff] %v918_v49  ;;  %v906_v47 = vadd.f32 %v1602_v7, %v886_v50  ;;  %v874_v48 = vmax.f32 %v667_v53, %v850_v54 }
 0x157   :  { %v669_v58 = vpop.f32.mrf.mxu0  ;;  %v852_v23 = vpop.f32.mrf.mxu1 }
 0x158   :  { %v919_v24 = vmax.f32 %v906_v47, 0.0  ;;  %v887_v61 = vmax.f32 %v495_v57, %v874_v48 }
 0x159   :  { %v670_v62 = vpop.f32.mrf.mxu0  ;;  %v853_v63 = vpop.f32.mrf.mxu1 }
 0x15a   :  { %932 = vst [vmem:[%s1683_s3 + $0x48] sm:$0xff] %v919_v24  ;;  %v907_v51 = vadd.f32 %v1602_v7, %v887_v61  ;;  %v875_v52 = vmax.f32 %v670_v62, %v853_v63 }
 0x15b   :  { %v672_v1 = vpop.f32.mrf.mxu0  ;;  %v855_v2 = vpop.f32.mrf.mxu1 }
 0x15c   :  { %v920_v3 = vmax.f32 %v907_v51, 0.0  ;;  %v888_v27 = vmax.f32 %v496_v0, %v875_v52 }
 0x15d   :  { %v675_v28 = vpop.f32.mrf.mxu0  ;;  %v858_v4 = vpop.f32.mrf.mxu1 }
 0x15e   :  { %933 = vst [vmem:[%s1683_s3 + $0x50] sm:$0xff] %v920_v3  ;;  %v908_v55 = vadd.f32 %v1602_v7, %v888_v27  ;;  %v876_v56 = vmax.f32 %v675_v28, %v858_v4 }
 0x15f   :  { %v677_v6 = vpop.f32.mrf.mxu0  ;;  %v860_v8 = vpop.f32.mrf.mxu1 }
 0x160   :  { %v921_v9 = vmax.f32 %v908_v55, 0.0  ;;  %v889_v10 = vmax.f32 %v497_v5, %v876_v56 }
 0x161   :  { %v678_v13 = vpop.f32.mrf.mxu0  ;;  %v861_v31 = vpop.f32.mrf.mxu1 }
 0x162   :  { %934 = vst [vmem:[%s1683_s3 + $0x58] sm:$0xff] %v921_v9  ;;  %v909_v32 = vadd.f32 %v1602_v7, %v889_v10 }
 0x163   :  { %v679_v59 = vpop.f32.mrf.mxu0  ;;  %v862_v60 = vpop.f32.mrf.mxu1 }
 0x164   :  { %v922_v14 = vmax.f32 %v909_v32, 0.0 }
 0x166   :  { %935 = vst [vmem:[%s1683_s3 + $0x60] sm:$0x3] %v922_v14 }

// kernel: forward.5
= control target key start
LH: loop header
LB: loop body
LE: loop exit
PB: predicated region body
PF: predicated region fallthrough
CT: control target
= control target key end

     0   :  { %v837_v27 = vlaneseq  ;;  %v6250_v35 = vmov 1966171168   ;;  %vm6252_vm0 = vmmov 0   ;;  %s7665_s0 = inlined_call_operand.vmem [shape: bf16[2,6272], index: 0, kind: input, shape index: {}]   ;;  %s7666_s1 = inlined_call_operand.vmem [shape: bf16[6272,128], index: 1, kind: input, shape index: {}]   ;;  %s7667_s2 = inlined_call_operand.vmem [shape: f32[1,128], index: 2, kind: input, shape index: {}]   ;;  %s7668_s3 = inlined_call_operand.vmem [shape: bf16[128,128], index: 3, kind: input, shape index: {}]   ;;  %s7669_s4 = inlined_call_operand.vmem [shape: f32[1,128], index: 4, kind: input, shape index: {}]   ;;  %s7670_s5 = inlined_call_operand.vmem [shape: bf16[128,128], index: 5, kind: input, shape index: {}]   ;;  %s7671_s6 = inlined_call_operand.vmem [shape: f32[1,128], index: 6, kind: input, shape index: {}]   ;;  %s7672_s7 = inlined_call_operand.hbm [shape: f32[2,128], index: 7, kind: output, shape index: {}]  }
   0x1   :  { %v5814_v0 = vld [vmem:[%s7666_s1 + $0x78] sm:$0xff]   ;;  %v5818_v4 = vld [vmem:[%s7666_s1 + $0x70] sm:$0xff]   ;;  %v5822_v8 = vld [vmem:[%s7666_s1 + $0x68] sm:$0xff]   ;;  %v835_v36 = vunpack.c.l.s4 %v6250_v35 }
   0x2   :  { %v5815_v1 = vld [vmem:[%s7666_s1 + $0x38] sm:$0xff]   ;;  %5195 = vmatprep.subr.bf16.mxu0 %v5814_v0  ;;  %v5819_v5 = vld [vmem:[%s7666_s1 + $0x30] sm:$0xff]   ;;  %v5823_v9 = vld [vmem:[%s7666_s1 + $0x28] sm:$0xff]   ;;  %v838_v32 = vshrl.u32 %v837_v27, 7 }
   0x3   :  { %v5816_v2 = vld [vmem:[%s7666_s1 + $0xf8] sm:$0xff]   ;;  %5196 = vmatpush3.bf16.msra.mxu0 %v5815_v1  ;;  %v5820_v6 = vld [vmem:[%s7666_s1 + $0xf0] sm:$0xff]   ;;  %v5824_v10 = vld [vmem:[%s7666_s1 + $0xe8] sm:$0xff]   ;;  %v836_v39 = vunpack.c.0.s8 %v835_v36 }
   0x4   :  { %v5817_v3 = vld [vmem:[%s7666_s1 + $0xb8] sm:$0xff]   ;;  %5217 = vmatprep.subr.bf16.mxu1 %v5816_v2  ;;  %5197 = vmatprep.subr.bf16.mxu0 %v5818_v4  ;;  %v5821_v7 = vld [vmem:[%s7666_s1 + $0xb0] sm:$0xff]   ;;  %v5825_v11 = vld [vmem:[%s7666_s1 + $0xa8] sm:$0xff]  }
   0x5   :  { %5218 = vmatpush3.bf16.msra.mxu1 %v5817_v3  ;;  %v5826_v12 = vld [vmem:[%s7666_s1 + $0x60] sm:$0xff]   ;;  %v5830_v16 = vld [vmem:[%s7666_s1 + $0x58] sm:$0xff]   ;;  %v5834_v20 = vld [vmem:[%s7666_s1 + $0x50] sm:$0xff]   ;;  %v6399_v41 = vsub.s32 %v836_v39, %v838_v32 }
   0x6   :  { %5219 = vmatprep.subr.bf16.mxu1 %v5820_v6  ;;  %v5827_v13 = vld [vmem:[%s7666_s1 + $0x20] sm:$0xff]   ;;  %v5831_v17 = vld [vmem:[%s7666_s1 + $0x18] sm:$0xff]   ;;  %v5835_v21 = vld [vmem:[%s7666_s1 + $0x10] sm:$0xff]  }
   0x7   :  { %5198 = vmatpush3.bf16.msra.mxu0 %v5819_v5  ;;  %v5828_v14 = vld [vmem:[%s7666_s1 + $0xe0] sm:$0xff]   ;;  %v5832_v18 = vld [vmem:[%s7666_s1 + $0xd8] sm:$0xff]   ;;  %v5836_v22 = vld [vmem:[%s7666_s1 + $0xd0] sm:$0xff]  }
   0x8   :  { %5199 = vmatprep.subr.bf16.mxu0 %v5822_v8  ;;  %v5829_v15 = vld [vmem:[%s7666_s1 + $0xa0] sm:$0xff]   ;;  %v5833_v19 = vld [vmem:[%s7666_s1 + $0x98] sm:$0xff]   ;;  %v5837_v23 = vld [vmem:[%s7666_s1 + $0x90] sm:$0xff]  }
   0x9   :  { %5220 = vmatpush3.bf16.msra.mxu1 %v5821_v7  ;;  %v5838_v24 = vld [vmem:[%s7666_s1 + $0x48] sm:$0xff]   ;;  %v5842_v29 = vld [vmem:[%s7666_s1 + $0x40] sm:$0xff]   ;;  %v5847_v37 = vld [vmem:[%s7666_s1 + $0x178] sm:$0xff]  }
   0xa   :  { %5221 = vmatprep.subr.bf16.mxu1 %v5824_v10  ;;  %v5839_v25 = vld [vmem:[%s7666_s1 + $0x8] sm:$0xff]   ;;  %v5843_v30 = vld [vmem:[%s7666_s1] sm:$0xff]   ;;  %v5849_v40 = vld [vmem:[%s7666_s1 + $0x1f8] sm:$0xff]  }
   0xb   :  { %5200 = vmatpush3.bf16.msra.mxu0 %v5823_v9  ;;  %v5840_v26 = vld [vmem:[%s7666_s1 + $0xc8] sm:$0xff]   ;;  %v5844_v31 = vld [vmem:[%s7666_s1 + $0xc0] sm:$0xff]   ;;  %v5848_v47 = vld [vmem:[%s7666_s1 + $0x138] sm:$0xff]  }
   0xc   :  { %5201 = vmatprep.subr.bf16.mxu0 %v5826_v12  ;;  %v5841_v28 = vld [vmem:[%s7666_s1 + $0x88] sm:$0xff]   ;;  %v28_v33 = vld [vmem:[%s7665_s0] sm:$0xff]  ;;  %v5850_v49 = vld [vmem:[%s7666_s1 + $0x1b8] sm:$0xff]  }
   0xd   :  { %5222 = vmatpush3.bf16.msra.mxu1 %v5825_v11  ;;  %v5846_v34 = vld [vmem:[%s7666_s1 + $0x80] sm:$0xff]   ;;  %v833_v38 = vcombine.high %v28_v33, %v28_v33  ;;  %v840_v42 = vrot.slane %v28_v33, %v6399_v41  ;;  %v5851_v52 = vld [vmem:[%s7666_s1 + $0x170] sm:$0xff]   ;;  %v5855_v58 = vld [vmem:[%s7666_s1 + $0x168] sm:$0xff]  }
   0xe   :  { %5223 = vmatprep.subr.bf16.mxu1 %v5828_v14  ;;  %v5852_v54 = vld [vmem:[%s7666_s1 + $0x130] sm:$0xff]   ;;  %v5856_v59 = vld [vmem:[%s7666_s1 + $0x128] sm:$0xff]   ;;  %v5859_v62 = vld [vmem:[%s7666_s1 + $0x160] sm:$0xff]  }
   0xf   :  { %5202 = vmatpush3.bf16.msra.mxu0 %v5827_v13  ;;  %v6403_v43 = vrot.slane %v833_v38, %v6399_v41  ;;  %v848_v44 = vcombine.high %v840_v42, %v840_v42  ;;  %v856_v45 = vrot.slane %v840_v42, %v6399_v41  ;;  %v5853_v55 = vld [vmem:[%s7666_s1 + $0x1f0] sm:$0xff]   ;;  %v5857_v60 = vld [vmem:[%s7666_s1 + $0x1e8] sm:$0xff]   ;;  %v5860_v63 = vld [vmem:[%s7666_s1 + $0x120] sm:$0xff]  }
  0x10   :  { %5203 = vmatprep.subr.bf16.mxu0 %v5830_v16  ;;  %v5854_v57 = vld [vmem:[%s7666_s1 + $0x1b0] sm:$0xff]   ;;  %v5858_v61 = vld [vmem:[%s7666_s1 + $0x1a8] sm:$0xff]   ;;  %v5861_v0 = vld [vmem:[%s7666_s1 + $0x1e0] sm:$0xff]  }
  0x11   :  { %5224 = vmatpush3.bf16.msra.mxu1 %v5829_v15  ;;  %v849_v46 = vcombine.high %v6403_v43, %v6403_v43  ;;  %v870_v48 = vrot.slane %v848_v44, %v6399_v41  ;;  %v878_v51 = vcombine.high %v856_v45, %v856_v45  ;;  %v5862_v1 = vld [vmem:[%s7666_s1 + $0x1a0] sm:$0xff]   ;;  %v5863_v2 = vld [vmem:[%s7666_s1 + $0x158] sm:$0xff]   ;;  %v5867_v6 = vld [vmem:[%s7666_s1 + $0x150] sm:$0xff]  }
  0x12   :  { %5225 = vmatprep.subr.bf16.mxu1 %v5832_v18  ;;  %v5864_v3 = vld [vmem:[%s7666_s1 + $0x118] sm:$0xff]   ;;  %v5868_v7 = vld [vmem:[%s7666_s1 + $0x110] sm:$0xff]   ;;  %v5871_v10 = vld [vmem:[%s7666_s1 + $0x148] sm:$0xff]   ;;  %v863_v18 = vrot.slane %v6403_v43, %v6399_v41 }
  0x13   :  { %5204 = vmatpush3.bf16.msra.mxu0 %v5831_v17  ;;  %v877_v50 = vrot.slane %v849_v46, %v6399_v41  ;;  %3574 = vmatprep.mubr.bf16.mxu0 %v870_v48  ;;  %v880_v53 = vcombine.high %v870_v48, %v870_v48  ;;  %v5865_v4 = vld [vmem:[%s7666_s1 + $0x1d8] sm:$0xff]   ;;  %v5869_v8 = vld [vmem:[%s7666_s1 + $0x1d0] sm:$0xff]   ;;  %v5872_v11 = vld [vmem:[%s7666_s1 + $0x108] sm:$0xff]  }
  0x14   :  { %5205 = vmatprep.subr.bf16.mxu0 %v5834_v20  ;;  %v5866_v5 = vld [vmem:[%s7666_s1 + $0x198] sm:$0xff]   ;;  %v5870_v9 = vld [vmem:[%s7666_s1 + $0x190] sm:$0xff]   ;;  %v5873_v12 = vld [vmem:[%s7666_s1 + $0x1c8] sm:$0xff]  }
  0x15   :  { %5226 = vmatpush3.bf16.msra.mxu1 %v5833_v19  ;;  %v881_v56 = vcombine.high %v877_v50, %v877_v50  ;;  %3614 = vmatprep.mubr.bf16.mxu1 %v880_v53  ;;  %v5874_v13 = vld [vmem:[%s7666_s1 + $0x188] sm:$0xff]   ;;  %v5875_v14 = vld [vmem:[%s7666_s1 + $0x140] sm:$0xff]   ;;  %v5879_v19 = vld [vmem:[%s7666_s1 + $0x278] sm:$0xff]  }
  0x16   :  { %5227 = vmatprep.subr.bf16.mxu1 %v5836_v22  ;;  %v5876_v15 = vld [vmem:[%s7666_s1 + $0x100] sm:$0xff]   ;;  %v5880_v20 = vld [vmem:[%s7666_s1 + $0x238] sm:$0xff]   ;;  %v5886_v27 = vld [vmem:[%s7666_s1 + $0x2b0] sm:$0xff]  }
  0x17   :  { %5206 = vmatpush3.bf16.msra.mxu0 %v5835_v21  ;;  %v5877_v16 = vld [vmem:[%s7666_s1 + $0x1c0] sm:$0xff]   ;;  %v5881_v21 = vld [vmem:[%s7666_s1 + $0x2f8] sm:$0xff]   ;;  %v5900_v42 = vld [vmem:[%s7666_s1 + $0x210] sm:$0xff]  }
  0x18   :  { %5207 = vmatprep.subr.bf16.mxu0 %v5838_v24  ;;  %v5878_v17 = vld [vmem:[%s7666_s1 + $0x180] sm:$0xff]   ;;  %v5882_v22 = vld [vmem:[%s7666_s1 + $0x2b8] sm:$0xff]   ;;  %v5883_v24 = vld [vmem:[%s7666_s1 + $0x270] sm:$0xff]  }
  0x19   :  { %5228 = vmatpush3.bf16.msra.mxu1 %v5837_v23  ;;  %v879_v23 = vcombine.high %v863_v18, %v863_v18  ;;  %v5891_v32 = vld [vmem:[%s7666_s1 + $0x260] sm:$0xff]   ;;  %v5895_v36 = vld [vmem:[%s7666_s1 + $0x258] sm:$0xff]   ;;  %v5901_v43 = vld [vmem:[%s7666_s1 + $0x2d0] sm:$0xff]  }
  0x1a   :  { %5229 = vmatprep.subr.bf16.mxu1 %v5840_v26  ;;  %v5885_v26 = vld [vmem:[%s7666_s1 + $0x2f0] sm:$0xff]   ;;  %v5892_v33 = vld [vmem:[%s7666_s1 + $0x220] sm:$0xff]   ;;  %v5897_v38 = vld [vmem:[%s7666_s1 + $0x2d8] sm:$0xff]  }
  0x1b   :  { %5208 = vmatpush3.bf16.msra.mxu0 %v5839_v25  ;;  %v5884_v25 = vld [vmem:[%s7666_s1 + $0x230] sm:$0xff]   ;;  %v5894_v35 = vld [vmem:[%s7666_s1 + $0x2a0] sm:$0xff]   ;;  %v5898_v39 = vld [vmem:[%s7666_s1 + $0x298] sm:$0xff]  }
  0x1c   :  { %5209 = vmatprep.subr.bf16.mxu0 %v5842_v29  ;;  %v5888_v29 = vld [vmem:[%s7666_s1 + $0x228] sm:$0xff]   ;;  %v5902_v44 = vld [vmem:[%s7666_s1 + $0x290] sm:$0xff]  }
  0x1d   :  { %5230 = vmatpush3.bf16.msra.mxu1 %v5841_v28  ;;  %v5887_v28 = vld [vmem:[%s7666_s1 + $0x268] sm:$0xff]  }
  0x1e   :  { %5231 = vmatprep.subr.bf16.mxu1 %v5844_v31  ;;  %v5890_v31 = vld [vmem:[%s7666_s1 + $0x2a8] sm:$0xff]  }
  0x1f   :  { %5210 = vmatpush3.bf16.msra.mxu0 %v5843_v30  ;;  %v5889_v30 = vld [vmem:[%s7666_s1 + $0x2e8] sm:$0xff]  }
  0x20   :  { %5239 = vmatprep.subr.bf16.mxu0 %v5847_v37  ;;  %v5896_v37 = vld [vmem:[%s7666_s1 + $0x218] sm:$0xff]   ;;  %v29_v46 = vld [vmem:[%s7665_s0 + $0x8] sm:$0xff] }
  0x21   :  { %5232 = vmatpush3.bf16.msra.mxu1 %v5846_v34  ;;  %v5893_v34 = vld [vmem:[%s7666_s1 + $0x2e0] sm:$0xff]   ;;  %v889_v48 = vrot.slane %v29_v46, %v6399_v41 }
  0x22   :  { %5261 = vmatprep.subr.bf16.mxu1 %v5849_v40  ;;  %3575 = vmatmul.mubr.bf16.vlgmr.msra.gmra.mxu0 %v856_v45  ;;  %v5899_v40 = vld [vmem:[%s7666_s1 + $0x250] sm:$0xff]   ;;  %v5903_v45 = vld [vmem:[%s7666_s1 + $0x248] sm:$0xff]  }
  0x23   :  { %5240 = vmatpush3.bf16.msra.mxu0 %v5848_v47  ;;  %3654 = vmatprep.mubr.bf16.mxu0 %v877_v50  ;;  %v5904_v47 = vld [vmem:[%s7666_s1 + $0x208] sm:$0xff]  }
  0x24   :  { %3615 = vmatmul.mubr.bf16.vlgmr.msra.gmra.mxu1 %v878_v51  ;;  %5241 = vmatprep.subr.bf16.mxu0 %v5851_v52  ;;  %v5905_v50 = vld [vmem:[%s7666_s1 + $0x2c8] sm:$0xff]   ;;  %v897_v52 = vcombine.high %v889_v48, %v889_v48 }
  0x25   :  { %5262 = vmatpush3.bf16.msra.mxu1 %v5850_v49  ;;  %3694 = vmatprep.mubr.bf16.mxu1 %v881_v56  ;;  %v882_v49 = vcombine.high %v29_v46, %v29_v46  ;;  %v5906_v51 = vld [vmem:[%s7666_s1 + $0x288] sm:$0xff]  }
  0x26   :  { %5263 = vmatprep.subr.bf16.mxu1 %v5853_v55  ;;  %v5908_v55 = vld [vmem:[%s7666_s1 + $0x200] sm:$0xff]   ;;  %v919_v56 = vrot.slane %v897_v52, %v6399_v41  ;;  %v5954_v46 = vld [vmem:[%s7666_s1 + $0x4e8] sm:$0xff]   ;;  %v5960_v52 = vld [vmem:[%s7666_s1 + $0x458] sm:$0xff]  }
  0x27   :  { %5242 = vmatpush3.bf16.msra.mxu0 %v5852_v54  ;;  %v6591_v53 = vrot.slane %v882_v49, %v6399_v41  ;;  %v5907_v54 = vld [vmem:[%s7666_s1 + $0x240] sm:$0xff]  }
  0x28   :  { %5243 = vmatprep.subr.bf16.mxu0 %v5855_v58  ;;  %v5909_v58 = vld [vmem:[%s7666_s1 + $0x2c0] sm:$0xff]  }
  0x29   :  { %5264 = vmatpush3.bf16.msra.mxu1 %v5854_v57  ;;  %v898_v57 = vcombine.high %v6591_v53, %v6591_v53  ;;  %v5957_v49 = vld [vmem:[%s7666_s1 + $0x420] sm:$0xff]  }
  0x2a   :  { %5265 = vmatprep.subr.bf16.mxu1 %v5857_v60  ;;  %v929_v60 = vcombine.high %v919_v56, %v919_v56 }
  0x2b   :  { %5244 = vmatpush3.bf16.msra.mxu0 %v5856_v59  ;;  %v5910_v59 = vld [vmem:[%s7666_s1 + $0x280] sm:$0xff]  }
  0x2c   :  { %5245 = vmatprep.subr.bf16.mxu0 %v5859_v62  ;;  %v5911_v62 = vld [vmem:[%s7666_s1 + $0x378] sm:$0xff]  }
  0x2d   :  { %5266 = vmatpush3.bf16.msra.mxu1 %v5858_v61  ;;  %v905_v61 = vrot.slane %v889_v48, %v6399_v41  ;;  %v5956_v48 = vld [vmem:[%s7666_s1 + $0x460] sm:$0xff]  }
  0x2e   :  { %5267 = vmatprep.subr.bf16.mxu1 %v5861_v0  ;;  %v926_v0 = vrot.slane %v898_v57, %v6399_v41  ;;  %v5965_v57 = vld [vmem:[%s7666_s1 + $0x410] sm:$0xff]  }
  0x2f   :  { %5246 = vmatpush3.bf16.msra.mxu0 %v5860_v63  ;;  %v5912_v63 = vld [vmem:[%s7666_s1 + $0x338] sm:$0xff]  }
  0x30   :  { %5247 = vmatprep.subr.bf16.mxu0 %v5863_v2  ;;  %v5914_v2 = vld [vmem:[%s7666_s1 + $0x3b8] sm:$0xff]  }
  0x31   :  { %5268 = vmatpush3.bf16.msra.mxu1 %v5862_v1  ;;  %v5913_v1 = vld [vmem:[%s7666_s1 + $0x3f8] sm:$0xff]  }
  0x32   :  { %5269 = vmatprep.subr.bf16.mxu1 %v5865_v4  ;;  %v5915_v4 = vld [vmem:[%s7666_s1 + $0x370] sm:$0xff]  }
  0x33   :  { %5248 = vmatpush3.bf16.msra.mxu0 %v5864_v3  ;;  %v927_v3 = vcombine.high %v905_v61, %v905_v61 }
  0x34   :  { %5249 = vmatprep.subr.bf16.mxu0 %v5867_v6  ;;  %v930_v6 = vcombine.high %v926_v0, %v926_v0 }
  0x35   :  { %5270 = vmatpush3.bf16.msra.mxu1 %v5866_v5  ;;  %v5916_v5 = vld [vmem:[%s7666_s1 + $0x330] sm:$0xff]  }
  0x36   :  { %5271 = vmatprep.subr.bf16.mxu1 %v5869_v8  ;;  %v5918_v8 = vld [vmem:[%s7666_s1 + $0x3b0] sm:$0xff]  }
  0x37   :  { %5250 = vmatpush3.bf16.msra.mxu0 %v5868_v7  ;;  %v5917_v7 = vld [vmem:[%s7666_s1 + $0x3f0] sm:$0xff]  }
  0x38   :  { %5251 = vmatprep.subr.bf16.mxu0 %v5871_v10  ;;  %v5920_v10 = vld [vmem:[%s7666_s1 + $0x328] sm:$0xff]  }
  0x39   :  { %5272 = vmatpush3.bf16.msra.mxu1 %v5870_v9  ;;  %v5919_v9 = vld [vmem:[%s7666_s1 + $0x368] sm:$0xff]  }
  0x3a   :  { %5273 = vmatprep.subr.bf16.mxu1 %v5873_v12  ;;  %v5922_v12 = vld [vmem:[%s7666_s1 + $0x3a8] sm:$0xff]  }
  0x3b   :  { %5252 = vmatpush3.bf16.msra.mxu0 %v5872_v11  ;;  %v5921_v11 = vld [vmem:[%s7666_s1 + $0x3e8] sm:$0xff]  }
  0x3c   :  { %5253 = vmatprep.subr.bf16.mxu0 %v5875_v14  ;;  %v5924_v14 = vld [vmem:[%s7666_s1 + $0x320] sm:$0xff]  }
  0x3d   :  { %5274 = vmatpush3.bf16.msra.mxu1 %v5874_v13  ;;  %v5923_v13 = vld [vmem:[%s7666_s1 + $0x360] sm:$0xff]  }
  0x3e   :  { %5275 = vmatprep.subr.bf16.mxu1 %v5877_v16  ;;  %v5926_v16 = vld [vmem:[%s7666_s1 + $0x3a0] sm:$0xff]  }
  0x3f   :  { %5254 = vmatpush3.bf16.msra.mxu0 %v5876_v15  ;;  %v5925_v15 = vld [vmem:[%s7666_s1 + $0x3e0] sm:$0xff]  }
  0x40   :  { %5283 = vmatprep.subr.bf16.mxu0 %v5879_v19  ;;  %v5929_v19 = vld [vmem:[%s7666_s1 + $0x3d8] sm:$0xff]  }
  0x41   :  { %5276 = vmatpush3.bf16.msra.mxu1 %v5878_v17  ;;  %v5927_v17 = vld [vmem:[%s7666_s1 + $0x358] sm:$0xff]  }
  0x42   :  { %3655 = vmatmul.mubr.bf16.vlgmr.msra.gmra.mxu0 %v863_v18  ;;  %5305 = vmatprep.subr.bf16.mxu1 %v5881_v21  ;;  %v5928_v18 = vld [vmem:[%s7666_s1 + $0x318] sm:$0xff]   ;;  %v5931_v21 = vld [vmem:[%s7666_s1 + $0x350] sm:$0xff]  }
  0x43   :  { %5284 = vmatpush3.bf16.msra.mxu0 %v5880_v20  ;;  %3734 = vmatprep.mubr.bf16.mxu0 %v919_v56  ;;  %v5930_v20 = vld [vmem:[%s7666_s1 + $0x398] sm:$0xff]   ;;  %v5964_v56 = vld [vmem:[%s7666_s1 + $0x450] sm:$0xff]  }
  0x44   :  { %3695 = vmatmul.mubr.bf16.vlgmr.msra.gmra.mxu1 %v879_v23  ;;  %5285 = vmatprep.subr.bf16.mxu0 %v5883_v24  ;;  %v5933_v23 = vld [vmem:[%s7666_s1 + $0x3d0] sm:$0xff]  }
  0x45   :  { %5306 = vmatpush3.bf16.msra.mxu1 %v5882_v22  ;;  %3774 = vmatprep.mubr.bf16.mxu1 %v929_v60  ;;  %v5932_v22 = vld [vmem:[%s7666_s1 + $0x310] sm:$0xff]   ;;  %v5968_v60 = vld [vmem:[%s7666_s1 + $0x448] sm:$0xff]  }
  0x46   :  { %5307 = vmatprep.subr.bf16.mxu1 %v5885_v26  ;;  %v5934_v24 = vld [vmem:[%s7666_s1 + $0x390] sm:$0xff]   ;;  %v5936_v26 = vld [vmem:[%s7666_s1 + $0x308] sm:$0xff]  }
  0x47   :  { %5286 = vmatpush3.bf16.msra.mxu0 %v5884_v25  ;;  %v5935_v25 = vld [vmem:[%s7666_s1 + $0x348] sm:$0xff]  }
  0x48   :  { %5287 = vmatprep.subr.bf16.mxu0 %v5887_v28  ;;  %v5938_v28 = vld [vmem:[%s7666_s1 + $0x388] sm:$0xff]  }
  0x49   :  { %5308 = vmatpush3.bf16.msra.mxu1 %v5886_v27  ;;  %v5937_v27 = vld [vmem:[%s7666_s1 + $0x3c8] sm:$0xff]  }
  0x4a   :  { %5309 = vmatprep.subr.bf16.mxu1 %v5889_v30  ;;  %v5940_v30 = vld [vmem:[%s7666_s1 + $0x300] sm:$0xff]  }
  0x4b   :  { %5288 = vmatpush3.bf16.msra.mxu0 %v5888_v29  ;;  %v5939_v29 = vld [vmem:[%s7666_s1 + $0x340] sm:$0xff]  }
  0x4c   :  { %5289 = vmatprep.subr.bf16.mxu0 %v5891_v32  ;;  %v5943_v32 = vld [vmem:[%s7666_s1 + $0x380] sm:$0xff]  }
  0x4d   :  { %5310 = vmatpush3.bf16.msra.mxu1 %v5890_v31  ;;  %v5941_v31 = vld [vmem:[%s7666_s1 + $0x3c0] sm:$0xff]  }
  0x4e   :  { %5311 = vmatprep.subr.bf16.mxu1 %v5893_v34  ;;  %v5944_v34 = vld [vmem:[%s7666_s1 + $0x478] sm:$0xff]  }
  0x4f   :  { %5290 = vmatpush3.bf16.msra.mxu0 %v5892_v33  ;;  %v912_v33 = vrot.slane %v6591_v53, %v6399_v41  ;;  %v5961_v53 = vld [vmem:[%s7666_s1 + $0x418] sm:$0xff]  }
  0x50   :  { %5291 = vmatprep.subr.bf16.mxu0 %v5895_v36  ;;  %v5946_v36 = vld [vmem:[%s7666_s1 + $0x4f8] sm:$0xff]  }
  0x51   :  { %5312 = vmatpush3.bf16.msra.mxu1 %v5894_v35  ;;  %v5945_v35 = vld [vmem:[%s7666_s1 + $0x438] sm:$0xff]  }
  0x52   :  { %5313 = vmatprep.subr.bf16.mxu1 %v5897_v38  ;;  %v928_v38 = vcombine.high %v912_v33, %v912_v33 }
  0x53   :  { %5292 = vmatpush3.bf16.msra.mxu0 %v5896_v37  ;;  %v5947_v37 = vld [vmem:[%s7666_s1 + $0x4b8] sm:$0xff]  }
  0x54   :  { %5293 = vmatprep.subr.bf16.mxu0 %v5899_v40  ;;  %v5949_v40 = vld [vmem:[%s7666_s1 + $0x430] sm:$0xff]  }
  0x55   :  { %5314 = vmatpush3.bf16.msra.mxu1 %v5898_v39  ;;  %v5948_v39 = vld [vmem:[%s7666_s1 + $0x470] sm:$0xff]  }
  0x56   :  { %5315 = vmatprep.subr.bf16.mxu1 %v5901_v43  ;;  %v5951_v43 = vld [vmem:[%s7666_s1 + $0x4b0] sm:$0xff]  }
  0x57   :  { %5294 = vmatpush3.bf16.msra.mxu0 %v5900_v42  ;;  %v5950_v42 = vld [vmem:[%s7666_s1 + $0x4f0] sm:$0xff]  }
  0x58   :  { %5295 = vmatprep.subr.bf16.mxu0 %v5903_v45  ;;  %v5953_v45 = vld [vmem:[%s7666_s1 + $0x428] sm:$0xff]  }
  0x59   :  { %5316 = vmatpush3.bf16.msra.mxu1 %v5902_v44  ;;  %v5952_v44 = vld [vmem:[%s7666_s1 + $0x468] sm:$0xff]  }
  0x5a   :  { %5317 = vmatprep.subr.bf16.mxu1 %v5905_v50  ;;  %v5958_v50 = vld [vmem:[%s7666_s1 + $0x4e0] sm:$0xff]  }
  0x5b   :  { %5296 = vmatpush3.bf16.msra.mxu0 %v5904_v47  ;;  %v5955_v47 = vld [vmem:[%s7666_s1 + $0x4a8] sm:$0xff]  }
  0x5c   :  { %5297 = vmatprep.subr.bf16.mxu0 %v5907_v54  ;;  %v5962_v54 = vld [vmem:[%s7666_s1 + $0x4d8] sm:$0xff]  }
  0x5d   :  { %5318 = vmatpush3.bf16.msra.mxu1 %v5906_v51  ;;  %v5959_v51 = vld [vmem:[%s7666_s1 + $0x4a0] sm:$0xff]  }
  0x5e   :  { %5319 = vmatprep.subr.bf16.mxu1 %v5909_v58  ;;  %v5966_v58 = vld [vmem:[%s7666_s1 + $0x4d0] sm:$0xff]  }
  0x5f   :  { %5298 = vmatpush3.bf16.msra.mxu0 %v5908_v55  ;;  %v5963_v55 = vld [vmem:[%s7666_s1 + $0x498] sm:$0xff]  }
  0x60   :  { %5327 = vmatprep.subr.bf16.mxu0 %v5911_v62  ;;  %v5969_v62 = vld [vmem:[%s7666_s1 + $0x408] sm:$0xff]  }
  0x61   :  { %5320 = vmatpush3.bf16.msra.mxu1 %v5910_v59  ;;  %v5967_v59 = vld [vmem:[%s7666_s1 + $0x490] sm:$0xff]  }
  0x62   :  { %3735 = vmatmul.mubr.bf16.vlgmr.msra.gmra.mxu0 %v905_v61  ;;  %5349 = vmatprep.subr.bf16.mxu1 %v5913_v1  ;;  %v30_v61 = vld [vmem:[%s7665_s0 + $0x10] sm:$0xff]  ;;  %v5970_v1 = vld [vmem:[%s7666_s1 + $0x4c8] sm:$0xff]  }
  0x63   :  { %5328 = vmatpush3.bf16.msra.mxu0 %v5912_v63  ;;  %3814 = vmatprep.mubr.bf16.mxu0 %v926_v0  ;;  %v938_v63 = vrot.slane %v30_v61, %v6399_v41  ;;  %v931_v0 = vcombine.high %v30_v61, %v30_v61  ;;  %v6019_v61 = vld [vmem:[%s7666_s1 + $0x6e8] sm:$0xff]  }
  0x64   :  { %3775 = vmatmul.mubr.bf16.vlgmr.msra.gmra.mxu1 %v927_v3  ;;  %5329 = vmatprep.subr.bf16.mxu0 %v5915_v4 }
  0x65   :  { %5350 = vmatpush3.bf16.msra.mxu1 %v5914_v2  ;;  %3854 = vmatprep.mubr.bf16.mxu1 %v930_v6  ;;  %v5971_v2 = vld [vmem:[%s7666_s1 + $0x488] sm:$0xff]   ;;  %v946_v3 = vcombine.high %v938_v63, %v938_v63  ;;  %v6797_v4 = vrot.slane %v931_v0, %v6399_v41  ;;  %v5973_v6 = vld [vmem:[%s7666_s1 + $0x400] sm:$0xff]  }
  0x66   :  { %5351 = vmatprep.subr.bf16.mxu1 %v5917_v7  ;;  %v6022_v0 = vld [vmem:[%s7666_s1 + $0x620] sm:$0xff]  }
  0x67   :  { %5330 = vmatpush3.bf16.msra.mxu0 %v5916_v5  ;;  %v5972_v5 = vld [vmem:[%s7666_s1 + $0x440] sm:$0xff]   ;;  %v968_v7 = vrot.slane %v946_v3, %v6399_v41  ;;  %v6025_v3 = vld [vmem:[%s7666_s1 + $0x658] sm:$0xff]  }
  0x68   :  { %5331 = vmatprep.subr.bf16.mxu0 %v5919_v9  ;;  %v5974_v9 = vld [vmem:[%s7666_s1 + $0x4c0] sm:$0xff]  }
  0x69   :  { %5352 = vmatpush3.bf16.msra.mxu1 %v5918_v8  ;;  %v947_v8 = vcombine.high %v6797_v4, %v6797_v4 }
  0x6a   :  { %5353 = vmatprep.subr.bf16.mxu1 %v5921_v11  ;;  %v978_v11 = vcombine.high %v968_v7, %v968_v7 }
  0x6b   :  { %5332 = vmatpush3.bf16.msra.mxu0 %v5920_v10  ;;  %v5975_v10 = vld [vmem:[%s7666_s1 + $0x480] sm:$0xff]  }
  0x6c   :  { %5333 = vmatprep.subr.bf16.mxu0 %v5923_v13  ;;  %v5976_v13 = vld [vmem:[%s7666_s1 + $0x578] sm:$0xff]  }
  0x6d   :  { %5354 = vmatpush3.bf16.msra.mxu1 %v5922_v12  ;;  %v954_v12 = vrot.slane %v938_v63, %v6399_v41  ;;  %v6021_v63 = vld [vmem:[%s7666_s1 + $0x660] sm:$0xff]  }
  0x6e   :  { %5355 = vmatprep.subr.bf16.mxu1 %v5925_v15  ;;  %v975_v15 = vrot.slane %v947_v8, %v6399_v41  ;;  %v6030_v8 = vld [vmem:[%s7666_s1 + $0x610] sm:$0xff]  }
  0x6f   :  { %5334 = vmatpush3.bf16.msra.mxu0 %v5924_v14  ;;  %v5977_v14 = vld [vmem:[%s7666_s1 + $0x538] sm:$0xff]  }
  0x70   :  { %5335 = vmatprep.subr.bf16.mxu0 %v5927_v17  ;;  %v5979_v17 = vld [vmem:[%s7666_s1 + $0x5b8] sm:$0xff]  }
  0x71   :  { %5356 = vmatpush3.bf16.msra.mxu1 %v5926_v16  ;;  %v5978_v16 = vld [vmem:[%s7666_s1 + $0x5f8] sm:$0xff]  }
  0x72   :  { %5357 = vmatprep.subr.bf16.mxu1 %v5929_v19  ;;  %v5980_v19 = vld [vmem:[%s7666_s1 + $0x570] sm:$0xff]  }
  0x73   :  { %5336 = vmatpush3.bf16.msra.mxu0 %v5928_v18  ;;  %v976_v18 = vcombine.high %v954_v12, %v954_v12 }
  0x74   :  { %5337 = vmatprep.subr.bf16.mxu0 %v5931_v21  ;;  %v979_v21 = vcombine.high %v975_v15, %v975_v15 }
  0x75   :  { %5358 = vmatpush3.bf16.msra.mxu1 %v5930_v20  ;;  %v5981_v20 = vld [vmem:[%s7666_s1 + $0x530] sm:$0xff]  }
  0x76   :  { %5359 = vmatprep.subr.bf16.mxu1 %v5933_v23  ;;  %v5983_v23 = vld [vmem:[%s7666_s1 + $0x5b0] sm:$0xff]  }
  0x77   :  { %5338 = vmatpush3.bf16.msra.mxu0 %v5932_v22  ;;  %v5982_v22 = vld [vmem:[%s7666_s1 + $0x5f0] sm:$0xff]  }
  0x78   :  { %5339 = vmatprep.subr.bf16.mxu0 %v5935_v25  ;;  %v5985_v25 = vld [vmem:[%s7666_s1 + $0x528] sm:$0xff]  }
  0x79   :  { %5360 = vmatpush3.bf16.msra.mxu1 %v5934_v24  ;;  %v5984_v24 = vld [vmem:[%s7666_s1 + $0x568] sm:$0xff]  }
  0x7a   :  { %5361 = vmatprep.subr.bf16.mxu1 %v5937_v27  ;;  %v5987_v27 = vld [vmem:[%s7666_s1 + $0x5a8] sm:$0xff]  }
  0x7b   :  { %5340 = vmatpush3.bf16.msra.mxu0 %v5936_v26  ;;  %v5986_v26 = vld [vmem:[%s7666_s1 + $0x5e8] sm:$0xff]  }
  0x7c   :  { %5341 = vmatprep.subr.bf16.mxu0 %v5939_v29  ;;  %v5989_v29 = vld [vmem:[%s7666_s1 + $0x520] sm:$0xff]  }
  0x7d   :  { %5362 = vmatpush3.bf16.msra.mxu1 %v5938_v28  ;;  %v5988_v28 = vld [vmem:[%s7666_s1 + $0x560] sm:$0xff]  }
  0x7e   :  { %5363 = vmatprep.subr.bf16.mxu1 %v5941_v31  ;;  %v5991_v31 = vld [vmem:[%s7666_s1 + $0x5a0] sm:$0xff]  }
  0x7f   :  { %5342 = vmatpush3.bf16.msra.mxu0 %v5940_v30  ;;  %v5990_v30 = vld [vmem:[%s7666_s1 + $0x5e0] sm:$0xff]  }
  0x80   :  { %5371 = vmatprep.subr.bf16.mxu0 %v5944_v34  ;;  %v5994_v34 = vld [vmem:[%s7666_s1 + $0x5d8] sm:$0xff]  }
  0x81   :  { %5364 = vmatpush3.bf16.msra.mxu1 %v5943_v32  ;;  %v5992_v32 = vld [vmem:[%s7666_s1 + $0x558] sm:$0xff]  }
  0x82   :  { %3815 = vmatmul.mubr.bf16.vlgmr.msra.gmra.mxu0 %v912_v33  ;;  %5393 = vmatprep.subr.bf16.mxu1 %v5946_v36  ;;  %v5993_v33 = vld [vmem:[%s7666_s1 + $0x518] sm:$0xff]   ;;  %v5996_v36 = vld [vmem:[%s7666_s1 + $0x550] sm:$0xff]  }
  0x83   :  { %5372 = vmatpush3.bf16.msra.mxu0 %v5945_v35  ;;  %3894 = vmatprep.mubr.bf16.mxu0 %v968_v7  ;;  %v5995_v35 = vld [vmem:[%s7666_s1 + $0x598] sm:$0xff]   ;;  %v6029_v7 = vld [vmem:[%s7666_s1 + $0x650] sm:$0xff]  }
  0x84   :  { %3855 = vmatmul.mubr.bf16.vlgmr.msra.gmra.mxu1 %v928_v38  ;;  %5373 = vmatprep.subr.bf16.mxu0 %v5948_v39  ;;  %v5998_v38 = vld [vmem:[%s7666_s1 + $0x5d0] sm:$0xff]  }
  0x85   :  { %5394 = vmatpush3.bf16.msra.mxu1 %v5947_v37  ;;  %3934 = vmatprep.mubr.bf16.mxu1 %v978_v11  ;;  %v5997_v37 = vld [vmem:[%s7666_s1 + $0x510] sm:$0xff]   ;;  %v6033_v11 = vld [vmem:[%s7666_s1 + $0x648] sm:$0xff]  }
  0x86   :  { %5395 = vmatprep.subr.bf16.mxu1 %v5950_v42  ;;  %v5999_v39 = vld [vmem:[%s7666_s1 + $0x590] sm:$0xff]   ;;  %v6001_v42 = vld [vmem:[%s7666_s1 + $0x508] sm:$0xff]  }
  0x87   :  { %5374 = vmatpush3.bf16.msra.mxu0 %v5949_v40  ;;  %v6000_v40 = vld [vmem:[%s7666_s1 + $0x548] sm:$0xff]  }
  0x88   :  { %5375 = vmatprep.subr.bf16.mxu0 %v5952_v44  ;;  %v6003_v44 = vld [vmem:[%s7666_s1 + $0x588] sm:$0xff]  }
  0x89   :  { %5396 = vmatpush3.bf16.msra.mxu1 %v5951_v43  ;;  %v6002_v43 = vld [vmem:[%s7666_s1 + $0x5c8] sm:$0xff]  }
  0x8a   :  { %5397 = vmatprep.subr.bf16.mxu1 %v5954_v46  ;;  %v6005_v46 = vld [vmem:[%s7666_s1 + $0x500] sm:$0xff]  }
  0x8b   :  { %5376 = vmatpush3.bf16.msra.mxu0 %v5953_v45  ;;  %v6004_v45 = vld [vmem:[%s7666_s1 + $0x540] sm:$0xff]  }
  0x8c   :  { %5377 = vmatprep.subr.bf16.mxu0 %v5956_v48  ;;  %v6008_v48 = vld [vmem:[%s7666_s1 + $0x580] sm:$0xff]  }
  0x8d   :  { %5398 = vmatpush3.bf16.msra.mxu1 %v5955_v47  ;;  %v6006_v47 = vld [vmem:[%s7666_s1 + $0x5c0] sm:$0xff]  }
  0x8e   :  { %5399 = vmatprep.subr.bf16.mxu1 %v5958_v50  ;;  %v6009_v50 = vld [vmem:[%s7666_s1 + $0x678] sm:$0xff]  }
  0x8f   :  { %5378 = vmatpush3.bf16.msra.mxu0 %v5957_v49  ;;  %v961_v49 = vrot.slane %v6797_v4, %v6399_v41  ;;  %v6026_v4 = vld [vmem:[%s7666_s1 + $0x618] sm:$0xff]  }
  0x90   :  { %5379 = vmatprep.subr.bf16.mxu0 %v5960_v52  ;;  %v6011_v52 = vld [vmem:[%s7666_s1 + $0x6f8] sm:$0xff]  }
  0x91   :  { %5400 = vmatpush3.bf16.msra.mxu1 %v5959_v51  ;;  %v6010_v51 = vld [vmem:[%s7666_s1 + $0x638] sm:$0xff]  }
  0x92   :  { %5401 = vmatprep.subr.bf16.mxu1 %v5962_v54  ;;  %v977_v54 = vcombine.high %v961_v49, %v961_v49 }
  0x93   :  { %5380 = vmatpush3.bf16.msra.mxu0 %v5961_v53  ;;  %v6012_v53 = vld [vmem:[%s7666_s1 + $0x6b8] sm:$0xff]  }
  0x94   :  { %5381 = vmatprep.subr.bf16.mxu0 %v5964_v56  ;;  %v6014_v56 = vld [vmem:[%s7666_s1 + $0x630] sm:$0xff]  }
  0x95   :  { %5402 = vmatpush3.bf16.msra.mxu1 %v5963_v55  ;;  %v6013_v55 = vld [vmem:[%s7666_s1 + $0x670] sm:$0xff]  }
  0x96   :  { %5403 = vmatprep.subr.bf16.mxu1 %v5966_v58  ;;  %v6016_v58 = vld [vmem:[%s7666_s1 + $0x6b0] sm:$0xff]  }
  0x97   :  { %5382 = vmatpush3.bf16.msra.mxu0 %v5965_v57  ;;  %v6015_v57 = vld [vmem:[%s7666_s1 + $0x6f0] sm:$0xff]  }
  0x98   :  { %5383 = vmatprep.subr.bf16.mxu0 %v5968_v60  ;;  %v6018_v60 = vld [vmem:[%s7666_s1 + $0x628] sm:$0xff]  }
  0x99   :  { %5404 = vmatpush3.bf16.msra.mxu1 %v5967_v59  ;;  %v6017_v59 = vld [vmem:[%s7666_s1 + $0x668] sm:$0xff]  }
  0x9a   :  { %5405 = vmatprep.subr.bf16.mxu1 %v5970_v1  ;;  %v6023_v1 = vld [vmem:[%s7666_s1 + $0x6e0] sm:$0xff]  }
  0x9b   :  { %5384 = vmatpush3.bf16.msra.mxu0 %v5969_v62  ;;  %v6020_v62 = vld [vmem:[%s7666_s1 + $0x6a8] sm:$0xff]  }
  0x9c   :  { %5385 = vmatprep.subr.bf16.mxu0 %v5972_v5  ;;  %v6027_v5 = vld [vmem:[%s7666_s1 + $0x6d8] sm:$0xff]  }
  0x9d   :  { %5406 = vmatpush3.bf16.msra.mxu1 %v5971_v2  ;;  %v6024_v2 = vld [vmem:[%s7666_s1 + $0x6a0] sm:$0xff]  }
  0x9e   :  { %5407 = vmatprep.subr.bf16.mxu1 %v5974_v9  ;;  %v6031_v9 = vld [vmem:[%s7666_s1 + $0x6d0] sm:$0xff]  }
  0x9f   :  { %5386 = vmatpush3.bf16.msra.mxu0 %v5973_v6  ;;  %v6028_v6 = vld [vmem:[%s7666_s1 + $0x698] sm:$0xff]  }
  0xa0   :  { %5415 = vmatprep.subr.bf16.mxu0 %v5976_v13  ;;  %v6035_v13 = vld [vmem:[%s7666_s1 + $0x6c8] sm:$0xff]  }
  0xa1   :  { %5408 = vmatpush3.bf16.msra.mxu1 %v5975_v10  ;;  %v6032_v10 = vld [vmem:[%s7666_s1 + $0x690] sm:$0xff]  }
  0xa2   :  { %3895 = vmatmul.mubr.bf16.vlgmr.msra.gmra.mxu0 %v954_v12  ;;  %5437 = vmatprep.subr.bf16.mxu1 %v5978_v16  ;;  %v31_v12 = vld [vmem:[%s7665_s0 + $0x18] sm:$0xff]  ;;  %v6034_v16 = vld [vmem:[%s7666_s1 + $0x608] sm:$0xff]  }
  0xa3   :  { %5416 = vmatpush3.bf16.msra.mxu0 %v5977_v14  ;;  %3974 = vmatprep.mubr.bf16.mxu0 %v975_v15  ;;  %v987_v14 = vrot.slane %v31_v12, %v6399_v41  ;;  %v980_v15 = vcombine.high %v31_v12, %v31_v12  ;;  %v6073_v12 = vld [vmem:[%s7666_s1 + $0x780] sm:$0xff]  }
  0xa4   :  { %3935 = vmatmul.mubr.bf16.vlgmr.msra.gmra.mxu1 %v976_v18  ;;  %5417 = vmatprep.subr.bf16.mxu0 %v5980_v19  ;;  %v6037_v18 = vld [vmem:[%s7666_s1 + $0x640] sm:$0xff]  }
  0xa5   :  { %5438 = vmatpush3.bf16.msra.mxu1 %v5979_v17  ;;  %4014 = vmatprep.mubr.bf16.mxu1 %v979_v21  ;;  %v6036_v17 = vld [vmem:[%s7666_s1 + $0x688] sm:$0xff]   ;;  %v995_v19 = vcombine.high %v987_v14, %v987_v14  ;;  %v6038_v21 = vld [vmem:[%s7666_s1 + $0x600] sm:$0xff]  }
  0xa6   :  { %5439 = vmatprep.subr.bf16.mxu1 %v5982_v22  ;;  %v6039_v22 = vld [vmem:[%s7666_s1 + $0x6c0] sm:$0xff]  }
  0xa7   :  { %5418 = vmatpush3.bf16.msra.mxu0 %v5981_v20  ;;  %v7006_v20 = vrot.slane %v980_v15, %v6399_v41  ;;  %v6075_v15 = vld [vmem:[%s7666_s1 + $0x838] sm:$0xff]  }
  0xa8   :  { %5419 = vmatprep.subr.bf16.mxu0 %v5984_v24 }
  0xa9   :  { %5440 = vmatpush3.bf16.msra.mxu1 %v5983_v23  ;;  %v1017_v23 = vrot.slane %v995_v19, %v6399_v41  ;;  %v996_v24 = vcombine.high %v7006_v20, %v7006_v20  ;;  %v6078_v19 = vld [vmem:[%s7666_s1 + $0x870] sm:$0xff]  }
  0xaa   :  { %5441 = vmatprep.subr.bf16.mxu1 %v5986_v26  ;;  %v1003_v26 = vrot.slane %v987_v14, %v6399_v41  ;;  %v6074_v14 = vld [vmem:[%s7666_s1 + $0x878] sm:$0xff]  }
  0xab   :  { %5420 = vmatpush3.bf16.msra.mxu0 %v5985_v25  ;;  %v6040_v25 = vld [vmem:[%s7666_s1 + $0x680] sm:$0xff]  }
  0xac   :  { %5421 = vmatprep.subr.bf16.mxu0 %v5988_v28  ;;  %v1027_v28 = vcombine.high %v1017_v23, %v1017_v23 }
  0xad   :  { %5442 = vmatpush3.bf16.msra.mxu1 %v5987_v27  ;;  %v6041_v27 = vld [vmem:[%s7666_s1 + $0x778] sm:$0xff]  }
  0xae   :  { %5443 = vmatprep.subr.bf16.mxu1 %v5990_v30  ;;  %v1024_v30 = vrot.slane %v996_v24, %v6399_v41 }
  0xaf   :  { %5422 = vmatpush3.bf16.msra.mxu0 %v5989_v29  ;;  %v6042_v29 = vld [vmem:[%s7666_s1 + $0x738] sm:$0xff]  }
  0xb0   :  { %5423 = vmatprep.subr.bf16.mxu0 %v5992_v32  ;;  %v6044_v32 = vld [vmem:[%s7666_s1 + $0x7b8] sm:$0xff]  }
  0xb1   :  { %5444 = vmatpush3.bf16.msra.mxu1 %v5991_v31  ;;  %v6043_v31 = vld [vmem:[%s7666_s1 + $0x7f8] sm:$0xff]  }
  0xb2   :  { %5445 = vmatprep.subr.bf16.mxu1 %v5994_v34  ;;  %v6045_v34 = vld [vmem:[%s7666_s1 + $0x770] sm:$0xff]  }
  0xb3   :  { %5424 = vmatpush3.bf16.msra.mxu0 %v5993_v33  ;;  %v1025_v33 = vcombine.high %v1003_v26, %v1003_v26 }
  0xb4   :  { %5425 = vmatprep.subr.bf16.mxu0 %v5996_v36  ;;  %v1028_v36 = vcombine.high %v1024_v30, %v1024_v30 }
  0xb5   :  { %5446 = vmatpush3.bf16.msra.mxu1 %v5995_v35  ;;  %v6046_v35 = vld [vmem:[%s7666_s1 + $0x730] sm:$0xff]  }
  0xb6   :  { %5447 = vmatprep.subr.bf16.mxu1 %v5998_v38  ;;  %v4783_v38 = vld [vmem:[%s7667_s2] ss:$0 sm:$0xff] }
  0xb7   :  { %5426 = vmatpush3.bf16.msra.mxu0 %v5997_v37 }
  0xb8   :  { %5427 = vmatprep.subr.bf16.mxu0 %v6000_v40  ;;  %v6048_v40 = vld [vmem:[%s7666_s1 + $0x7b0] sm:$0xff]  }
  0xb9   :  { %5448 = vmatpush3.bf16.msra.mxu1 %v5999_v39  ;;  %v6047_v39 = vld [vmem:[%s7666_s1 + $0x7f0] sm:$0xff]  }
  0xba   :  { %5449 = vmatprep.subr.bf16.mxu1 %v6002_v43 }
  0xbb   :  { %5428 = vmatpush3.bf16.msra.mxu0 %v6001_v42 }
  0xbc   :  { %5429 = vmatprep.subr.bf16.mxu0 %v6004_v45 }
  0xbd   :  { %5450 = vmatpush3.bf16.msra.mxu1 %v6003_v44  ;;  %v6049_v44 = vld [vmem:[%s7666_s1 + $0x768] sm:$0xff]  }
  0xbe   :  { %5451 = vmatprep.subr.bf16.mxu1 %v6006_v47 }
  0xbf   :  { %5430 = vmatpush3.bf16.msra.mxu0 %v6005_v46  ;;  %v6050_v46 = vld [vmem:[%s7666_s1 + $0x728] sm:$0xff]  }
  0xc0   :  { %5459 = vmatprep.subr.bf16.mxu0 %v6009_v50 }
  0xc1   :  { %5452 = vmatpush3.bf16.msra.mxu1 %v6008_v48 }
  0xc2   :  { %3975 = vmatmul.mubr.bf16.vlgmr.msra.gmra.mxu0 %v961_v49  ;;  %5481 = vmatprep.subr.bf16.mxu1 %v6011_v52  ;;  %v6051_v49 = vld [vmem:[%s7666_s1 + $0x7e8] sm:$0xff]  }
  0xc3   :  { %5460 = vmatpush3.bf16.msra.mxu0 %v6010_v51  ;;  %4054 = vmatprep.mubr.bf16.mxu0 %v1017_v23  ;;  %v6052_v52 = vld [vmem:[%s7666_s1 + $0x7a8] sm:$0xff]   ;;  %v6081_v23 = vld [vmem:[%s7666_s1 + $0x8b0] sm:$0xff]  }
  0xc4   :  { %4015 = vmatmul.mubr.bf16.vlgmr.msra.gmra.mxu1 %v977_v54  ;;  %5461 = vmatprep.subr.bf16.mxu0 %v6013_v55  ;;  %v6053_v54 = vld [vmem:[%s7666_s1 + $0x760] sm:$0xff]  }
  0xc5   :  { %5482 = vmatpush3.bf16.msra.mxu1 %v6012_v53  ;;  %4094 = vmatprep.mubr.bf16.mxu1 %v1027_v28  ;;  %v6083_v28 = vld [vmem:[%s7666_s1 + $0x828] sm:$0xff]  }
  0xc6   :  { %5483 = vmatprep.subr.bf16.mxu1 %v6015_v57  ;;  %v6054_v57 = vld [vmem:[%s7666_s1 + $0x720] sm:$0xff]  }
  0xc7   :  { %5462 = vmatpush3.bf16.msra.mxu0 %v6014_v56 }
  0xc8   :  { %5463 = vmatprep.subr.bf16.mxu0 %v6017_v59 }
  0xc9   :  { %5484 = vmatpush3.bf16.msra.mxu1 %v6016_v58  ;;  %v6055_v58 = vld [vmem:[%s7666_s1 + $0x7e0] sm:$0xff]  }
  0xca   :  { %5485 = vmatprep.subr.bf16.mxu1 %v6019_v61  ;;  %v6057_v61 = vld [vmem:[%s7666_s1 + $0x758] sm:$0xff]  }
  0xcb   :  { %5464 = vmatpush3.bf16.msra.mxu0 %v6018_v60  ;;  %v6056_v60 = vld [vmem:[%s7666_s1 + $0x7a0] sm:$0xff]  }
  0xcc   :  { %5465 = vmatprep.subr.bf16.mxu0 %v6021_v63  ;;  %v6059_v63 = vld [vmem:[%s7666_s1 + $0x7d8] sm:$0xff]  }
  0xcd   :  { %5486 = vmatpush3.bf16.msra.mxu1 %v6020_v62  ;;  %v6058_v62 = vld [vmem:[%s7666_s1 + $0x718] sm:$0xff]  }
  0xce   :  { %5487 = vmatprep.subr.bf16.mxu1 %v6023_v1  ;;  %v6061_v1 = vld [vmem:[%s7666_s1 + $0x750] sm:$0xff]  }
  0xcf   :  { %5466 = vmatpush3.bf16.msra.mxu0 %v6022_v0  ;;  %v6060_v0 = vld [vmem:[%s7666_s1 + $0x798] sm:$0xff]  }
  0xd0   :  { %5467 = vmatprep.subr.bf16.mxu0 %v6025_v3  ;;  %v6063_v3 = vld [vmem:[%s7666_s1 + $0x7d0] sm:$0xff]  }
  0xd1   :  { %5488 = vmatpush3.bf16.msra.mxu1 %v6024_v2  ;;  %v6062_v2 = vld [vmem:[%s7666_s1 + $0x710] sm:$0xff]  }
  0xd2   :  { %5489 = vmatprep.subr.bf16.mxu1 %v6027_v5  ;;  %v6065_v5 = vld [vmem:[%s7666_s1 + $0x748] sm:$0xff]  }
  0xd3   :  { %5468 = vmatpush3.bf16.msra.mxu0 %v6026_v4  ;;  %v6064_v4 = vld [vmem:[%s7666_s1 + $0x790] sm:$0xff]  }
  0xd4   :  { %5469 = vmatprep.subr.bf16.mxu0 %v6029_v7  ;;  %v6067_v7 = vld [vmem:[%s7666_s1 + $0x7c8] sm:$0xff]  }
  0xd5   :  { %5490 = vmatpush3.bf16.msra.mxu1 %v6028_v6  ;;  %v6066_v6 = vld [vmem:[%s7666_s1 + $0x708] sm:$0xff]  }
  0xd6   :  { %5491 = vmatprep.subr.bf16.mxu1 %v6031_v9  ;;  %v6069_v9 = vld [vmem:[%s7666_s1 + $0x740] sm:$0xff]  }
  0xd7   :  { %5470 = vmatpush3.bf16.msra.mxu0 %v6030_v8  ;;  %v6068_v8 = vld [vmem:[%s7666_s1 + $0x788] sm:$0xff]  }
  0xd8   :  { %5471 = vmatprep.subr.bf16.mxu0 %v6033_v11  ;;  %v6071_v11 = vld [vmem:[%s7666_s1 + $0x7c0] sm:$0xff]  }
  0xd9   :  { %5492 = vmatpush3.bf16.msra.mxu1 %v6032_v10  ;;  %v6070_v10 = vld [vmem:[%s7666_s1 + $0x700] sm:$0xff]  }
  0xda   :  { %5493 = vmatprep.subr.bf16.mxu1 %v6035_v13  ;;  %v1010_v13 = vrot.slane %v7006_v20, %v6399_v41  ;;  %v6079_v20 = vld [vmem:[%s7666_s1 + $0x830] sm:$0xff]  }
  0xdb   :  { %5472 = vmatpush3.bf16.msra.mxu0 %v6034_v16  ;;  %v6076_v16 = vld [vmem:[%s7666_s1 + $0x8f8] sm:$0xff]  }
  0xdc   :  { %5473 = vmatprep.subr.bf16.mxu0 %v6037_v18  ;;  %v1026_v18 = vcombine.high %v1010_v13, %v1010_v13 }
  0xdd   :  { %5494 = vmatpush3.bf16.msra.mxu1 %v6036_v17  ;;  %v6077_v17 = vld [vmem:[%s7666_s1 + $0x8b8] sm:$0xff]  }
  0xde   :  { %5495 = vmatprep.subr.bf16.mxu1 %v6039_v22  ;;  %v6080_v22 = vld [vmem:[%s7666_s1 + $0x8f0] sm:$0xff]  }
  0xdf   :  { %5474 = vmatpush3.bf16.msra.mxu0 %v6038_v21 }
  0xe0   :  { %5503 = vmatprep.subr.bf16.mxu0 %v6041_v27 }
  0xe1   :  { %5496 = vmatpush3.bf16.msra.mxu1 %v6040_v25 }
  0xe2   :  { %v5211_v37 = vpop.f32.mrf.mxu0  ;;  %4055 = vmatmul.mubr.bf16.vlgmr.msra.gmra.mxu0 %v1003_v26  ;;  %5525 = vmatprep.subr.bf16.mxu1 %v6043_v31  ;;  %v6082_v26 = vld [vmem:[%s7666_s1 + $0x868] sm:$0xff]  }
  0xe3   :  { %5504 = vmatpush3.bf16.msra.mxu0 %v6042_v29  ;;  %4134 = vmatprep.mubr.bf16.mxu0 %v1024_v30  ;;  %v6084_v31 = vld [vmem:[%s7666_s1 + $0x8e8] sm:$0xff]  }
  0xe4   :  { %v5212_v42 = vpop.f32.mrf.mxu0  ;;  %v5233_v43 = vpop.f32.mrf.mxu1  ;;  %4095 = vmatmul.mubr.bf16.vlgmr.msra.gmra.mxu1 %v1025_v33  ;;  %5505 = vmatprep.subr.bf16.mxu0 %v6045_v34  ;;  %v6085_v34 = vld [vmem:[%s7666_s1 + $0x8a8] sm:$0xff]  }
  0xe5   :  { %v5213_v45 = vadd.f32 %v5212_v42, %v5211_v37  ;;  %5526 = vmatpush3.bf16.msra.mxu1 %v6044_v32  ;;  %4174 = vmatprep.mubr.bf16.mxu1 %v1028_v36  ;;  %v6086_v36 = vld [vmem:[%s7666_s1 + $0x860] sm:$0xff]  }
  0xe6   :  { %v5214_v47 = vpop.f32.mrf.mxu0  ;;  %v5234_v48 = vpop.f32.mrf.mxu1  ;;  %5527 = vmatprep.subr.bf16.mxu1 %v6047_v39  ;;  %v6087_v39 = vld [vmem:[%s7666_s1 + $0x820] sm:$0xff]  }
  0xe7   :  { %v3577_v50 = vadd.f32 %v5213_v45, %v4783_v38  ;;  %v5235_v51 = vadd.f32 %v5234_v48, %v5233_v43  ;;  %5506 = vmatpush3.bf16.msra.mxu0 %v6046_v35  ;;  %v6089_v43 = vld [vmem:[%s7666_s1 + $0x8a0] sm:$0xff]   ;;  %v6091_v45 = vld [vmem:[%s7666_s1 + $0x818] sm:$0xff]   ;;  %v6094_v48 = vld [vmem:[%s7666_s1 + $0x850] sm:$0xff]  }
  0xe8   :  { %v5215_v53 = vpop.f32.mrf.mxu0  ;;  %5507 = vmatprep.subr.bf16.mxu0 %v6049_v44  ;;  %v5236_v55 = vpop.f32.mrf.mxu1  ;;  %v6090_v44 = vld [vmem:[%s7666_s1 + $0x858] sm:$0xff]  }
  0xe9   :  { %v7064_v56 = vadd.f32 %v5235_v51, %v3577_v50  ;;  %5528 = vmatpush3.bf16.msra.mxu1 %v6048_v40  ;;  %v6088_v40 = vld [vmem:[%s7666_s1 + $0x8e0] sm:$0xff]   ;;  %v6093_v47 = vld [vmem:[%s7666_s1 + $0x898] sm:$0xff]   ;;  %v6096_v50 = vld [vmem:[%s7666_s1 + $0x8d0] sm:$0xff]  }
  0xea   :  { %5529 = vmatprep.subr.bf16.mxu1 %v6051_v49  ;;  %v5237_v59 = vpop.f32.mrf.mxu1  ;;  %v6095_v49 = vld [vmem:[%s7666_s1 + $0x810] sm:$0xff]   ;;  %v6099_v53 = vld [vmem:[%s7666_s1 + $0x808] sm:$0xff]  }
  0xeb   :  { %5508 = vmatpush3.bf16.msra.mxu0 %v6050_v46  ;;  %v6092_v46 = vld [vmem:[%s7666_s1 + $0x8d8] sm:$0xff]   ;;  %v6097_v51 = vld [vmem:[%s7666_s1 + $0x890] sm:$0xff]   ;;  %v6100_v55 = vld [vmem:[%s7666_s1 + $0x8c8] sm:$0xff]  }
  0xec   :  { %5509 = vmatprep.subr.bf16.mxu0 %v6053_v54  ;;  %v32_v54 = vld [vmem:[%s7665_s0 + $0x20] sm:$0xff] }
  0xed   :  { %5530 = vmatpush3.bf16.msra.mxu1 %v6052_v52  ;;  %v6098_v52 = vld [vmem:[%s7666_s1 + $0x848] sm:$0xff]   ;;  %v6102_v59 = vld [vmem:[%s7666_s1 + $0x840] sm:$0xff]  }
  0xee   :  { %5531 = vmatprep.subr.bf16.mxu1 %v6055_v58  ;;  %v6101_v58 = vld [vmem:[%s7666_s1 + $0x888] sm:$0xff]  }
  0xef   :  { %5510 = vmatpush3.bf16.msra.mxu0 %v6054_v57  ;;  %v1029_v57 = vcombine.high %v32_v54, %v32_v54 }
  0xf0   :  { %5511 = vmatprep.subr.bf16.mxu0 %v6057_v61 }
  0xf1   :  { %5532 = vmatpush3.bf16.msra.mxu1 %v6056_v60  ;;  %v7220_v61 = vrot.slane %v1029_v57, %v6399_v41  ;;  %v6142_v57 = vld [vmem:[%s7666_s1 + $0xab8] sm:$0xff]  }
  0xf2   :  { %5533 = vmatprep.subr.bf16.mxu1 %v6059_v63  ;;  %v6104_v63 = vld [vmem:[%s7666_s1 + $0x8c0] sm:$0xff]  }
  0xf3   :  { %5512 = vmatpush3.bf16.msra.mxu0 %v6058_v62  ;;  %v6103_v62 = vld [vmem:[%s7666_s1 + $0x800] sm:$0xff]  }
  0xf4   :  { %5513 = vmatprep.subr.bf16.mxu0 %v6061_v1  ;;  %v1045_v1 = vcombine.high %v7220_v61, %v7220_v61 }
  0xf5   :  { %5534 = vmatpush3.bf16.msra.mxu1 %v6060_v0 }
  0xf6   :  { %5535 = vmatprep.subr.bf16.mxu1 %v6063_v3 }
  0xf7   :  { %5514 = vmatpush3.bf16.msra.mxu0 %v6062_v2  ;;  %v6105_v2 = vld [vmem:[%s7666_s1 + $0x880] sm:$0xff]  }
  0xf8   :  { %5515 = vmatprep.subr.bf16.mxu0 %v6065_v5 }
  0xf9   :  { %5536 = vmatpush3.bf16.msra.mxu1 %v6064_v4  ;;  %v6106_v4 = vld [vmem:[%s7666_s1 + $0x978] sm:$0xff]  }
  0xfa   :  { %5537 = vmatprep.subr.bf16.mxu1 %v6067_v7  ;;  %v1073_v7 = vrot.slane %v1045_v1, %v6399_v41 }
  0xfb   :  { %5516 = vmatpush3.bf16.msra.mxu0 %v6066_v6  ;;  %v6107_v6 = vld [vmem:[%s7666_s1 + $0x938] sm:$0xff]  }
  0xfc   :  { %5517 = vmatprep.subr.bf16.mxu0 %v6069_v9  ;;  %v6109_v9 = vld [vmem:[%s7666_s1 + $0x9b8] sm:$0xff]  }
  0xfd   :  { %5538 = vmatpush3.bf16.msra.mxu1 %v6068_v8  ;;  %v6108_v8 = vld [vmem:[%s7666_s1 + $0x9f8] sm:$0xff]  }
  0xfe   :  { %5539 = vmatprep.subr.bf16.mxu1 %v6071_v11  ;;  %v6110_v11 = vld [vmem:[%s7666_s1 + $0x970] sm:$0xff]  }
  0xff   :  { %5518 = vmatpush3.bf16.msra.mxu0 %v6070_v10 }
 0x100   :  { %5547 = vmatprep.subr.bf16.mxu0 %v6074_v14 }
 0x101   :  { %5540 = vmatpush3.bf16.msra.mxu1 %v6073_v12  ;;  %v6111_v12 = vld [vmem:[%s7666_s1 + $0x930] sm:$0xff]  }
 0x102   :  { %v5255_v21 = vpop.f32.mrf.mxu0  ;;  %4135 = vmatmul.mubr.bf16.vlgmr.msra.gmra.mxu0 %v1010_v13  ;;  %5569 = vmatprep.subr.bf16.mxu1 %v6076_v16  ;;  %v1077_v13 = vcombine.high %v1073_v7, %v1073_v7  ;;  %v6113_v16 = vld [vmem:[%s7666_s1 + $0x9b0] sm:$0xff]  }
 0x103   :  { %5548 = vmatpush3.bf16.msra.mxu0 %v6075_v15  ;;  %v6112_v15 = vld [vmem:[%s7666_s1 + $0x9f0] sm:$0xff]  }
 0x104   :  { %v5256_v24 = vpop.f32.mrf.mxu0  ;;  %v5277_v25 = vpop.f32.mrf.mxu1  ;;  %4175 = vmatmul.mubr.bf16.vlgmr.msra.gmra.mxu1 %v1026_v18  ;;  %5549 = vmatprep.subr.bf16.mxu0 %v6078_v19  ;;  %v6114_v19 = vld [vmem:[%s7666_s1 + $0x968] sm:$0xff]  }
 0x105   :  { %v5257_v27 = vadd.f32 %v5256_v24, %v5255_v21  ;;  %5570 = vmatpush3.bf16.msra.mxu1 %v6077_v17  ;;  %v6115_v21 = vld [vmem:[%s7666_s1 + $0x928] sm:$0xff]  }
 0x106   :  { %v5258_v29 = vpop.f32.mrf.mxu0  ;;  %v5278_v30 = vpop.f32.mrf.mxu1  ;;  %5571 = vmatprep.subr.bf16.mxu1 %v6080_v22  ;;  %v6116_v24 = vld [vmem:[%s7666_s1 + $0x9e8] sm:$0xff]  }
 0x107   :  { %v3657_v32 = vadd.f32 %v5257_v27, %v7064_v56  ;;  %v5279_v33 = vadd.f32 %v5278_v30, %v5277_v25  ;;  %5550 = vmatpush3.bf16.msra.mxu0 %v6079_v20  ;;  %v1036_v56 = vrot.slane %v32_v54, %v6399_v41  ;;  %v6117_v27 = vld [vmem:[%s7666_s1 + $0x9a8] sm:$0xff]   ;;  %v6118_v29 = vld [vmem:[%s7666_s1 + $0x960] sm:$0xff]   ;;  %v6139_v54 = vld [vmem:[%s7666_s1 + $0xa78] sm:$0xff]  }
 0x108   :  { %v5259_v35 = vpop.f32.mrf.mxu0  ;;  %5551 = vmatprep.subr.bf16.mxu0 %v6082_v26  ;;  %v5280_v37 = vpop.f32.mrf.mxu1 }
 0x109   :  { %v7165_v38 = vadd.f32 %v5279_v33, %v3657_v32  ;;  %5572 = vmatpush3.bf16.msra.mxu1 %v6081_v23  ;;  %v1044_v60 = vcombine.high %v1036_v56, %v1036_v56  ;;  %v1052_v3 = vrot.slane %v1036_v56, %v6399_v41  ;;  %v6119_v32 = vld [vmem:[%s7666_s1 + $0x920] sm:$0xff]   ;;  %v6123_v37 = vld [vmem:[%s7666_s1 + $0x918] sm:$0xff]  }
 0x10a   :  { %5573 = vmatprep.subr.bf16.mxu1 %v6084_v31  ;;  %v5281_v42 = vpop.f32.mrf.mxu1  ;;  %v6120_v33 = vld [vmem:[%s7666_s1 + $0x9e0] sm:$0xff]   ;;  %v6141_v56 = vld [vmem:[%s7666_s1 + $0xaf8] sm:$0xff]  }
 0x10b   :  { %5552 = vmatpush3.bf16.msra.mxu0 %v6083_v28  ;;  %v1066_v0 = vrot.slane %v1044_v60, %v6399_v41  ;;  %v1074_v10 = vcombine.high %v1052_v3, %v1052_v3  ;;  %v6121_v35 = vld [vmem:[%s7666_s1 + $0x9a0] sm:$0xff]   ;;  %v6127_v42 = vld [vmem:[%s7666_s1 + $0x910] sm:$0xff]  }
 0x10c   :  { %5553 = vmatprep.subr.bf16.mxu0 %v6086_v36  ;;  %v6122_v36 = vld [vmem:[%s7666_s1 + $0x958] sm:$0xff]   ;;  %v6144_v60 = vld [vmem:[%s7666_s1 + $0xa30] sm:$0xff]  }
 0x10d   :  { %5574 = vmatpush3.bf16.msra.mxu1 %v6085_v34  ;;  %4214 = vmatprep.mubr.bf16.mxu0 %v1066_v0  ;;  %v1076_v5 = vcombine.high %v1066_v0, %v1066_v0 }
 0x10e   :  { %5575 = vmatprep.subr.bf16.mxu1 %v6088_v40  ;;  %v6126_v40 = vld [vmem:[%s7666_s1 + $0x950] sm:$0xff]  }
 0x10f   :  { %5554 = vmatpush3.bf16.msra.mxu0 %v6087_v39  ;;  %4254 = vmatprep.mubr.bf16.mxu1 %v1076_v5  ;;  %v6125_v39 = vld [vmem:[%s7666_s1 + $0x998] sm:$0xff]  }
 0x110   :  { %5555 = vmatprep.subr.bf16.mxu0 %v6090_v44  ;;  %v6129_v44 = vld [vmem:[%s7666_s1 + $0x990] sm:$0xff]  }
 0x111   :  { %5576 = vmatpush3.bf16.msra.mxu1 %v6089_v43  ;;  %v6128_v43 = vld [vmem:[%s7666_s1 + $0x9d0] sm:$0xff]  }
 0x112   :  { %5577 = vmatprep.subr.bf16.mxu1 %v6092_v46  ;;  %v6131_v46 = vld [vmem:[%s7666_s1 + $0x908] sm:$0xff]  }
 0x113   :  { %5556 = vmatpush3.bf16.msra.mxu0 %v6091_v45  ;;  %v6130_v45 = vld [vmem:[%s7666_s1 + $0x948] sm:$0xff]  }
 0x114   :  { %5557 = vmatprep.subr.bf16.mxu0 %v6094_v48  ;;  %v6133_v48 = vld [vmem:[%s7666_s1 + $0x988] sm:$0xff]  }
 0x115   :  { %5578 = vmatpush3.bf16.msra.mxu1 %v6093_v47  ;;  %v6132_v47 = vld [vmem:[%s7666_s1 + $0x9c8] sm:$0xff]  }
 0x116   :  { %5579 = vmatprep.subr.bf16.mxu1 %v6096_v50  ;;  %v6135_v50 = vld [vmem:[%s7666_s1 + $0x900] sm:$0xff]  }
 0x117   :  { %5558 = vmatpush3.bf16.msra.mxu0 %v6095_v49  ;;  %v6134_v49 = vld [vmem:[%s7666_s1 + $0x940] sm:$0xff]  }
 0x118   :  { %5559 = vmatprep.subr.bf16.mxu0 %v6098_v52  ;;  %v6138_v52 = vld [vmem:[%s7666_s1 + $0x980] sm:$0xff]  }
 0x119   :  { %5580 = vmatpush3.bf16.msra.mxu1 %v6097_v51  ;;  %v6136_v51 = vld [vmem:[%s7666_s1 + $0x9c0] sm:$0xff]  }
 0x11a   :  { %5581 = vmatprep.subr.bf16.mxu1 %v6100_v55  ;;  %v6140_v55 = vld [vmem:[%s7666_s1 + $0xa38] sm:$0xff]  }
 0x11b   :  { %5560 = vmatpush3.bf16.msra.mxu0 %v6099_v53  ;;  %v1059_v53 = vrot.slane %v7220_v61, %v6399_v41 }
 0x11c   :  { %5561 = vmatprep.subr.bf16.mxu0 %v6102_v59  ;;  %v6143_v59 = vld [vmem:[%s7666_s1 + $0xa70] sm:$0xff]  }
 0x11d   :  { %5582 = vmatpush3.bf16.msra.mxu1 %v6101_v58  ;;  %v1075_v58 = vcombine.high %v1059_v53, %v1059_v53 }
 0x11e   :  { %5583 = vmatprep.subr.bf16.mxu1 %v6104_v63  ;;  %v6146_v63 = vld [vmem:[%s7666_s1 + $0xab0] sm:$0xff]  }
 0x11f   :  { %5562 = vmatpush3.bf16.msra.mxu0 %v6103_v62  ;;  %v6145_v62 = vld [vmem:[%s7666_s1 + $0xaf0] sm:$0xff]  }
 0x120   :  { %5591 = vmatprep.subr.bf16.mxu0 %v6106_v4  ;;  %v6148_v4 = vld [vmem:[%s7666_s1 + $0xa28] sm:$0xff]  }
 0x121   :  { %5584 = vmatpush3.bf16.msra.mxu1 %v6105_v2  ;;  %v6147_v2 = vld [vmem:[%s7666_s1 + $0xa68] sm:$0xff]  }
 0x122   :  { %v5299_v14 = vpop.f32.mrf.mxu0  ;;  %4215 = vmatmul.mubr.bf16.vlgmr.msra.gmra.mxu0 %v1052_v3  ;;  %5613 = vmatprep.subr.bf16.mxu1 %v6108_v8 }
 0x123   :  { %5592 = vmatpush3.bf16.msra.mxu0 %v6107_v6  ;;  %4294 = vmatprep.mubr.bf16.mxu0 %v1073_v7  ;;  %v6149_v7 = vld [vmem:[%s7666_s1 + $0xae8] sm:$0xff]  }
 0x124   :  { %v5300_v17 = vpop.f32.mrf.mxu0  ;;  %v5321_v18 = vpop.f32.mrf.mxu1  ;;  %4255 = vmatmul.mubr.bf16.vlgmr.msra.gmra.mxu1 %v1074_v10  ;;  %5593 = vmatprep.subr.bf16.mxu0 %v6110_v11  ;;  %v6150_v10 = vld [vmem:[%s7666_s1 + $0xaa8] sm:$0xff]  }
 0x125   :  { %v5301_v20 = vadd.f32 %v5300_v17, %v5299_v14  ;;  %5614 = vmatpush3.bf16.msra.mxu1 %v6109_v9  ;;  %4334 = vmatprep.mubr.bf16.mxu1 %v1077_v13 }
 0x126   :  { %v5302_v22 = vpop.f32.mrf.mxu0  ;;  %v5322_v23 = vpop.f32.mrf.mxu1  ;;  %5615 = vmatprep.subr.bf16.mxu1 %v6112_v15  ;;  %v6152_v15 = vld [vmem:[%s7666_s1 + $0xa20] sm:$0xff]  }
 0x127   :  { %v3737_v25 = vadd.f32 %v5301_v20, %v7165_v38  ;;  %v5323_v26 = vadd.f32 %v5322_v23, %v5321_v18  ;;  %5594 = vmatpush3.bf16.msra.mxu0 %v6111_v12  ;;  %v6124_v38 = vld [vmem:[%s7666_s1 + $0x9d8] sm:$0xff]   ;;  %v6151_v12 = vld [vmem:[%s7666_s1 + $0xa60] sm:$0xff]   ;;  %v6159_v23 = vld [vmem:[%s7666_s1 + $0xa50] sm:$0xff]  }
 0x128   :  { %v5303_v28 = vpop.f32.mrf.mxu0  ;;  %5595 = vmatprep.subr.bf16.mxu0 %v6114_v19  ;;  %v5324_v30 = vpop.f32.mrf.mxu1  ;;  %v6154_v18 = vld [vmem:[%s7666_s1 + $0xaa0] sm:$0xff]   ;;  %v6155_v19 = vld [vmem:[%s7666_s1 + $0xa58] sm:$0xff]  }
 0x129   :  { %v7276_v31 = vadd.f32 %v5323_v26, %v3737_v25  ;;  %5616 = vmatpush3.bf16.msra.mxu1 %v6113_v16  ;;  %v6153_v16 = vld [vmem:[%s7666_s1 + $0xae0] sm:$0xff]   ;;  %v6156_v20 = vld [vmem:[%s7666_s1 + $0xa18] sm:$0xff]   ;;  %v6161_v25 = vld [vmem:[%s7666_s1 + $0xad0] sm:$0xff]  }
 0x12a   :  { %5617 = vmatprep.subr.bf16.mxu1 %v6116_v24  ;;  %v5325_v34 = vpop.f32.mrf.mxu1  ;;  %v6158_v22 = vld [vmem:[%s7666_s1 + $0xa98] sm:$0xff]   ;;  %v6160_v24 = vld [vmem:[%s7666_s1 + $0xa10] sm:$0xff]   ;;  %v6165_v28 = vld [vmem:[%s7666_s1 + $0xac8] sm:$0xff]  }
 0x12b   :  { %5596 = vmatpush3.bf16.msra.mxu0 %v6115_v21  ;;  %v6157_v21 = vld [vmem:[%s7666_s1 + $0xad8] sm:$0xff]   ;;  %v6162_v26 = vld [vmem:[%s7666_s1 + $0xa90] sm:$0xff]   ;;  %v6164_v30 = vld [vmem:[%s7666_s1 + $0xa08] sm:$0xff]  }
 0x12c   :  { %5597 = vmatprep.subr.bf16.mxu0 %v6118_v29  ;;  %v33_v29 = vld [vmem:[%s7665_s0 + $0x28] sm:$0xff] }
 0x12d   :  { %5618 = vmatpush3.bf16.msra.mxu1 %v6117_v27  ;;  %v6163_v27 = vld [vmem:[%s7666_s1 + $0xa48] sm:$0xff]  }
 0x12e   :  { %5619 = vmatprep.subr.bf16.mxu1 %v6120_v33  ;;  %v6167_v33 = vld [vmem:[%s7666_s1 + $0xa40] sm:$0xff]   ;;  %v6166_v34 = vld [vmem:[%s7666_s1 + $0xa88] sm:$0xff]  }
 0x12f   :  { %5598 = vmatpush3.bf16.msra.mxu0 %v6119_v32  ;;  %v1078_v32 = vcombine.high %v33_v29, %v33_v29 }
 0x130   :  { %5599 = vmatprep.subr.bf16.mxu0 %v6122_v36 }
 0x131   :  { %5620 = vmatpush3.bf16.msra.mxu1 %v6121_v35  ;;  %v7432_v36 = vrot.slane %v1078_v32, %v6399_v41  ;;  %v6205_v32 = vld [vmem:[%s7666_s1 + $0xc30] sm:$0xff]  }
 0x132   :  { %5621 = vmatprep.subr.bf16.mxu1 %v6124_v38  ;;  %v6168_v38 = vld [vmem:[%s7666_s1 + $0xa00] sm:$0xff]  }
 0x133   :  { %5600 = vmatpush3.bf16.msra.mxu0 %v6123_v37  ;;  %v6169_v37 = vld [vmem:[%s7666_s1 + $0xac0] sm:$0xff]  }
 0x134   :  { %5601 = vmatprep.subr.bf16.mxu0 %v6126_v40  ;;  %v1094_v40 = vcombine.high %v7432_v36, %v7432_v36 }
 0x135   :  { %5622 = vmatpush3.bf16.msra.mxu1 %v6125_v39 }
 0x136   :  { %5623 = vmatprep.subr.bf16.mxu1 %v6128_v43  ;;  %v6171_v43 = vld [vmem:[%s7666_s1 + $0xb78] sm:$0xff]  }
 0x137   :  { %5602 = vmatpush3.bf16.msra.mxu0 %v6127_v42 }
 0x138   :  { %5603 = vmatprep.subr.bf16.mxu0 %v6130_v45 }
 0x139   :  { %5624 = vmatpush3.bf16.msra.mxu1 %v6129_v44  ;;  %v6170_v44 = vld [vmem:[%s7666_s1 + $0xa80] sm:$0xff]  }
 0x13a   :  { %5625 = vmatprep.subr.bf16.mxu1 %v6132_v47  ;;  %v6173_v47 = vld [vmem:[%s7666_s1 + $0xbf8] sm:$0xff]  }
 0x13b   :  { %5604 = vmatpush3.bf16.msra.mxu0 %v6131_v46  ;;  %v1122_v46 = vrot.slane %v1094_v40, %v6399_v41 }
 0x13c   :  { %5605 = vmatprep.subr.bf16.mxu0 %v6134_v49 }
 0x13d   :  { %5626 = vmatpush3.bf16.msra.mxu1 %v6133_v48  ;;  %v6172_v48 = vld [vmem:[%s7666_s1 + $0xb38] sm:$0xff]  }
 0x13e   :  { %5627 = vmatprep.subr.bf16.mxu1 %v6136_v51  ;;  %v6174_v51 = vld [vmem:[%s7666_s1 + $0xbb8] sm:$0xff]  }
 0x13f   :  { %5606 = vmatpush3.bf16.msra.mxu0 %v6135_v50  ;;  %v6175_v50 = vld [vmem:[%s7666_s1 + $0xb70] sm:$0xff]  }
 0x140   :  { %5635 = vmatprep.subr.bf16.mxu0 %v6139_v54  ;;  %v6177_v54 = vld [vmem:[%s7666_s1 + $0xbf0] sm:$0xff]  }
 0x141   :  { %5628 = vmatpush3.bf16.msra.mxu1 %v6138_v52  ;;  %v1126_v52 = vcombine.high %v1122_v46, %v1122_v46 }
 0x142   :  { %v5343_v61 = vpop.f32.mrf.mxu0  ;;  %4295 = vmatmul.mubr.bf16.vlgmr.msra.gmra.mxu0 %v1059_v53  ;;  %5657 = vmatprep.subr.bf16.mxu1 %v6141_v56 }
 0x143   :  { %5636 = vmatpush3.bf16.msra.mxu0 %v6140_v55  ;;  %v6176_v55 = vld [vmem:[%s7666_s1 + $0xb30] sm:$0xff]  }
 0x144   :  { %v5344_v0 = vpop.f32.mrf.mxu0  ;;  %v5365_v1 = vpop.f32.mrf.mxu1  ;;  %4335 = vmatmul.mubr.bf16.vlgmr.msra.gmra.mxu1 %v1075_v58  ;;  %5637 = vmatprep.subr.bf16.mxu0 %v6143_v59  ;;  %v6179_v58 = vld [vmem:[%s7666_s1 + $0xb68] sm:$0xff]  }
 0x145   :  { %v5345_v3 = vadd.f32 %v5344_v0, %v5343_v61  ;;  %5658 = vmatpush3.bf16.msra.mxu1 %v6142_v57 }
 0x146   :  { %v5346_v5 = vpop.f32.mrf.mxu0  ;;  %v5366_v6 = vpop.f32.mrf.mxu1  ;;  %5659 = vmatprep.subr.bf16.mxu1 %v6145_v62 }
 0x147   :  { %v3817_v8 = vadd.f32 %v5345_v3, %v7276_v31  ;;  %v5367_v9 = vadd.f32 %v5366_v6, %v5365_v1  ;;  %5638 = vmatpush3.bf16.msra.mxu0 %v6144_v60  ;;  %v1085_v31 = vrot.slane %v33_v29, %v6399_v41  ;;  %v6178_v60 = vld [vmem:[%s7666_s1 + $0xbb0] sm:$0xff]   ;;  %v6204_v29 = vld [vmem:[%s7666_s1 + $0xc38] sm:$0xff]  }
 0x148   :  { %v5347_v11 = vpop.f32.mrf.mxu0  ;;  %5639 = vmatprep.subr.bf16.mxu0 %v6147_v2  ;;  %v5368_v13 = vpop.f32.mrf.mxu1  ;;  %v6180_v2 = vld [vmem:[%s7666_s1 + $0xb28] sm:$0xff]  }
 0x149   :  { %v7377_v14 = vadd.f32 %v5367_v9, %v3817_v8  ;;  %5660 = vmatpush3.bf16.msra.mxu1 %v6146_v63  ;;  %v1093_v35 = vcombine.high %v1085_v31, %v1085_v31  ;;  %v1101_v42 = vrot.slane %v1085_v31, %v6399_v41  ;;  %v6181_v63 = vld [vmem:[%s7666_s1 + $0xbe8] sm:$0xff]   ;;  %v6185_v8 = vld [vmem:[%s7666_s1 + $0xbe0] sm:$0xff]   ;;  %v6187_v11 = vld [vmem:[%s7666_s1 + $0xb58] sm:$0xff]  }
 0x14a   :  { %5661 = vmatprep.subr.bf16.mxu1 %v6149_v7  ;;  %v5369_v17 = vpop.f32.mrf.mxu1  ;;  %v6182_v7 = vld [vmem:[%s7666_s1 + $0xba8] sm:$0xff]   ;;  %v6189_v13 = vld [vmem:[%s7666_s1 + $0xbd8] sm:$0xff]  }
 0x14b   :  { %5640 = vmatpush3.bf16.msra.mxu0 %v6148_v4  ;;  %v1115_v39 = vrot.slane %v1093_v35, %v6399_v41  ;;  %v1123_v49 = vcombine.high %v1101_v42, %v1101_v42  ;;  %v6183_v4 = vld [vmem:[%s7666_s1 + $0xb60] sm:$0xff]   ;;  %v6193_v17 = vld [vmem:[%s7666_s1 + $0xbd0] sm:$0xff]  }
 0x14c   :  { %5641 = vmatprep.subr.bf16.mxu0 %v6151_v12  ;;  %v6186_v12 = vld [vmem:[%s7666_s1 + $0xba0] sm:$0xff]  }
 0x14d   :  { %5662 = vmatpush3.bf16.msra.mxu1 %v6150_v10  ;;  %4374 = vmatprep.mubr.bf16.mxu0 %v1115_v39  ;;  %v1125_v45 = vcombine.high %v1115_v39, %v1115_v39  ;;  %v6184_v10 = vld [vmem:[%s7666_s1 + $0xb20] sm:$0xff]  }
 0x14e   :  { %5663 = vmatprep.subr.bf16.mxu1 %v6153_v16  ;;  %v6190_v16 = vld [vmem:[%s7666_s1 + $0xb98] sm:$0xff]  }
 0x14f   :  { %5642 = vmatpush3.bf16.msra.mxu0 %v6152_v15  ;;  %4414 = vmatprep.mubr.bf16.mxu1 %v1125_v45  ;;  %v6191_v15 = vld [vmem:[%s7666_s1 + $0xb50] sm:$0xff]  }
 0x150   :  { %5643 = vmatprep.subr.bf16.mxu0 %v6155_v19  ;;  %v6195_v19 = vld [vmem:[%s7666_s1 + $0xb48] sm:$0xff]  }
 0x151   :  { %5664 = vmatpush3.bf16.msra.mxu1 %v6154_v18  ;;  %v6192_v18 = vld [vmem:[%s7666_s1 + $0xb10] sm:$0xff]  }
 0x152   :  { %5665 = vmatprep.subr.bf16.mxu1 %v6157_v21  ;;  %v6197_v21 = vld [vmem:[%s7666_s1 + $0xbc8] sm:$0xff]  }
 0x153   :  { %5644 = vmatpush3.bf16.msra.mxu0 %v6156_v20  ;;  %v6194_v20 = vld [vmem:[%s7666_s1 + $0xb90] sm:$0xff]  }
 0x154   :  { %5645 = vmatprep.subr.bf16.mxu0 %v6159_v23  ;;  %v6199_v23 = vld [vmem:[%s7666_s1 + $0xb40] sm:$0xff]  }
 0x155   :  { %5666 = vmatpush3.bf16.msra.mxu1 %v6158_v22  ;;  %v6196_v22 = vld [vmem:[%s7666_s1 + $0xb08] sm:$0xff]  }
 0x156   :  { %5667 = vmatprep.subr.bf16.mxu1 %v6161_v25  ;;  %v6201_v25 = vld [vmem:[%s7666_s1 + $0xbc0] sm:$0xff]  }
 0x157   :  { %5646 = vmatpush3.bf16.msra.mxu0 %v6160_v24  ;;  %v6198_v24 = vld [vmem:[%s7666_s1 + $0xb88] sm:$0xff]  }
 0x158   :  { %5647 = vmatprep.subr.bf16.mxu0 %v6163_v27  ;;  %v1108_v27 = vrot.slane %v7432_v36, %v6399_v41 }
 0x159   :  { %5668 = vmatpush3.bf16.msra.mxu1 %v6162_v26  ;;  %v6200_v26 = vld [vmem:[%s7666_s1 + $0xb00] sm:$0xff]  }
 0x15a   :  { %5669 = vmatprep.subr.bf16.mxu1 %v6165_v28  ;;  %v6203_v28 = vld [vmem:[%s7666_s1 + $0xb80] sm:$0xff]   ;;  %v1124_v31 = vcombine.high %v1108_v27, %v1108_v27 }
 0x15b   :  { %5648 = vmatpush3.bf16.msra.mxu0 %v6164_v30  ;;  %v6251_v30 = vmov 0.0  }
 0x15c   :  { %5649 = vmatprep.subr.bf16.mxu0 %v6167_v33 }
 0x15d   :  { %5670 = vmatpush3.bf16.msra.mxu1 %v6166_v34 }
 0x15e   :  { %5671 = vmatprep.subr.bf16.mxu1 %v6169_v37  ;;  %v6206_v37 = vld [vmem:[%s7666_s1 + $0xc28] sm:$0xff]  }
 0x15f   :  { %5650 = vmatpush3.bf16.msra.mxu0 %v6168_v38 }
 0x160   :  { %5679 = vmatprep.subr.bf16.mxu0 %v6171_v43 }
 0x161   :  { %5672 = vmatpush3.bf16.msra.mxu1 %v6170_v44 }
 0x162   :  { %v5387_v53 = vpop.f32.mrf.mxu0  ;;  %4375 = vmatmul.mubr.bf16.vlgmr.msra.gmra.mxu0 %v1101_v42  ;;  %5701 = vmatprep.subr.bf16.mxu1 %v6173_v47 }
 0x163   :  { %5680 = vmatpush3.bf16.msra.mxu0 %v6172_v48  ;;  %4454 = vmatprep.mubr.bf16.mxu0 %v1122_v46 }
 0x164   :  { %v5388_v56 = vpop.f32.mrf.mxu0  ;;  %v5409_v57 = vpop.f32.mrf.mxu1  ;;  %4415 = vmatmul.mubr.bf16.vlgmr.msra.gmra.mxu1 %v1123_v49  ;;  %5681 = vmatprep.subr.bf16.mxu0 %v6175_v50 }
 0x165   :  { %v5389_v59 = vadd.f32 %v5388_v56, %v5387_v53  ;;  %5702 = vmatpush3.bf16.msra.mxu1 %v6174_v51  ;;  %4494 = vmatprep.mubr.bf16.mxu1 %v1126_v52 }
 0x166   :  { %v5390_v61 = vpop.f32.mrf.mxu0  ;;  %v5410_v62 = vpop.f32.mrf.mxu1  ;;  %5703 = vmatprep.subr.bf16.mxu1 %v6177_v54 }
 0x167   :  { %v3897_v0 = vadd.f32 %v5389_v59, %v7377_v14  ;;  %v5411_v1 = vadd.f32 %v5410_v62, %v5409_v57  ;;  %5682 = vmatpush3.bf16.msra.mxu0 %v6176_v55  ;;  %v6188_v14 = vld [vmem:[%s7666_s1 + $0xb18] sm:$0xff]  }
 0x168   :  { %v5391_v3 = vpop.f32.mrf.mxu0  ;;  %5683 = vmatprep.subr.bf16.mxu0 %v6179_v58  ;;  %v5412_v5 = vpop.f32.mrf.mxu1 }
 0x169   :  { %v7485_v6 = vadd.f32 %v5411_v1, %v3897_v0  ;;  %5704 = vmatpush3.bf16.msra.mxu1 %v6178_v60 }
 0x16a   :  { %5705 = vmatprep.subr.bf16.mxu1 %v6181_v63  ;;  %v5413_v9 = vpop.f32.mrf.mxu1 }
 0x16b   :  { %5684 = vmatpush3.bf16.msra.mxu0 %v6180_v2 }
 0x16c   :  { %5685 = vmatprep.subr.bf16.mxu0 %v6183_v4 }
 0x16d   :  { %5706 = vmatpush3.bf16.msra.mxu1 %v6182_v7 }
 0x16e   :  { %5707 = vmatprep.subr.bf16.mxu1 %v6185_v8 }
 0x16f   :  { %5686 = vmatpush3.bf16.msra.mxu0 %v6184_v10 }
 0x170   :  { %5687 = vmatprep.subr.bf16.mxu0 %v6187_v11 }
 0x171   :  { %5708 = vmatpush3.bf16.msra.mxu1 %v6186_v12 }
 0x172   :  { %5709 = vmatprep.subr.bf16.mxu1 %v6189_v13 }
 0x173   :  { %5688 = vmatpush3.bf16.msra.mxu0 %v6188_v14 }
 0x174   :  { %5689 = vmatprep.subr.bf16.mxu0 %v6191_v15 }
 0x175   :  { %5710 = vmatpush3.bf16.msra.mxu1 %v6190_v16 }
 0x176   :  { %5711 = vmatprep.subr.bf16.mxu1 %v6193_v17 }
 0x177   :  { %5690 = vmatpush3.bf16.msra.mxu0 %v6192_v18 }
 0x178   :  { %5691 = vmatprep.subr.bf16.mxu0 %v6195_v19 }
 0x179   :  { %5712 = vmatpush3.bf16.msra.mxu1 %v6194_v20 }
 0x17a   :  { %5713 = vmatprep.subr.bf16.mxu1 %v6197_v21 }
 0x17b   :  { %5692 = vmatpush3.bf16.msra.mxu0 %v6196_v22 }
 0x17c   :  { %5693 = vmatprep.subr.bf16.mxu0 %v6199_v23 }
 0x17d   :  { %5714 = vmatpush3.bf16.msra.mxu1 %v6198_v24 }
 0x17e   :  { %5715 = vmatprep.subr.bf16.mxu1 %v6201_v25 }
 0x17f   :  { %5694 = vmatpush3.bf16.msra.mxu0 %v6200_v26 }
 0x180   :  { %5750 = vmatprep.subr.bf16.mxu0 %v6251_v30 }
 0x181   :  { %5716 = vmatpush3.bf16.msra.mxu1 %v6203_v28 }
 0x182   :  { %v5431_v33 = vpop.f32.mrf.mxu0  ;;  %4455 = vmatmul.mubr.bf16.vlgmr.msra.gmra.mxu0 %v1108_v27  ;;  %5770 = vmatprep.subr.bf16.mxu1 %v6251_v30 }
 0x183   :  { %5751 = vmatpush3.bf16.msra.mxu0 %v6204_v29  ;;  %5766 = vmatprep.mubr.msk.bf16.mxu0 %vm6252_vm0, %v6251_v30 }
 0x184   :  { %v5432_v34 = vpop.f32.mrf.mxu0  ;;  %v5453_v35 = vpop.f32.mrf.mxu1  ;;  %4495 = vmatmul.mubr.bf16.vlgmr.msra.gmra.mxu1 %v1124_v31  ;;  %5752 = vmatprep.subr.bf16.mxu0 %v6251_v30 }
 0x185   :  { %v5433_v36 = vadd.f32 %v5432_v34, %v5431_v33  ;;  %5786 = vmatprep.mubr.msk.bf16.mxu1 %vm6252_vm0, %v6251_v30 }
 0x186   :  { %v5434_v38 = vpop.f32.mrf.mxu0  ;;  %v5454_v39 = vpop.f32.mrf.mxu1 }
 0x187   :  { %v3977_v40 = vadd.f32 %v5433_v36, %v7485_v6  ;;  %v5455_v42 = vadd.f32 %v5454_v39, %v5453_v35  ;;  %5753 = vmatpush3.bf16.msra.mxu0 %v6205_v32 }
 0x188   :  { %v5435_v43 = vpop.f32.mrf.mxu0  ;;  %5754 = vmatprep.subr.bf16.mxu0 %v6251_v30  ;;  %v5456_v44 = vpop.f32.mrf.mxu1 }
 0x189   :  { %v4017_v45 = vadd.f32 %v5455_v42, %v3977_v40 }
 0x18a   :  { %v5457_v46 = vpop.f32.mrf.mxu1 }
 0x18b   :  { %12 = vsyncpa [#allocation3], 0  ;;  %5755 = vmatpush3.bf16.msra.mxu0 %v6206_v37  ;;  %v6207_v47 = vld [vmem:[%s7666_s1 + $0xc20] sm:$0xff]   ;;  %v6208_v48 = vld [vmem:[%s7666_s1 + $0xc18] sm:$0xff]   ;;  %s6253_s12 = smov [#allocation2]  }
 0x18c   :  { %5756 = vmatprep.subr.bf16.mxu0 %v6251_v30  ;;  %v6209_v49 = vld [vmem:[%s7666_s1 + $0xc10] sm:$0xff]   ;;  %v6210_v50 = vld [vmem:[%s7666_s1 + $0xc08] sm:$0xff]   ;;  %v6211_v51 = vld [vmem:[%s7666_s1 + $0xc00] sm:$0xff]   ;;  %s4775_s13 = sshll.u32 %s6253_s12, 4  ;;  %s4776_s13 = int_to_ptr.vmem [resolvable:$true] %s4775_s13 }
 0x18d   :  { %v4784_v52 = vld.sshfl [vmem:[%s7665_s0 + $0x30] sm:$0x1 pattern:$0x75316420]  ;;  %v6212_v11 = vld [vmem:[%s7668_s3 + $0x38] sm:$0xff]   ;;  %v6214_v15 = vld [vmem:[%s7668_s3 + $0x28] sm:$0xff]   ;;  %p6233_p1 = scmp.lt.s32.totalorder %s4776_s13, %s4776_s13 }
 0x18e   :  { %v1140_v53 = vrot.slane %v4784_v52, %v6399_v41  ;;  %5771 = vmatpush3.bf16.msra.mxu1 %v6212_v11  ;;  %v6213_v14 = vld [vmem:[%s7668_s3 + $0x30] sm:$0xff]   ;;  %v6215_v16 = vld [vmem:[%s7668_s3 + $0x20] sm:$0xff]   ;;  %v6216_v17 = vld [vmem:[%s7668_s3 + $0x18] sm:$0xff]  }
 0x18f   :  { %5757 = vmatpush3.bf16.msra.mxu0 %v6207_v47  ;;  %5772 = vmatprep.subr.bf16.mxu1 %v6251_v30  ;;  %v6217_v18 = vld [vmem:[%s7668_s3 + $0x10] sm:$0xff]   ;;  %v6218_v19 = vld [vmem:[%s7668_s3 + $0x8] sm:$0xff]   ;;  %v6219_v23 = vld [vmem:[%s7668_s3] sm:$0xff]  }
 0x190   :  { %5758 = vmatprep.subr.bf16.mxu0 %v6251_v30  ;;  %v6220_v33 = vld [vmem:[%s7670_s5 + $0x38] sm:$0xff]   ;;  %v6221_v35 = vld [vmem:[%s7670_s5 + $0x30] sm:$0xff]   ;;  %v6222_v36 = vld [vmem:[%s7670_s5 + $0x28] sm:$0xff]  }
 0x191   :  { %v6223_v37 = vld [vmem:[%s7670_s5 + $0x20] sm:$0xff]   ;;  %v6224_v38 = vld [vmem:[%s7670_s5 + $0x18] sm:$0xff]   ;;  %v6225_v39 = vld [vmem:[%s7670_s5 + $0x10] sm:$0xff]  }
 0x192   :  { %5773 = vmatpush3.bf16.msra.mxu1 %v6213_v14 }
 0x193   :  { %5759 = vmatpush3.bf16.msra.mxu0 %v6208_v48  ;;  %5774 = vmatprep.subr.bf16.mxu1 %v6251_v30 }
 0x194   :  { %5760 = vmatprep.subr.bf16.mxu0 %v6251_v30 }
 0x196   :  { %5775 = vmatpush3.bf16.msra.mxu1 %v6214_v15 }
 0x197   :  { %5761 = vmatpush3.bf16.msra.mxu0 %v6209_v49  ;;  %5776 = vmatprep.subr.bf16.mxu1 %v6251_v30 }
 0x198   :  { %5762 = vmatprep.subr.bf16.mxu0 %v6251_v30 }
 0x19a   :  { %5777 = vmatpush3.bf16.msra.mxu1 %v6215_v16 }
 0x19b   :  { %5763 = vmatpush3.bf16.msra.mxu0 %v6210_v50  ;;  %5778 = vmatprep.subr.bf16.mxu1 %v6251_v30 }
 0x19c   :  { %5764 = vmatprep.subr.bf16.mxu0 %v6251_v30 }
 0x19e   :  { %5779 = vmatpush3.bf16.msra.mxu1 %v6216_v17 }
 0x19f   :  { %5765 = vmatpush3.bf16.msra.mxu0 %v6211_v51  ;;  %5780 = vmatprep.subr.bf16.mxu1 %v6251_v30 }
 0x1a0   :  { %5790 = vmatprep.subr.bf16.mxu0 %v6251_v30 }
 0x1a2   :  { %v5475_v54 = vpop.f32.mrf.mxu0  ;;  %5767 = vmatmul.mubr.bf16.vlgmr.msra.gmra.mxu0 %v1140_v53  ;;  %5781 = vmatpush3.bf16.msra.mxu1 %v6217_v18 }
 0x1a3   :  { %5806 = vmatprep.mubr.msk.bf16.mxu0 %vm6252_vm0, %v6251_v30  ;;  %5782 = vmatprep.subr.bf16.mxu1 %v6251_v30 }
 0x1a4   :  { %v5476_v55 = vpop.f32.mrf.mxu0  ;;  %v5497_v56 = vpop.f32.mrf.mxu1  ;;  %5791 = vmatpush3.bf16.msra.mxu0 %v6220_v33 }
 0x1a5   :  { %v5477_v57 = vadd.f32 %v5476_v55, %v5475_v54  ;;  %5792 = vmatprep.subr.bf16.mxu0 %v6251_v30 }
 0x1a6   :  { %v5478_v58 = vpop.f32.mrf.mxu0  ;;  %v5498_v59 = vpop.f32.mrf.mxu1  ;;  %5783 = vmatpush3.bf16.msra.mxu1 %v6218_v19  ;;  %v6226_v19 = vld [vmem:[%s7670_s5 + $0x8] sm:$0xff]  }
 0x1a7   :  { %v4057_v60 = vadd.f32 %v5477_v57, %v4017_v45  ;;  %v5499_v61 = vadd.f32 %v5498_v59, %v5497_v56  ;;  %5784 = vmatprep.subr.bf16.mxu1 %v6251_v30 }
 0x1a8   :  { %v5479_v62 = vpop.f32.mrf.mxu0  ;;  %v5500_v63 = vpop.f32.mrf.mxu1  ;;  %5793 = vmatpush3.bf16.msra.mxu0 %v6221_v35 }
 0x1a9   :  { %v4097_v0 = vadd.f32 %v5499_v61, %v4057_v60  ;;  %5794 = vmatprep.subr.bf16.mxu0 %v6251_v30 }
 0x1aa   :  { %v5501_v1 = vpop.f32.mrf.mxu1  ;;  %5785 = vmatpush3.bf16.msra.mxu1 %v6219_v23 }
 0x1ac   :  { %5795 = vmatpush3.bf16.msra.mxu0 %v6222_v36 }
 0x1ad   :  { %5796 = vmatprep.subr.bf16.mxu0 %v6251_v30 }
 0x1b0   :  { %5797 = vmatpush3.bf16.msra.mxu0 %v6223_v37 }
 0x1b1   :  { %5798 = vmatprep.subr.bf16.mxu0 %v6251_v30 }
 0x1b4   :  { %5799 = vmatpush3.bf16.msra.mxu0 %v6224_v38 }
 0x1b5   :  { %5800 = vmatprep.subr.bf16.mxu0 %v6251_v30 }
 0x1b8   :  { %5801 = vmatpush3.bf16.msra.mxu0 %v6225_v39 }
 0x1b9   :  { %5802 = vmatprep.subr.bf16.mxu0 %v6251_v30 }
 0x1bc   :  { %5803 = vmatpush3.bf16.msra.mxu0 %v6226_v19 }
 0x1bd   :  { %5804 = vmatprep.subr.bf16.mxu0 %v6251_v30  ;;  %v5186_v30 = vld [vmem:[%s7671_s6] ss:$0 sm:$0xff] }
 0x1c2   :  { %v5519_v41 = vpop.f32.mrf.mxu0 }
 0x1c4   :  { %v5520_v2 = vpop.f32.mrf.mxu0  ;;  %v5541_v3 = vpop.f32.mrf.mxu1 }
 0x1c5   :  { %v5521_v4 = vadd.f32 %v5520_v2, %v5519_v41 }
 0x1c6   :  { %v5522_v5 = vpop.f32.mrf.mxu0  ;;  %v5542_v6 = vpop.f32.mrf.mxu1 }
 0x1c7   :  { %v4137_v7 = vadd.f32 %v5521_v4, %v4097_v0  ;;  %v5543_v8 = vadd.f32 %v5542_v6, %v5541_v3 }
 0x1c8   :  { %v5523_v9 = vpop.f32.mrf.mxu0  ;;  %v5544_v10 = vpop.f32.mrf.mxu1 }
 0x1c9   :  { %v4177_v12 = vadd.f32 %v5543_v8, %v4137_v7 }
 0x1ca   :  { %v5545_v13 = vpop.f32.mrf.mxu1 }
 0x1e2   :  { %v5563_v20 = vpop.f32.mrf.mxu0 }
 0x1e4   :  { %v5564_v21 = vpop.f32.mrf.mxu0  ;;  %v5585_v22 = vpop.f32.mrf.mxu1 }
 0x1e5   :  { %v5565_v24 = vadd.f32 %v5564_v21, %v5563_v20  ;;  %v6227_v20 = vld [vmem:[%s7670_s5] sm:$0xff]  }
 0x1e6   :  { %v5566_v25 = vpop.f32.mrf.mxu0  ;;  %v5586_v26 = vpop.f32.mrf.mxu1  ;;  %5805 = vmatpush3.bf16.msra.mxu0 %v6227_v20  ;;  %v5177_v21 = vld [vmem:[%s7669_s4] ss:$0 sm:$0xff]  ;;  %s6228_s4 = scalar_lea.vmem %s4776_s13, 32 }
 0x1e7   :  { %v4217_v27 = vadd.f32 %v5565_v24, %v4177_v12  ;;  %v5587_v28 = vadd.f32 %v5586_v26, %v5585_v22  ;;  %p6229_p0 = scmp.ne.s32.totalorder %s4776_s13, %s6228_s4  ;;  %p6234_p2 = scmp.lt.s32.totalorder %s6228_s4, %s6228_s4 }
 0x1e8   :  { %v5567_v29 = vpop.f32.mrf.mxu0  ;;  %v5588_v31 = vpop.f32.mrf.mxu1 }
 0x1e9   :  { %v4257_v32 = vadd.f32 %v5587_v28, %v4217_v27  ;;  %p6235_p3 = por %p6234_p2, %p6233_p1 }
 0x1ea   :  { %v5589_v34 = vpop.f32.mrf.mxu1 }
 0x1eb   :  { %p6236_p4 = pnand %p6235_p3, %p6229_p0 }
 0x202   :  { %v5607_v40 = vpop.f32.mrf.mxu0 }
 0x204   :  { %v5608_v42 = vpop.f32.mrf.mxu0  ;;  %v5629_v43 = vpop.f32.mrf.mxu1 }
 0x205   :  { %v5609_v44 = vadd.f32 %v5608_v42, %v5607_v40 }
 0x206   :  { %v5610_v45 = vpop.f32.mrf.mxu0  ;;  %v5630_v46 = vpop.f32.mrf.mxu1 }
 0x207   :  { %v4297_v47 = vadd.f32 %v5609_v44, %v4257_v32  ;;  %v5631_v48 = vadd.f32 %v5630_v46, %v5629_v43 }
 0x208   :  { %v5611_v49 = vpop.f32.mrf.mxu0  ;;  %v5632_v50 = vpop.f32.mrf.mxu1 }
 0x209   :  { %v4337_v51 = vadd.f32 %v5631_v48, %v4297_v47 }
 0x20a   :  { %v5633_v52 = vpop.f32.mrf.mxu1 }
 0x222   :  { %v5651_v53 = vpop.f32.mrf.mxu0 }
 0x224   :  { %v5652_v54 = vpop.f32.mrf.mxu0  ;;  %v5673_v55 = vpop.f32.mrf.mxu1 }
 0x225   :  { %v5653_v4 = vadd.f32 %v5652_v54, %v5651_v53 }
 0x226   :  { %v5654_v56 = vpop.f32.mrf.mxu0  ;;  %v5674_v57 = vpop.f32.mrf.mxu1 }
 0x227   :  { %v4377_v5 = vadd.f32 %v5653_v4, %v4337_v51  ;;  %v5675_v6 = vadd.f32 %v5674_v57, %v5673_v55 }
 0x228   :  { %v5655_v58 = vpop.f32.mrf.mxu0  ;;  %v5676_v59 = vpop.f32.mrf.mxu1 }
 0x229   :  { %v4417_v8 = vadd.f32 %v5675_v6, %v4377_v5 }
 0x22a   :  { %v5677_v60 = vpop.f32.mrf.mxu1 }
 0x242   :  { %v5695_v61 = vpop.f32.mrf.mxu0 }
 0x244   :  { %v5696_v62 = vpop.f32.mrf.mxu0  ;;  %v5717_v63 = vpop.f32.mrf.mxu1 }
 0x245   :  { %v5697_v7 = vadd.f32 %v5696_v62, %v5695_v61 }
 0x246   :  { %v5698_v0 = vpop.f32.mrf.mxu0  ;;  %v5718_v1 = vpop.f32.mrf.mxu1 }
 0x247   :  { %v4457_v9 = vadd.f32 %v5697_v7, %v4417_v8  ;;  %v5719_v10 = vadd.f32 %v5718_v1, %v5717_v63 }
 0x248   :  { %v5699_v41 = vpop.f32.mrf.mxu0  ;;  %v5720_v2 = vpop.f32.mrf.mxu1 }
 0x249   :  { %v4497_v11 = vadd.f32 %v5719_v10, %v4457_v9 }
 0x24a   :  { %v5721_v3 = vpop.f32.mrf.mxu1 }
 0x262   :  { %v4536_v12 = vpop.f32.mrf.mxu0 }
 0x263   :  { %v4537_v13 = vadd.f32 %v4536_v12, %v4497_v11 }
 0x264   :  { %v5768_v14 = vpop.f32.mrf.mxu0 }
 0x265   :  { %v4542_v15 = vmax.f32 %v4537_v13, 0.0 }
 0x266   :  { %v4539_v16 = vpop.f32.mrf.mxu0 }
 0x267   :  { %v4543_v17 = vpack.c.bf16 %v4542_v15, %v4542_v15 }
 0x268   :  { %v5769_v18 = vpop.f32.mrf.mxu0 }
 0x269   :  { %5787 = vmatmul.mubr.bf16.vlgmr.msra.gmra.mxu1 %v4543_v17 }
 0x329   :  { %v4649_v22 = vpop.f32.mrf.mxu1 }
 0x32a   :  { %v4650_v23 = vadd.f32 %v5177_v21, %v4649_v22 }
 0x32b   :  { %v5788_v24 = vpop.f32.mrf.mxu1 }
 0x32c   :  { %v4655_v25 = vmax.f32 %v4650_v23, 0.0 }
 0x32d   :  { %v4652_v26 = vpop.f32.mrf.mxu1 }
 0x32e   :  { %v4656_v27 = vpack.c.bf16 %v4655_v25, %v4655_v25 }
 0x32f   :  { %v5789_v28 = vpop.f32.mrf.mxu1 }
 0x330   :  { %5807 = vmatmul.mubr.bf16.vlgmr.msra.gmra.mxu0 %v4656_v27 }
 0x3f0   :  { %v4762_v29 = vpop.f32.mrf.mxu0 }
 0x3f1   :  { %v4763_v31 = vadd.f32 %v5186_v30, %v4762_v29 }
 0x3f2   :  { %v5808_v32 = vpop.f32.mrf.mxu0 }
 0x3f3   :  { %4768 = vst [vmem:[#allocation2] sm:$0x3] %v4763_v31 }
 0x3f4   :  { %v4765_v33 = vpop.f32.mrf.mxu0 }
 0x3f5   :  { %6239 = shalt.err (!%p6236_p4)
}
 0x3f6   :  { %4778 = dma.vmem_to_hbm [thread:$0]  %s4776_s13, 32, %s7672_s7, [#allocation3]   ;;  %v5809_v34 = vpop.f32.mrf.mxu0 }
 0x3f7   :  { %6248 = dma.done.wait [#allocation3], 32  }
 0x3f8   :  { %6249 = vsyncadd [#allocation3], 4294967264 }
 0x3f9   :  { %4782 = vsyncpa [#allocation3], 1 }

</bundles_post_ra>
